<compile_context>
chip_gen: v5e
topology: v5e:2x2
jax: 0.10.0
libtpu: 0.0.40
codegen_flags: <defaults>
</compile_context>

<pallas_src>
import jax
import jax.numpy as jnp
import numpy as np
from jax.experimental import pallas as pl
from jax.experimental.pallas import tpu as pltpu


def _round_up(n, m):
    return ((n + m - 1) // m) * m


# --------------------------------------------------------------------------
# Kernel 1: h0/c0 prologue — one fused matmul  img @ [w_h0 | w_c0] + [b_h0|b_c0]
# --------------------------------------------------------------------------
def init_state_kernel(img_ref, w_ref, b_ref, hc0_ref):
    hc0_ref[...] = (
        jnp.dot(img_ref[...], w_ref[...], preferred_element_type=jnp.float32)
        + b_ref[...])


# --------------------------------------------------------------------------
# Kernel 2: full LSTM recurrence in ONE invocation (time loop unrolled).
#   hc0_ref : (Bt, 2*Hp) f32      emb_ref : (T, Bt, Ep) bf16
#   w_ih    : (Ep, 4*Hp) bf16     w_hh    : (Hp, 4*Hp) bf16
#   b_g     : (1, 4*Hp)  f32      hs_ref  : (T, Bt, Hp) bf16  (output)
# --------------------------------------------------------------------------
def lstm_seq_kernel(hc0_ref, emb_ref, w_ih_ref, w_hh_ref, b_g_ref, hs_ref):
    T = emb_ref.shape[0]
    Hp = w_hh_ref.shape[0]

    w_ih = w_ih_ref[...]
    w_hh = w_hh_ref[...]
    b_g = b_g_ref[...]

    h = hc0_ref[:, :Hp]          # f32 (Bt, Hp)
    c = hc0_ref[:, Hp:]          # f32 (Bt, Hp)

    # TODO(synk): for very long sequences switch to lax.fori_loop with h/c in
    # VMEM scratch; at small T a fully-unrolled loop gives the scheduler full
    # visibility and all stores are static / sublane-aligned.
    for t in range(T):
        x_t = emb_ref[t]         # bf16 (Bt, Ep)
        gates = (jnp.dot(x_t, w_ih, preferred_element_type=jnp.float32)
                 + jnp.dot(h.astype(jnp.bfloat16), w_hh,
                           preferred_element_type=jnp.float32)
                 + b_g)          # f32 (Bt, 4*Hp), gate order i,f,g,o

        # 128-lane-aligned gate slices (Hp is a multiple of 128).
        i_g = jax.nn.sigmoid(gates[:, 0 * Hp:1 * Hp])
        f_g = jax.nn.sigmoid(gates[:, 1 * Hp:2 * Hp])
        g_g = jnp.tanh(gates[:, 2 * Hp:3 * Hp])
        o_g = jax.nn.sigmoid(gates[:, 3 * Hp:4 * Hp])

        c = f_g * c + i_g * g_g
        h = o_g * jnp.tanh(c)

        hs_ref[t] = h.astype(hs_ref.dtype)


# --------------------------------------------------------------------------
# Kernel 3: batched, lane-dense logits projection  hs @ w_log + b_log
# --------------------------------------------------------------------------
def logits_kernel(hs_ref, w_ref, b_ref, out_ref):
    out_ref[...] = (
        jnp.dot(hs_ref[...], w_ref[...], preferred_element_type=jnp.float32)
        + b_ref[...])


# --------------------------------------------------------------------------
# Wrapper
# --------------------------------------------------------------------------
def caption_net_forward(params, image_vectors, captions):
    B, F = image_vectors.shape
    T = captions.shape[1]
    V, E = params["emb"].shape
    H = params["w_hh"].shape[0]

    Bp = _round_up(max(B, 8), 8)     # sublane-aligned batch
    Fp = _round_up(F, 128)
    Ep = _round_up(E, 128)
    Hp = _round_up(H, 128)
    Vp = _round_up(V, 128)

    f32, bf16 = jnp.float32, jnp.bfloat16

    # ---- parameter repacking (zero padding => numerically exact) ----------
    img_p = jnp.pad(image_vectors, ((0, Bp - B), (0, Fp - F))).astype(bf16)

    w_hc0 = jnp.concatenate(
        [jnp.pad(params["w_h0"], ((0, Fp - F), (0, Hp - H))),
         jnp.pad(params["w_c0"], ((0, Fp - F), (0, Hp - H)))],
        axis=1).astype(bf16)                                    # (Fp, 2Hp)
    b_hc0 = jnp.concatenate(
        [jnp.pad(params["b_h0"], ((0, 0), (0, Hp - H))),
         jnp.pad(params["b_c0"], ((0, 0), (0, Hp - H)))],
        axis=1).astype(f32)                                     # (1, 2Hp)

    def repack_gates(w, rows_p):
        # [rows, 4H] -> [rows_p, 4Hp]; each gate block lane-aligned at k*Hp.
        blocks = [
            jnp.pad(w[:, k * H:(k + 1) * H],
                    ((0, rows_p - w.shape[0]), (0, Hp - H)))
            for k in range(4)
        ]
        return jnp.concatenate(blocks, axis=1)

    w_ih_p = repack_gates(params["w_ih"], Ep).astype(bf16)      # (Ep, 4Hp)
    w_hh_p = repack_gates(params["w_hh"], Hp).astype(bf16)      # (Hp, 4Hp)
    b_g_p = repack_gates(params["b_g"], 1).astype(f32)          # (1, 4Hp)

    w_log_p = jnp.pad(params["w_log"],
                      ((0, Hp - H), (0, Vp - V))).astype(bf16)  # (Hp, Vp)
    b_log_p = jnp.pad(params["b_log"], ((0, 0), (0, Vp - V))).astype(f32)

    # Embedding lookup kept in plain JAX glue (token-id gather), then
    # time-major + padded + bf16.
    # TODO(synk): at production scale, gather rows in-kernel from
    # scalar-prefetched caption ids instead of materializing [T,B,E] in HBM.
    emb_seq = jnp.take(params["emb"], captions, axis=0)          # [B, T, E]
    emb_tm = jnp.transpose(emb_seq, (1, 0, 2))                   # [T, B, E]
    emb_tm = jnp.pad(emb_tm,
                     ((0, 0), (0, Bp - B), (0, Ep - E))).astype(bf16)

    # ---- 1) h0/c0 prologue (single MXU pass; whole arrays in VMEM) --------
    hc0 = pl.pallas_call(
        init_state_kernel,
        out_shape=jax.ShapeDtypeStruct((Bp, 2 * Hp), f32),
    )(img_p, w_hc0, b_hc0)

    # ---- 2) single-invocation recurrence, batch-tiled "parallel" grid -----
    Bt = 8                       # one f32 sublane group per tile
    n_bt = Bp // Bt
    hs = pl.pallas_call(
        lstm_seq_kernel,
        out_shape=jax.ShapeDtypeStruct((T, Bp, Hp), bf16),
        grid_spec=pltpu.PrefetchScalarGridSpec(
            num_scalar_prefetch=0,
            grid=(n_bt,),
            in_specs=[
                pl.BlockSpec((Bt, 2 * Hp), lambda i: (i, 0)),     # hc0
                pl.BlockSpec((T, Bt, Ep), lambda i: (0, i, 0)),   # emb (time-major)
                pl.BlockSpec((Ep, 4 * Hp), lambda i: (0, 0)),     # w_ih (resident)
                pl.BlockSpec((Hp, 4 * Hp), lambda i: (0, 0)),     # w_hh (resident)
                pl.BlockSpec((1, 4 * Hp), lambda i: (0, 0)),      # b_g  (resident)
            ],
            out_specs=pl.BlockSpec((T, Bt, Hp), lambda i: (0, i, 0)),
        ),
        compiler_params=pltpu.CompilerParams(
            dimension_semantics=("parallel",),   # independent batch tiles
        ),
    )(hc0, emb_tm, w_ih_p, w_hh_p, b_g_p)

    # ---- 3) hoisted, batched, lane-dense logits matmul ---------------------
    rows = T * Bp
    hs_flat = hs.reshape(rows, Hp)               # contiguous -> free reshape
    if rows <= 512:
        tm = rows
    else:
        tm = next(t for t in (512, 256, 128, 64, 32, 16, 8) if rows % t == 0)
    tn = 256 if Vp % 256 == 0 else 128

    out_flat = pl.pallas_call(
        logits_kernel,
        out_shape=jax.ShapeDtypeStruct((rows, Vp), f32),
        grid_spec=pltpu.PrefetchScalarGridSpec(
            num_scalar_prefetch=0,
            grid=(rows // tm, Vp // tn),
            in_specs=[
                pl.BlockSpec((tm, Hp), lambda i, j: (i, 0)),
                pl.BlockSpec((Hp, tn), lambda i, j: (0, j)),
                pl.BlockSpec((1, tn), lambda i, j: (0, j)),
            ],
            out_specs=pl.BlockSpec((tm, tn), lambda i, j: (i, j)),
        ),
        compiler_params=pltpu.CompilerParams(
            dimension_semantics=("parallel", "parallel"),
        ),
    )(hs_flat, w_log_p, b_log_p)

    out = out_flat.reshape(T, Bp, Vp)[:, :B, :V]
    return jnp.transpose(out, (1, 0, 2))         # [B, T, V], batch_first


caption_net_forward = jax.jit(caption_net_forward)


# --------------------------------------------------------------------------
# Pure-JAX reference (mirrors PyTorch semantics) and param init
# --------------------------------------------------------------------------
def reference_forward(params, image_vectors, captions):
    H = params["w_hh"].shape[0]
    h = image_vectors @ params["w_h0"] + params["b_h0"][0]
    c = image_vectors @ params["w_c0"] + params["b_c0"][0]
    emb_seq = params["emb"][captions]   # [B, T, E]
    outs = []
    for t in range(captions.shape[1]):
        x = emb_seq[:, t]
        gates = x @ params["w_ih"] + h @ params["w_hh"] + params["b_g"][0]
        i = jax.nn.sigmoid(gates[:, 0 * H:1 * H])
        f = jax.nn.sigmoid(gates[:, 1 * H:2 * H])
        g = jnp.tanh(gates[:, 2 * H:3 * H])
        o = jax.nn.sigmoid(gates[:, 3 * H:4 * H])
        c = f * c + i * g
        h = o * jnp.tanh(c)
        outs.append(h @ params["w_log"] + params["b_log"][0])
    return jnp.stack(outs, axis=1)      # [B, T, V]


def init_params(key, n_tokens, emb_size, lstm_units, cnn_feature_size):
    ks = jax.random.split(key, 11)
    u = lambda k, shape, s: jax.random.uniform(k, shape, jnp.float32, -s, s)
    H, E, F, V = lstm_units, emb_size, cnn_feature_size, n_tokens
    return {
        "w_h0": u(ks[0], (F, H), 0.05), "b_h0": u(ks[1], (1, H), 0.05),
        "w_c0": u(ks[2], (F, H), 0.05), "b_c0": u(ks[3], (1, H), 0.05),
        "emb":  u(ks[4], (V, E), 0.5),
        "w_ih": u(ks[5], (E, 4 * H), 0.1),
        "w_hh": u(ks[6], (H, 4 * H), 0.1),
        "b_g":  u(ks[7], (1, 4 * H), 0.1),       # b_ih + b_hh folded together
        "w_log": u(ks[8], (H, V), 0.1), "b_log": u(ks[9], (1, V), 0.1),
    }


if __name__ == "__main__":
    # Small, forward-consistent shapes.
    B, T = 2, 8
    n_tokens, emb_size, lstm_units, cnn_feature_size = 16, 32, 32, 64

    key = jax.random.PRNGKey(0)
    k_param, k_img, k_cap = jax.random.split(key, 3)

    params = init_params(k_param, n_tokens, emb_size, lstm_units, cnn_feature_size)
    image_vectors = jax.random.normal(k_img, (B, cnn_feature_size), jnp.float32)
    captions = jax.random.randint(k_cap, (B, T), 0, n_tokens, jnp.int32)

    logits = caption_net_forward(params, image_vectors, captions)
    jax.block_until_ready(logits)

    ref = reference_forward(params, image_vectors, captions)
    assert logits.shape == (B, T, n_tokens), logits.shape
    # 2e-2 tolerance accommodates bf16 MXU inputs with f32 accumulation.
    assert np.allclose(np.asarray(logits), np.asarray(ref), rtol=2e-2, atol=2e-2), \
        "Pallas kernel output mismatch vs. pure-JAX reference"

    print("KERNEL_OK")
</pallas_src>

<mosaic_0001>
module attributes {stable_mosaic.version = 11 : i64} {
  func.func @init_state_kernel(%arg0: memref<8x128xbf16, #tpu.memory_space<vmem>>, %arg1: memref<128x256xbf16, #tpu.memory_space<vmem>>, %arg2: memref<1x256xf32, #tpu.memory_space<vmem>>, %arg3: memref<8x256xf32, #tpu.memory_space<vmem>>) attributes {dimension_semantics = [], scalar_prefetch = 0 : i64, scratch_operands = 0 : i64, tpu.core_type = #tpu.core_type<tc>} {
    %c0 = arith.constant 0 : index
    %c0_0 = arith.constant 0 : index
    %0 = vector.load %arg0[%c0, %c0_0] : memref<8x128xbf16, #tpu.memory_space<vmem>>, vector<8x128xbf16>
    %c0_1 = arith.constant 0 : index
    %c0_2 = arith.constant 0 : index
    %1 = vector.load %arg1[%c0_1, %c0_2] : memref<128x256xbf16, #tpu.memory_space<vmem>>, vector<128x256xbf16>
    %cst = arith.constant dense<0.000000e+00> : vector<8x256xf32>
    %2 = tpu.matmul %0, %1, %cst {dimension_numbers = #tpu.dot_dimension_numbers<[1], [0], [0], [1], [0, 0, 1, 1], [], []>} : vector<8x128xbf16>, vector<128x256xbf16>, vector<8x256xf32> -> vector<8x256xf32>
    %c0_3 = arith.constant 0 : index
    %c0_4 = arith.constant 0 : index
    %3 = vector.load %arg2[%c0_3, %c0_4] : memref<1x256xf32, #tpu.memory_space<vmem>>, vector<1x256xf32>
    %4 = vector.broadcast %3 : vector<1x256xf32> to vector<8x256xf32>
    %5 = arith.addf %2, %4 : vector<8x256xf32>
    %c0_5 = arith.constant 0 : index
    %c0_6 = arith.constant 0 : index
    %6 = vector.load %arg3[%c0_5, %c0_6] : memref<8x256xf32, #tpu.memory_space<vmem>>, vector<8x256xf32>
    tpu.vector_store %arg3[%c0_5, %c0_6], %5 {strides = array<i32>} : memref<8x256xf32, #tpu.memory_space<vmem>>, vector<8x256xf32>,
    return
  }
}

module attributes {stable_mosaic.version = 11 : i64} {
  func.func @lstm_seq_kernel(%arg0: i32, %arg1: memref<8x256xf32, #tpu.memory_space<vmem>>, %arg2: memref<8x8x128xbf16, #tpu.memory_space<vmem>>, %arg3: memref<128x512xbf16, #tpu.memory_space<vmem>>, %arg4: memref<128x512xbf16, #tpu.memory_space<vmem>>, %arg5: memref<1x512xf32, #tpu.memory_space<vmem>>, %arg6: memref<8x8x128xbf16, #tpu.memory_space<vmem>>) attributes {dimension_semantics = [#tpu.dimension_semantics<parallel>], iteration_bounds = array<i64: 1>, scalar_prefetch = 0 : i64, scratch_operands = 0 : i64, tpu.core_type = #tpu.core_type<tc>, window_params = [{transform_indices = @transform_0, window_bounds = array<i64: 8, 256>}, {transform_indices = @transform_1, window_bounds = array<i64: 8, 8, 128>}, {pipeline_mode = #tpu.pipeline_mode<synchronous>, transform_indices = @transform_2, window_bounds = array<i64: 128, 512>}, {pipeline_mode = #tpu.pipeline_mode<synchronous>, transform_indices = @transform_3, window_bounds = array<i64: 128, 512>}, {pipeline_mode = #tpu.pipeline_mode<synchronous>, transform_indices = @transform_4, window_bounds = array<i64: 1, 512>}, {transform_indices = @transform_5, window_bounds = array<i64: 8, 8, 128>}]} {
    %c0 = arith.constant 0 : index
    %c0_0 = arith.constant 0 : index
    %0 = vector.load %arg3[%c0, %c0_0] : memref<128x512xbf16, #tpu.memory_space<vmem>>, vector<128x512xbf16>
    %c0_1 = arith.constant 0 : index
    %c0_2 = arith.constant 0 : index
    %1 = vector.load %arg4[%c0_1, %c0_2] : memref<128x512xbf16, #tpu.memory_space<vmem>>, vector<128x512xbf16>
    %c0_3 = arith.constant 0 : index
    %c0_4 = arith.constant 0 : index
    %2 = vector.load %arg5[%c0_3, %c0_4] : memref<1x512xf32, #tpu.memory_space<vmem>>, vector<1x512xf32>
    %c0_5 = arith.constant 0 : index
    %c0_6 = arith.constant 0 : index
    %3 = vector.load %arg1[%c0_5, %c0_6] : memref<8x256xf32, #tpu.memory_space<vmem>>, vector<8x128xf32>
    %c0_7 = arith.constant 0 : index
    %c128 = arith.constant 128 : index
    %4 = vector.load %arg1[%c0_7, %c128] : memref<8x256xf32, #tpu.memory_space<vmem>>, vector<8x128xf32>
    %c0_8 = arith.constant 0 : index
    %c0_9 = arith.constant 0 : index
    %c0_10 = arith.constant 0 : index
    %5 = vector.load %arg2[%c0_8, %c0_9, %c0_10] : memref<8x8x128xbf16, #tpu.memory_space<vmem>>, vector<1x8x128xbf16>
    %6 = vector.shape_cast %5 : vector<1x8x128xbf16> to vector<8x128xbf16>
    %cst = arith.constant dense<0.000000e+00> : vector<8x512xf32>
    %7 = tpu.matmul %6, %0, %cst {dimension_numbers = #tpu.dot_dimension_numbers<[1], [0], [0], [1], [0, 0, 1, 1], [], []>} : vector<8x128xbf16>, vector<128x512xbf16>, vector<8x512xf32> -> vector<8x512xf32>
    %8 = arith.truncf %3 : vector<8x128xf32> to vector<8x128xbf16>
    %cst_11 = arith.constant dense<0.000000e+00> : vector<8x512xf32>
    %9 = tpu.matmul %8, %1, %cst_11 {dimension_numbers = #tpu.dot_dimension_numbers<[1], [0], [0], [1], [0, 0, 1, 1], [], []>} : vector<8x128xbf16>, vector<128x512xbf16>, vector<8x512xf32> -> vector<8x512xf32>
    %10 = arith.addf %7, %9 : vector<8x512xf32>
    %11 = vector.broadcast %2 : vector<1x512xf32> to vector<8x512xf32>
    %12 = arith.addf %10, %11 : vector<8x512xf32>
    %13 = vector.extract_strided_slice %12 {offsets = [0, 0], sizes = [8, 128], strides = [1, 1]} : vector<8x512xf32> to vector<8x128xf32>
    %14 = arith.negf %13 : vector<8x128xf32>
    %15 = math.exp %14 : vector<8x128xf32>
    %cst_12 = arith.constant 1.000000e+00 : f32
    %16 = vector.broadcast %cst_12 : f32 to vector<8x128xf32>
    %17 = arith.addf %16, %15 : vector<8x128xf32>
    %18 = arith.divf %16, %17 : vector<8x128xf32>
    %19 = vector.extract_strided_slice %12 {offsets = [0, 128], sizes = [8, 128], strides = [1, 1]} : vector<8x512xf32> to vector<8x128xf32>
    %20 = arith.negf %19 : vector<8x128xf32>
    %21 = math.exp %20 : vector<8x128xf32>
    %cst_13 = arith.constant 1.000000e+00 : f32
    %22 = vector.broadcast %cst_13 : f32 to vector<8x128xf32>
    %23 = arith.addf %22, %21 : vector<8x128xf32>
    %24 = arith.divf %22, %23 : vector<8x128xf32>
    %25 = vector.extract_strided_slice %12 {offsets = [0, 256], sizes = [8, 128], strides = [1, 1]} : vector<8x512xf32> to vector<8x128xf32>
    %26 = math.tanh %25 : vector<8x128xf32>
    %27 = vector.extract_strided_slice %12 {offsets = [0, 384], sizes = [8, 128], strides = [1, 1]} : vector<8x512xf32> to vector<8x128xf32>
    %28 = arith.negf %27 : vector<8x128xf32>
    %29 = math.exp %28 : vector<8x128xf32>
    %cst_14 = arith.constant 1.000000e+00 : f32
    %30 = vector.broadcast %cst_14 : f32 to vector<8x128xf32>
    %31 = arith.addf %30, %29 : vector<8x128xf32>
    %32 = arith.divf %30, %31 : vector<8x128xf32>
    %33 = arith.mulf %24, %4 : vector<8x128xf32>
    %34 = arith.mulf %18, %26 : vector<8x128xf32>
    %35 = arith.addf %33, %34 : vector<8x128xf32>
    %36 = math.tanh %35 : vector<8x128xf32>
    %37 = arith.mulf %32, %36 : vector<8x128xf32>
    %38 = arith.truncf %37 : vector<8x128xf32> to vector<8x128xbf16>
    %c0_15 = arith.constant 0 : index
    %c0_16 = arith.constant 0 : index
    %c0_17 = arith.constant 0 : index
    %39 = vector.load %arg6[%c0_15, %c0_16, %c0_17] : memref<8x8x128xbf16, #tpu.memory_space<vmem>>, vector<1x8x128xbf16>
    %40 = vector.shape_cast %39 : vector<1x8x128xbf16> to vector<8x128xbf16>
    %41 = vector.shape_cast %38 : vector<8x128xbf16> to vector<1x8x128xbf16>
    tpu.vector_store %arg6[%c0_15, %c0_16, %c0_17], %41 {strides = array<i32>} : memref<8x8x128xbf16, #tpu.memory_space<vmem>>, vector<1x8x128xbf16>,
    %c1 = arith.constant 1 : index
    %c0_18 = arith.constant 0 : index
    %c0_19 = arith.constant 0 : index
    %42 = vector.load %arg2[%c1, %c0_18, %c0_19] : memref<8x8x128xbf16, #tpu.memory_space<vmem>>, vector<1x8x128xbf16>
    %43 = vector.shape_cast %42 : vector<1x8x128xbf16> to vector<8x128xbf16>
    %cst_20 = arith.constant dense<0.000000e+00> : vector<8x512xf32>
    %44 = tpu.matmul %43, %0, %cst_20 {dimension_numbers = #tpu.dot_dimension_numbers<[1], [0], [0], [1], [0, 0, 1, 1], [], []>} : vector<8x128xbf16>, vector<128x512xbf16>, vector<8x512xf32> -> vector<8x512xf32>
    %45 = arith.truncf %37 : vector<8x128xf32> to vector<8x128xbf16>
    %cst_21 = arith.constant dense<0.000000e+00> : vector<8x512xf32>
    %46 = tpu.matmul %45, %1, %cst_21 {dimension_numbers = #tpu.dot_dimension_numbers<[1], [0], [0], [1], [0, 0, 1, 1], [], []>} : vector<8x128xbf16>, vector<128x512xbf16>, vector<8x512xf32> -> vector<8x512xf32>
    %47 = arith.addf %44, %46 : vector<8x512xf32>
    %48 = vector.broadcast %2 : vector<1x512xf32> to vector<8x512xf32>
    %49 = arith.addf %47, %48 : vector<8x512xf32>
    %50 = vector.extract_strided_slice %49 {offsets = [0, 0], sizes = [8, 128], strides = [1, 1]} : vector<8x512xf32> to vector<8x128xf32>
    %51 = arith.negf %50 : vector<8x128xf32>
    %52 = math.exp %51 : vector<8x128xf32>
    %cst_22 = arith.constant 1.000000e+00 : f32
    %53 = vector.broadcast %cst_22 : f32 to vector<8x128xf32>
    %54 = arith.addf %53, %52 : vector<8x128xf32>
    %55 = arith.divf %53, %54 : vector<8x128xf32>
    %56 = vector.extract_strided_slice %49 {offsets = [0, 128], sizes = [8, 128], strides = [1, 1]} : vector<8x512xf32> to vector<8x128xf32>
    %57 = arith.negf %56 : vector<8x128xf32>
    %58 = math.exp %57 : vector<8x128xf32>
    %cst_23 = arith.constant 1.000000e+00 : f32
    %59 = vector.broadcast %cst_23 : f32 to vector<8x128xf32>
    %60 = arith.addf %59, %58 : vector<8x128xf32>
    %61 = arith.divf %59, %60 : vector<8x128xf32>
    %62 = vector.extract_strided_slice %49 {offsets = [0, 256], sizes = [8, 128], strides = [1, 1]} : vector<8x512xf32> to vector<8x128xf32>
    %63 = math.tanh %62 : vector<8x128xf32>
    %64 = vector.extract_strided_slice %49 {offsets = [0, 384], sizes = [8, 128], strides = [1, 1]} : vector<8x512xf32> to vector<8x128xf32>
    %65 = arith.negf %64 : vector<8x128xf32>
    %66 = math.exp %65 : vector<8x128xf32>
    %cst_24 = arith.constant 1.000000e+00 : f32
    %67 = vector.broadcast %cst_24 : f32 to vector<8x128xf32>
    %68 = arith.addf %67, %66 : vector<8x128xf32>
    %69 = arith.divf %67, %68 : vector<8x128xf32>
    %70 = arith.mulf %61, %35 : vector<8x128xf32>
    %71 = arith.mulf %55, %63 : vector<8x128xf32>
    %72 = arith.addf %70, %71 : vector<8x128xf32>
    %73 = math.tanh %72 : vector<8x128xf32>
    %74 = arith.mulf %69, %73 : vector<8x128xf32>
    %75 = arith.truncf %74 : vector<8x128xf32> to vector<8x128xbf16>
    %c1_25 = arith.constant 1 : index
    %c0_26 = arith.constant 0 : index
    %c0_27 = arith.constant 0 : index
    %76 = vector.load %arg6[%c1_25, %c0_26, %c0_27] : memref<8x8x128xbf16, #tpu.memory_space<vmem>>, vector<1x8x128xbf16>
    %77 = vector.shape_cast %76 : vector<1x8x128xbf16> to vector<8x128xbf16>
    %78 = vector.shape_cast %75 : vector<8x128xbf16> to vector<1x8x128xbf16>
    tpu.vector_store %arg6[%c1_25, %c0_26, %c0_27], %78 {strides = array<i32>} : memref<8x8x128xbf16, #tpu.memory_space<vmem>>, vector<1x8x128xbf16>,
    %c2 = arith.constant 2 : index
    %c0_28 = arith.constant 0 : index
    %c0_29 = arith.constant 0 : index
    %79 = vector.load %arg2[%c2, %c0_28, %c0_29] : memref<8x8x128xbf16, #tpu.memory_space<vmem>>, vector<1x8x128xbf16>
    %80 = vector.shape_cast %79 : vector<1x8x128xbf16> to vector<8x128xbf16>
    %cst_30 = arith.constant dense<0.000000e+00> : vector<8x512xf32>
    %81 = tpu.matmul %80, %0, %cst_30 {dimension_numbers = #tpu.dot_dimension_numbers<[1], [0], [0], [1], [0, 0, 1, 1], [], []>} : vector<8x128xbf16>, vector<128x512xbf16>, vector<8x512xf32> -> vector<8x512xf32>
    %82 = arith.truncf %74 : vector<8x128xf32> to vector<8x128xbf16>
    %cst_31 = arith.constant dense<0.000000e+00> : vector<8x512xf32>
    %83 = tpu.matmul %82, %1, %cst_31 {dimension_numbers = #tpu.dot_dimension_numbers<[1], [0], [0], [1], [0, 0, 1, 1], [], []>} : vector<8x128xbf16>, vector<128x512xbf16>, vector<8x512xf32> -> vector<8x512xf32>
    %84 = arith.addf %81, %83 : vector<8x512xf32>
    %85 = vector.broadcast %2 : vector<1x512xf32> to vector<8x512xf32>
    %86 = arith.addf %84, %85 : vector<8x512xf32>
    %87 = vector.extract_strided_slice %86 {offsets = [0, 0], sizes = [8, 128], strides = [1, 1]} : vector<8x512xf32> to vector<8x128xf32>
    %88 = arith.negf %87 : vector<8x128xf32>
    %89 = math.exp %88 : vector<8x128xf32>
    %cst_32 = arith.constant 1.000000e+00 : f32
    %90 = vector.broadcast %cst_32 : f32 to vector<8x128xf32>
    %91 = arith.addf %90, %89 : vector<8x128xf32>
    %92 = arith.divf %90, %91 : vector<8x128xf32>
    %93 = vector.extract_strided_slice %86 {offsets = [0, 128], sizes = [8, 128], strides = [1, 1]} : vector<8x512xf32> to vector<8x128xf32>
    %94 = arith.negf %93 : vector<8x128xf32>
    %95 = math.exp %94 : vector<8x128xf32>
    %cst_33 = arith.constant 1.000000e+00 : f32
    %96 = vector.broadcast %cst_33 : f32 to vector<8x128xf32>
    %97 = arith.addf %96, %95 : vector<8x128xf32>
    %98 = arith.divf %96, %97 : vector<8x128xf32>
    %99 = vector.extract_strided_slice %86 {offsets = [0, 256], sizes = [8, 128], strides = [1, 1]} : vector<8x512xf32> to vector<8x128xf32>
    %100 = math.tanh %99 : vector<8x128xf32>
    %101 = vector.extract_strided_slice %86 {offsets = [0, 384], sizes = [8, 128], strides = [1, 1]} : vector<8x512xf32> to vector<8x128xf32>
    %102 = arith.negf %101 : vector<8x128xf32>
    %103 = math.exp %102 : vector<8x128xf32>
    %cst_34 = arith.constant 1.000000e+00 : f32
    %104 = vector.broadcast %cst_34 : f32 to vector<8x128xf32>
    %105 = arith.addf %104, %103 : vector<8x128xf32>
    %106 = arith.divf %104, %105 : vector<8x128xf32>
    %107 = arith.mulf %98, %72 : vector<8x128xf32>
    %108 = arith.mulf %92, %100 : vector<8x128xf32>
    %109 = arith.addf %107, %108 : vector<8x128xf32>
    %110 = math.tanh %109 : vector<8x128xf32>
    %111 = arith.mulf %106, %110 : vector<8x128xf32>
    %112 = arith.truncf %111 : vector<8x128xf32> to vector<8x128xbf16>
    %c2_35 = arith.constant 2 : index
    %c0_36 = arith.constant 0 : index
    %c0_37 = arith.constant 0 : index
    %113 = vector.load %arg6[%c2_35, %c0_36, %c0_37] : memref<8x8x128xbf16, #tpu.memory_space<vmem>>, vector<1x8x128xbf16>
    %114 = vector.shape_cast %113 : vector<1x8x128xbf16> to vector<8x128xbf16>
    %115 = vector.shape_cast %112 : vector<8x128xbf16> to vector<1x8x128xbf16>
    tpu.vector_store %arg6[%c2_35, %c0_36, %c0_37], %115 {strides = array<i32>} : memref<8x8x128xbf16, #tpu.memory_space<vmem>>, vector<1x8x128xbf16>,
    %c3 = arith.constant 3 : index
    %c0_38 = arith.constant 0 : index
    %c0_39 = arith.constant 0 : index
    %116 = vector.load %arg2[%c3, %c0_38, %c0_39] : memref<8x8x128xbf16, #tpu.memory_space<vmem>>, vector<1x8x128xbf16>
    %117 = vector.shape_cast %116 : vector<1x8x128xbf16> to vector<8x128xbf16>
    %cst_40 = arith.constant dense<0.000000e+00> : vector<8x512xf32>
    %118 = tpu.matmul %117, %0, %cst_40 {dimension_numbers = #tpu.dot_dimension_numbers<[1], [0], [0], [1], [0, 0, 1, 1], [], []>} : vector<8x128xbf16>, vector<128x512xbf16>, vector<8x512xf32> -> vector<8x512xf32>
    %119 = arith.truncf %111 : vector<8x128xf32> to vector<8x128xbf16>
    %cst_41 = arith.constant dense<0.000000e+00> : vector<8x512xf32>
    %120 = tpu.matmul %119, %1, %cst_41 {dimension_numbers = #tpu.dot_dimension_numbers<[1], [0], [0], [1], [0, 0, 1, 1], [], []>} : vector<8x128xbf16>, vector<128x512xbf16>, vector<8x512xf32> -> vector<8x512xf32>
    %121 = arith.addf %118, %120 : vector<8x512xf32>
    %122 = vector.broadcast %2 : vector<1x512xf32> to vector<8x512xf32>
    %123 = arith.addf %121, %122 : vector<8x512xf32>
    %124 = vector.extract_strided_slice %123 {offsets = [0, 0], sizes = [8, 128], strides = [1, 1]} : vector<8x512xf32> to vector<8x128xf32>
    %125 = arith.negf %124 : vector<8x128xf32>
    %126 = math.exp %125 : vector<8x128xf32>
    %cst_42 = arith.constant 1.000000e+00 : f32
    %127 = vector.broadcast %cst_42 : f32 to vector<8x128xf32>
    %128 = arith.addf %127, %126 : vector<8x128xf32>
    %129 = arith.divf %127, %128 : vector<8x128xf32>
    %130 = vector.extract_strided_slice %123 {offsets = [0, 128], sizes = [8, 128], strides = [1, 1]} : vector<8x512xf32> to vector<8x128xf32>
    %131 = arith.negf %130 : vector<8x128xf32>
    %132 = math.exp %131 : vector<8x128xf32>
    %cst_43 = arith.constant 1.000000e+00 : f32
    %133 = vector.broadcast %cst_43 : f32 to vector<8x128xf32>
    %134 = arith.addf %133, %132 : vector<8x128xf32>
    %135 = arith.divf %133, %134 : vector<8x128xf32>
    %136 = vector.extract_strided_slice %123 {offsets = [0, 256], sizes = [8, 128], strides = [1, 1]} : vector<8x512xf32> to vector<8x128xf32>
    %137 = math.tanh %136 : vector<8x128xf32>
    %138 = vector.extract_strided_slice %123 {offsets = [0, 384], sizes = [8, 128], strides = [1, 1]} : vector<8x512xf32> to vector<8x128xf32>
    %139 = arith.negf %138 : vector<8x128xf32>
    %140 = math.exp %139 : vector<8x128xf32>
    %cst_44 = arith.constant 1.000000e+00 : f32
    %141 = vector.broadcast %cst_44 : f32 to vector<8x128xf32>
    %142 = arith.addf %141, %140 : vector<8x128xf32>
    %143 = arith.divf %141, %142 : vector<8x128xf32>
    %144 = arith.mulf %135, %109 : vector<8x128xf32>
    %145 = arith.mulf %129, %137 : vector<8x128xf32>
    %146 = arith.addf %144, %145 : vector<8x128xf32>
    %147 = math.tanh %146 : vector<8x128xf32>
    %148 = arith.mulf %143, %147 : vector<8x128xf32>
    %149 = arith.truncf %148 : vector<8x128xf32> to vector<8x128xbf16>
    %c3_45 = arith.constant 3 : index
    %c0_46 = arith.constant 0 : index
    %c0_47 = arith.constant 0 : index
    %150 = vector.load %arg6[%c3_45, %c0_46, %c0_47] : memref<8x8x128xbf16, #tpu.memory_space<vmem>>, vector<1x8x128xbf16>
    %151 = vector.shape_cast %150 : vector<1x8x128xbf16> to vector<8x128xbf16>
    %152 = vector.shape_cast %149 : vector<8x128xbf16> to vector<1x8x128xbf16>
    tpu.vector_store %arg6[%c3_45, %c0_46, %c0_47], %152 {strides = array<i32>} : memref<8x8x128xbf16, #tpu.memory_space<vmem>>, vector<1x8x128xbf16>,
    %c4 = arith.constant 4 : index
    %c0_48 = arith.constant 0 : index
    %c0_49 = arith.constant 0 : index
    %153 = vector.load %arg2[%c4, %c0_48, %c0_49] : memref<8x8x128xbf16, #tpu.memory_space<vmem>>, vector<1x8x128xbf16>
    %154 = vector.shape_cast %153 : vector<1x8x128xbf16> to vector<8x128xbf16>
    %cst_50 = arith.constant dense<0.000000e+00> : vector<8x512xf32>
    %155 = tpu.matmul %154, %0, %cst_50 {dimension_numbers = #tpu.dot_dimension_numbers<[1], [0], [0], [1], [0, 0, 1, 1], [], []>} : vector<8x128xbf16>, vector<128x512xbf16>, vector<8x512xf32> -> vector<8x512xf32>
    %156 = arith.truncf %148 : vector<8x128xf32> to vector<8x128xbf16>
    %cst_51 = arith.constant dense<0.000000e+00> : vector<8x512xf32>
    %157 = tpu.matmul %156, %1, %cst_51 {dimension_numbers = #tpu.dot_dimension_numbers<[1], [0], [0], [1], [0, 0, 1, 1], [], []>} : vector<8x128xbf16>, vector<128x512xbf16>, vector<8x512xf32> -> vector<8x512xf32>
    %158 = arith.addf %155, %157 : vector<8x512xf32>
    %159 = vector.broadcast %2 : vector<1x512xf32> to vector<8x512xf32>
    %160 = arith.addf %158, %159 : vector<8x512xf32>
    %161 = vector.extract_strided_slice %160 {offsets = [0, 0], sizes = [8, 128], strides = [1, 1]} : vector<8x512xf32> to vector<8x128xf32>
    %162 = arith.negf %161 : vector<8x128xf32>
    %163 = math.exp %162 : vector<8x128xf32>
    %cst_52 = arith.constant 1.000000e+00 : f32
    %164 = vector.broadcast %cst_52 : f32 to vector<8x128xf32>
    %165 = arith.addf %164, %163 : vector<8x128xf32>
    %166 = arith.divf %164, %165 : vector<8x128xf32>
    %167 = vector.extract_strided_slice %160 {offsets = [0, 128], sizes = [8, 128], strides = [1, 1]} : vector<8x512xf32> to vector<8x128xf32>
    %168 = arith.negf %167 : vector<8x128xf32>
    %169 = math.exp %168 : vector<8x128xf32>
    %cst_53 = arith.constant 1.000000e+00 : f32
    %170 = vector.broadcast %cst_53 : f32 to vector<8x128xf32>
    %171 = arith.addf %170, %169 : vector<8x128xf32>
    %172 = arith.divf %170, %171 : vector<8x128xf32>
    %173 = vector.extract_strided_slice %160 {offsets = [0, 256], sizes = [8, 128], strides = [1, 1]} : vector<8x512xf32> to vector<8x128xf32>
    %174 = math.tanh %173 : vector<8x128xf32>
    %175 = vector.extract_strided_slice %160 {offsets = [0, 384], sizes = [8, 128], strides = [1, 1]} : vector<8x512xf32> to vector<8x128xf32>
    %176 = arith.negf %175 : vector<8x128xf32>
    %177 = math.exp %176 : vector<8x128xf32>
    %cst_54 = arith.constant 1.000000e+00 : f32
    %178 = vector.broadcast %cst_54 : f32 to vector<8x128xf32>
    %179 = arith.addf %178, %177 : vector<8x128xf32>
    %180 = arith.divf %178, %179 : vector<8x128xf32>
    %181 = arith.mulf %172, %146 : vector<8x128xf32>
    %182 = arith.mulf %166, %174 : vector<8x128xf32>
    %183 = arith.addf %181, %182 : vector<8x128xf32>
    %184 = math.tanh %183 : vector<8x128xf32>
    %185 = arith.mulf %180, %184 : vector<8x128xf32>
    %186 = arith.truncf %185 : vector<8x128xf32> to vector<8x128xbf16>
    %c4_55 = arith.constant 4 : index
    %c0_56 = arith.constant 0 : index
    %c0_57 = arith.constant 0 : index
    %187 = vector.load %arg6[%c4_55, %c0_56, %c0_57] : memref<8x8x128xbf16, #tpu.memory_space<vmem>>, vector<1x8x128xbf16>
    %188 = vector.shape_cast %187 : vector<1x8x128xbf16> to vector<8x128xbf16>
    %189 = vector.shape_cast %186 : vector<8x128xbf16> to vector<1x8x128xbf16>
    tpu.vector_store %arg6[%c4_55, %c0_56, %c0_57], %189 {strides = array<i32>} : memref<8x8x128xbf16, #tpu.memory_space<vmem>>, vector<1x8x128xbf16>,
    %c5 = arith.constant 5 : index
    %c0_58 = arith.constant 0 : index
    %c0_59 = arith.constant 0 : index
    %190 = vector.load %arg2[%c5, %c0_58, %c0_59] : memref<8x8x128xbf16, #tpu.memory_space<vmem>>, vector<1x8x128xbf16>
    %191 = vector.shape_cast %190 : vector<1x8x128xbf16> to vector<8x128xbf16>
    %cst_60 = arith.constant dense<0.000000e+00> : vector<8x512xf32>
    %192 = tpu.matmul %191, %0, %cst_60 {dimension_numbers = #tpu.dot_dimension_numbers<[1], [0], [0], [1], [0, 0, 1, 1], [], []>} : vector<8x128xbf16>, vector<128x512xbf16>, vector<8x512xf32> -> vector<8x512xf32>
    %193 = arith.truncf %185 : vector<8x128xf32> to vector<8x128xbf16>
    %cst_61 = arith.constant dense<0.000000e+00> : vector<8x512xf32>
    %194 = tpu.matmul %193, %1, %cst_61 {dimension_numbers = #tpu.dot_dimension_numbers<[1], [0], [0], [1], [0, 0, 1, 1], [], []>} : vector<8x128xbf16>, vector<128x512xbf16>, vector<8x512xf32> -> vector<8x512xf32>
    %195 = arith.addf %192, %194 : vector<8x512xf32>
    %196 = vector.broadcast %2 : vector<1x512xf32> to vector<8x512xf32>
    %197 = arith.addf %195, %196 : vector<8x512xf32>
    %198 = vector.extract_strided_slice %197 {offsets = [0, 0], sizes = [8, 128], strides = [1, 1]} : vector<8x512xf32> to vector<8x128xf32>
    %199 = arith.negf %198 : vector<8x128xf32>
    %200 = math.exp %199 : vector<8x128xf32>
    %cst_62 = arith.constant 1.000000e+00 : f32
    %201 = vector.broadcast %cst_62 : f32 to vector<8x128xf32>
    %202 = arith.addf %201, %200 : vector<8x128xf32>
    %203 = arith.divf %201, %202 : vector<8x128xf32>
    %204 = vector.extract_strided_slice %197 {offsets = [0, 128], sizes = [8, 128], strides = [1, 1]} : vector<8x512xf32> to vector<8x128xf32>
    %205 = arith.negf %204 : vector<8x128xf32>
    %206 = math.exp %205 : vector<8x128xf32>
    %cst_63 = arith.constant 1.000000e+00 : f32
    %207 = vector.broadcast %cst_63 : f32 to vector<8x128xf32>
    %208 = arith.addf %207, %206 : vector<8x128xf32>
    %209 = arith.divf %207, %208 : vector<8x128xf32>
    %210 = vector.extract_strided_slice %197 {offsets = [0, 256], sizes = [8, 128], strides = [1, 1]} : vector<8x512xf32> to vector<8x128xf32>
    %211 = math.tanh %210 : vector<8x128xf32>
    %212 = vector.extract_strided_slice %197 {offsets = [0, 384], sizes = [8, 128], strides = [1, 1]} : vector<8x512xf32> to vector<8x128xf32>
    %213 = arith.negf %212 : vector<8x128xf32>
    %214 = math.exp %213 : vector<8x128xf32>
    %cst_64 = arith.constant 1.000000e+00 : f32
    %215 = vector.broadcast %cst_64 : f32 to vector<8x128xf32>
    %216 = arith.addf %215, %214 : vector<8x128xf32>
    %217 = arith.divf %215, %216 : vector<8x128xf32>
    %218 = arith.mulf %209, %183 : vector<8x128xf32>
    %219 = arith.mulf %203, %211 : vector<8x128xf32>
    %220 = arith.addf %218, %219 : vector<8x128xf32>
    %221 = math.tanh %220 : vector<8x128xf32>
    %222 = arith.mulf %217, %221 : vector<8x128xf32>
    %223 = arith.truncf %222 : vector<8x128xf32> to vector<8x128xbf16>
    %c5_65 = arith.constant 5 : index
    %c0_66 = arith.constant 0 : index
    %c0_67 = arith.constant 0 : index
    %224 = vector.load %arg6[%c5_65, %c0_66, %c0_67] : memref<8x8x128xbf16, #tpu.memory_space<vmem>>, vector<1x8x128xbf16>
    %225 = vector.shape_cast %224 : vector<1x8x128xbf16> to vector<8x128xbf16>
    %226 = vector.shape_cast %223 : vector<8x128xbf16> to vector<1x8x128xbf16>
    tpu.vector_store %arg6[%c5_65, %c0_66, %c0_67], %226 {strides = array<i32>} : memref<8x8x128xbf16, #tpu.memory_space<vmem>>, vector<1x8x128xbf16>,
    %c6 = arith.constant 6 : index
    %c0_68 = arith.constant 0 : index
    %c0_69 = arith.constant 0 : index
    %227 = vector.load %arg2[%c6, %c0_68, %c0_69] : memref<8x8x128xbf16, #tpu.memory_space<vmem>>, vector<1x8x128xbf16>
    %228 = vector.shape_cast %227 : vector<1x8x128xbf16> to vector<8x128xbf16>
    %cst_70 = arith.constant dense<0.000000e+00> : vector<8x512xf32>
    %229 = tpu.matmul %228, %0, %cst_70 {dimension_numbers = #tpu.dot_dimension_numbers<[1], [0], [0], [1], [0, 0, 1, 1], [], []>} : vector<8x128xbf16>, vector<128x512xbf16>, vector<8x512xf32> -> vector<8x512xf32>
    %230 = arith.truncf %222 : vector<8x128xf32> to vector<8x128xbf16>
    %cst_71 = arith.constant dense<0.000000e+00> : vector<8x512xf32>
    %231 = tpu.matmul %230, %1, %cst_71 {dimension_numbers = #tpu.dot_dimension_numbers<[1], [0], [0], [1], [0, 0, 1, 1], [], []>} : vector<8x128xbf16>, vector<128x512xbf16>, vector<8x512xf32> -> vector<8x512xf32>
    %232 = arith.addf %229, %231 : vector<8x512xf32>
    %233 = vector.broadcast %2 : vector<1x512xf32> to vector<8x512xf32>
    %234 = arith.addf %232, %233 : vector<8x512xf32>
    %235 = vector.extract_strided_slice %234 {offsets = [0, 0], sizes = [8, 128], strides = [1, 1]} : vector<8x512xf32> to vector<8x128xf32>
    %236 = arith.negf %235 : vector<8x128xf32>
    %237 = math.exp %236 : vector<8x128xf32>
    %cst_72 = arith.constant 1.000000e+00 : f32
    %238 = vector.broadcast %cst_72 : f32 to vector<8x128xf32>
    %239 = arith.addf %238, %237 : vector<8x128xf32>
    %240 = arith.divf %238, %239 : vector<8x128xf32>
    %241 = vector.extract_strided_slice %234 {offsets = [0, 128], sizes = [8, 128], strides = [1, 1]} : vector<8x512xf32> to vector<8x128xf32>
    %242 = arith.negf %241 : vector<8x128xf32>
    %243 = math.exp %242 : vector<8x128xf32>
    %cst_73 = arith.constant 1.000000e+00 : f32
    %244 = vector.broadcast %cst_73 : f32 to vector<8x128xf32>
    %245 = arith.addf %244, %243 : vector<8x128xf32>
    %246 = arith.divf %244, %245 : vector<8x128xf32>
    %247 = vector.extract_strided_slice %234 {offsets = [0, 256], sizes = [8, 128], strides = [1, 1]} : vector<8x512xf32> to vector<8x128xf32>
    %248 = math.tanh %247 : vector<8x128xf32>
    %249 = vector.extract_strided_slice %234 {offsets = [0, 384], sizes = [8, 128], strides = [1, 1]} : vector<8x512xf32> to vector<8x128xf32>
    %250 = arith.negf %249 : vector<8x128xf32>
    %251 = math.exp %250 : vector<8x128xf32>
    %cst_74 = arith.constant 1.000000e+00 : f32
    %252 = vector.broadcast %cst_74 : f32 to vector<8x128xf32>
    %253 = arith.addf %252, %251 : vector<8x128xf32>
    %254 = arith.divf %252, %253 : vector<8x128xf32>
    %255 = arith.mulf %246, %220 : vector<8x128xf32>
    %256 = arith.mulf %240, %248 : vector<8x128xf32>
    %257 = arith.addf %255, %256 : vector<8x128xf32>
    %258 = math.tanh %257 : vector<8x128xf32>
    %259 = arith.mulf %254, %258 : vector<8x128xf32>
    %260 = arith.truncf %259 : vector<8x128xf32> to vector<8x128xbf16>
    %c6_75 = arith.constant 6 : index
    %c0_76 = arith.constant 0 : index
    %c0_77 = arith.constant 0 : index
    %261 = vector.load %arg6[%c6_75, %c0_76, %c0_77] : memref<8x8x128xbf16, #tpu.memory_space<vmem>>, vector<1x8x128xbf16>
    %262 = vector.shape_cast %261 : vector<1x8x128xbf16> to vector<8x128xbf16>
    %263 = vector.shape_cast %260 : vector<8x128xbf16> to vector<1x8x128xbf16>
    tpu.vector_store %arg6[%c6_75, %c0_76, %c0_77], %263 {strides = array<i32>} : memref<8x8x128xbf16, #tpu.memory_space<vmem>>, vector<1x8x128xbf16>,
    %c7 = arith.constant 7 : index
    %c0_78 = arith.constant 0 : index
    %c0_79 = arith.constant 0 : index
    %264 = vector.load %arg2[%c7, %c0_78, %c0_79] : memref<8x8x128xbf16, #tpu.memory_space<vmem>>, vector<1x8x128xbf16>
    %265 = vector.shape_cast %264 : vector<1x8x128xbf16> to vector<8x128xbf16>
    %cst_80 = arith.constant dense<0.000000e+00> : vector<8x512xf32>
    %266 = tpu.matmul %265, %0, %cst_80 {dimension_numbers = #tpu.dot_dimension_numbers<[1], [0], [0], [1], [0, 0, 1, 1], [], []>} : vector<8x128xbf16>, vector<128x512xbf16>, vector<8x512xf32> -> vector<8x512xf32>
    %267 = arith.truncf %259 : vector<8x128xf32> to vector<8x128xbf16>
    %cst_81 = arith.constant dense<0.000000e+00> : vector<8x512xf32>
    %268 = tpu.matmul %267, %1, %cst_81 {dimension_numbers = #tpu.dot_dimension_numbers<[1], [0], [0], [1], [0, 0, 1, 1], [], []>} : vector<8x128xbf16>, vector<128x512xbf16>, vector<8x512xf32> -> vector<8x512xf32>
    %269 = arith.addf %266, %268 : vector<8x512xf32>
    %270 = vector.broadcast %2 : vector<1x512xf32> to vector<8x512xf32>
    %271 = arith.addf %269, %270 : vector<8x512xf32>
    %272 = vector.extract_strided_slice %271 {offsets = [0, 0], sizes = [8, 128], strides = [1, 1]} : vector<8x512xf32> to vector<8x128xf32>
    %273 = arith.negf %272 : vector<8x128xf32>
    %274 = math.exp %273 : vector<8x128xf32>
    %cst_82 = arith.constant 1.000000e+00 : f32
    %275 = vector.broadcast %cst_82 : f32 to vector<8x128xf32>
    %276 = arith.addf %275, %274 : vector<8x128xf32>
    %277 = arith.divf %275, %276 : vector<8x128xf32>
    %278 = vector.extract_strided_slice %271 {offsets = [0, 128], sizes = [8, 128], strides = [1, 1]} : vector<8x512xf32> to vector<8x128xf32>
    %279 = arith.negf %278 : vector<8x128xf32>
    %280 = math.exp %279 : vector<8x128xf32>
    %cst_83 = arith.constant 1.000000e+00 : f32
    %281 = vector.broadcast %cst_83 : f32 to vector<8x128xf32>
    %282 = arith.addf %281, %280 : vector<8x128xf32>
    %283 = arith.divf %281, %282 : vector<8x128xf32>
    %284 = vector.extract_strided_slice %271 {offsets = [0, 256], sizes = [8, 128], strides = [1, 1]} : vector<8x512xf32> to vector<8x128xf32>
    %285 = math.tanh %284 : vector<8x128xf32>
    %286 = vector.extract_strided_slice %271 {offsets = [0, 384], sizes = [8, 128], strides = [1, 1]} : vector<8x512xf32> to vector<8x128xf32>
    %287 = arith.negf %286 : vector<8x128xf32>
    %288 = math.exp %287 : vector<8x128xf32>
    %cst_84 = arith.constant 1.000000e+00 : f32
    %289 = vector.broadcast %cst_84 : f32 to vector<8x128xf32>
    %290 = arith.addf %289, %288 : vector<8x128xf32>
    %291 = arith.divf %289, %290 : vector<8x128xf32>
    %292 = arith.mulf %283, %257 : vector<8x128xf32>
    %293 = arith.mulf %277, %285 : vector<8x128xf32>
    %294 = arith.addf %292, %293 : vector<8x128xf32>
    %295 = math.tanh %294 : vector<8x128xf32>
    %296 = arith.mulf %291, %295 : vector<8x128xf32>
    %297 = arith.truncf %296 : vector<8x128xf32> to vector<8x128xbf16>
    %c7_85 = arith.constant 7 : index
    %c0_86 = arith.constant 0 : index
    %c0_87 = arith.constant 0 : index
    %298 = vector.load %arg6[%c7_85, %c0_86, %c0_87] : memref<8x8x128xbf16, #tpu.memory_space<vmem>>, vector<1x8x128xbf16>
    %299 = vector.shape_cast %298 : vector<1x8x128xbf16> to vector<8x128xbf16>
    %300 = vector.shape_cast %297 : vector<8x128xbf16> to vector<1x8x128xbf16>
    tpu.vector_store %arg6[%c7_85, %c0_86, %c0_87], %300 {strides = array<i32>} : memref<8x8x128xbf16, #tpu.memory_space<vmem>>, vector<1x8x128xbf16>,
    return
  }
  func.func @transform_0(%arg0: i32) -> (i32, i32) {
    %c0_i32 = arith.constant 0 : i32
    %c0_i32_0 = arith.constant 0 : i32
    return %arg0, %c0_i32 : i32, i32
  }
  func.func @transform_1(%arg0: i32) -> (i32, i32, i32) {
    %c0_i32 = arith.constant 0 : i32
    %c0_i32_0 = arith.constant 0 : i32
    %c0_i32_1 = arith.constant 0 : i32
    return %c0_i32, %arg0, %c0_i32_0 : i32, i32, i32
  }
  func.func @transform_2(%arg0: i32) -> (i32, i32) {
    %c0_i32 = arith.constant 0 : i32
    %c0_i32_0 = arith.constant 0 : i32
    %c0_i32_1 = arith.constant 0 : i32
    return %c0_i32, %c0_i32_0 : i32, i32
  }
  func.func @transform_3(%arg0: i32) -> (i32, i32) {
    %c0_i32 = arith.constant 0 : i32
    %c0_i32_0 = arith.constant 0 : i32
    %c0_i32_1 = arith.constant 0 : i32
    return %c0_i32, %c0_i32_0 : i32, i32
  }
  func.func @transform_4(%arg0: i32) -> (i32, i32) {
    %c0_i32 = arith.constant 0 : i32
    %c0_i32_0 = arith.constant 0 : i32
    %c0_i32_1 = arith.constant 0 : i32
    return %c0_i32, %c0_i32_0 : i32, i32
  }
  func.func @transform_5(%arg0: i32) -> (i32, i32, i32) {
    %c0_i32 = arith.constant 0 : i32
    %c0_i32_0 = arith.constant 0 : i32
    %c0_i32_1 = arith.constant 0 : i32
    return %c0_i32, %arg0, %c0_i32_0 : i32, i32, i32
  }
}

module attributes {stable_mosaic.version = 11 : i64} {
  func.func @logits_kernel(%arg0: i32, %arg1: i32, %arg2: memref<64x128xbf16, #tpu.memory_space<vmem>>, %arg3: memref<128x128xbf16, #tpu.memory_space<vmem>>, %arg4: memref<1x128xf32, #tpu.memory_space<vmem>>, %arg5: memref<64x128xf32, #tpu.memory_space<vmem>>) attributes {dimension_semantics = [#tpu.dimension_semantics<parallel>, #tpu.dimension_semantics<parallel>], iteration_bounds = array<i64: 1, 1>, scalar_prefetch = 0 : i64, scratch_operands = 0 : i64, tpu.core_type = #tpu.core_type<tc>, window_params = [{transform_indices = @transform_0, window_bounds = array<i64: 64, 128>}, {transform_indices = @transform_1, window_bounds = array<i64: 128, 128>}, {transform_indices = @transform_2, window_bounds = array<i64: 1, 128>}, {transform_indices = @transform_3, window_bounds = array<i64: 64, 128>}]} {
    %c0 = arith.constant 0 : index
    %c0_0 = arith.constant 0 : index
    %0 = vector.load %arg2[%c0, %c0_0] : memref<64x128xbf16, #tpu.memory_space<vmem>>, vector<64x128xbf16>
    %c0_1 = arith.constant 0 : index
    %c0_2 = arith.constant 0 : index
    %1 = vector.load %arg3[%c0_1, %c0_2] : memref<128x128xbf16, #tpu.memory_space<vmem>>, vector<128x128xbf16>
    %cst = arith.constant dense<0.000000e+00> : vector<64x128xf32>
    %2 = tpu.matmul %0, %1, %cst {dimension_numbers = #tpu.dot_dimension_numbers<[1], [0], [0], [1], [0, 0, 1, 1], [], []>} : vector<64x128xbf16>, vector<128x128xbf16>, vector<64x128xf32> -> vector<64x128xf32>
    %c0_3 = arith.constant 0 : index
    %c0_4 = arith.constant 0 : index
    %3 = vector.load %arg4[%c0_3, %c0_4] : memref<1x128xf32, #tpu.memory_space<vmem>>, vector<1x128xf32>
    %4 = vector.broadcast %3 : vector<1x128xf32> to vector<64x128xf32>
    %5 = arith.addf %2, %4 : vector<64x128xf32>
    %c0_5 = arith.constant 0 : index
    %c0_6 = arith.constant 0 : index
    %6 = vector.load %arg5[%c0_5, %c0_6] : memref<64x128xf32, #tpu.memory_space<vmem>>, vector<64x128xf32>
    tpu.vector_store %arg5[%c0_5, %c0_6], %5 {strides = array<i32>} : memref<64x128xf32, #tpu.memory_space<vmem>>, vector<64x128xf32>,
    return
  }
  func.func @transform_0(%arg0: i32, %arg1: i32) -> (i32, i32) {
    %c0_i32 = arith.constant 0 : i32
    %c0_i32_0 = arith.constant 0 : i32
    return %arg0, %c0_i32 : i32, i32
  }
  func.func @transform_1(%arg0: i32, %arg1: i32) -> (i32, i32) {
    %c0_i32 = arith.constant 0 : i32
    %c0_i32_0 = arith.constant 0 : i32
    return %c0_i32, %arg1 : i32, i32
  }
  func.func @transform_2(%arg0: i32, %arg1: i32) -> (i32, i32) {
    %c0_i32 = arith.constant 0 : i32
    %c0_i32_0 = arith.constant 0 : i32
    return %c0_i32, %arg1 : i32, i32
  }
  func.func @transform_3(%arg0: i32, %arg1: i32) -> (i32, i32) {
    %c0_i32 = arith.constant 0 : i32
    return %arg0, %arg1 : i32, i32
  }
}

</mosaic_0001>

<bundles_post_ra>
// kernel: caption_net_forward.3
= control target key start
LH: loop header
LB: loop body
LE: loop exit
PB: predicated region body
PF: predicated region fallthrough
CT: control target
= control target key end

     0   :  { %s357_s1 = inlined_call_operand.vmem [shape: bf16[128,256], index: 1, kind: input, shape index: {}]   ;;  %s358_s0 = inlined_call_operand.vmem [shape: bf16[8,128], index: 0, kind: input, shape index: {}]   ;;  %s359_s2 = inlined_call_operand.vmem [shape: f32[1,256], index: 2, kind: input, shape index: {}]   ;;  %s360_s3 = inlined_call_operand.vmem [shape: f32[8,256], index: 3, kind: output, shape index: {}]  }
   0x1   :  { %v207_v0 = vld [vmem:[%s357_s1 + $0x70] sm:$0xf]  ;;  %v228_v1 = vld [vmem:[%s357_s1 + $0x74] sm:$0xf0]  ;;  %v227_v2 = vld [vmem:[%s357_s1 + $0x74] sm:$0xf] }
   0x2   :  { %v208_v3 = vor.u32 %v228_v1, %v207_v0  ;;  %v209_v4 = vld [vmem:[%s357_s1 + $0x78] sm:$0xf0]  ;;  %v199_v5 = vld [vmem:[%s357_s1 + $0x60] sm:$0xf]  ;;  %v226_v6 = vld [vmem:[%s357_s1 + $0x64] sm:$0xf0] }
   0x3   :  { %v212_v7 = vor.u32 %v227_v2, %v209_v4  ;;  %v225_v8 = vld [vmem:[%s357_s1 + $0x64] sm:$0xf]  ;;  %v201_v9 = vld [vmem:[%s357_s1 + $0x68] sm:$0xf0]  ;;  %v200_v10 = vor.u32 %v226_v6, %v199_v5  ;;  %v191_v12 = vld [vmem:[%s357_s1 + $0x50] sm:$0xf] }
   0x4   :  { %117 = vmatpush.bf16.msra.mxu0 %v208_v3  ;;  %v204_v11 = vor.u32 %v225_v8, %v201_v9  ;;  %v224_v13 = vld [vmem:[%s357_s1 + $0x54] sm:$0xf0]  ;;  %v223_v14 = vld [vmem:[%s357_s1 + $0x54] sm:$0xf]  ;;  %v193_v15 = vld [vmem:[%s357_s1 + $0x58] sm:$0xf0] }
   0x5   :  { %130 = vmatpush.bf16.msra.mxu1 %v212_v7  ;;  %v192_v16 = vor.u32 %v224_v13, %v191_v12  ;;  %v196_v17 = vor.u32 %v223_v14, %v193_v15  ;;  %v183_v18 = vld [vmem:[%s357_s1 + $0x40] sm:$0xf]  ;;  %v222_v19 = vld [vmem:[%s357_s1 + $0x44] sm:$0xf0]  ;;  %v221_v20 = vld [vmem:[%s357_s1 + $0x44] sm:$0xf] }
   0x6   :  { %v185_v21 = vld [vmem:[%s357_s1 + $0x48] sm:$0xf0]  ;;  %v184_v22 = vor.u32 %v222_v19, %v183_v18  ;;  %v175_v24 = vld [vmem:[%s357_s1 + $0x30] sm:$0xf]  ;;  %v220_v25 = vld [vmem:[%s357_s1 + $0x34] sm:$0xf0] }
   0x7   :  { %v188_v23 = vor.u32 %v221_v20, %v185_v21  ;;  %v219_v26 = vld [vmem:[%s357_s1 + $0x34] sm:$0xf]  ;;  %v177_v27 = vld [vmem:[%s357_s1 + $0x38] sm:$0xf0]  ;;  %v176_v28 = vor.u32 %v220_v25, %v175_v24  ;;  %v167_v30 = vld [vmem:[%s357_s1 + $0x20] sm:$0xf] }
   0x8   :  { %118 = vmatpush.bf16.msra.mxu0 %v200_v10  ;;  %v180_v29 = vor.u32 %v219_v26, %v177_v27  ;;  %v218_v31 = vld [vmem:[%s357_s1 + $0x24] sm:$0xf0]  ;;  %v217_v32 = vld [vmem:[%s357_s1 + $0x24] sm:$0xf]  ;;  %v169_v33 = vld [vmem:[%s357_s1 + $0x28] sm:$0xf0] }
   0x9   :  { %131 = vmatpush.bf16.msra.mxu1 %v204_v11  ;;  %v168_v34 = vor.u32 %v218_v31, %v167_v30  ;;  %v172_v35 = vor.u32 %v217_v32, %v169_v33  ;;  %v159_v36 = vld [vmem:[%s357_s1 + $0x10] sm:$0xf]  ;;  %v216_v37 = vld [vmem:[%s357_s1 + $0x14] sm:$0xf0]  ;;  %v215_v38 = vld [vmem:[%s357_s1 + $0x14] sm:$0xf] }
   0xa   :  { %v161_v39 = vld [vmem:[%s357_s1 + $0x18] sm:$0xf0]  ;;  %v160_v40 = vor.u32 %v216_v37, %v159_v36  ;;  %v151_v42 = vld [vmem:[%s357_s1] sm:$0xf]  ;;  %v214_v43 = vld [vmem:[%s357_s1 + $0x4] sm:$0xf0] }
   0xb   :  { %v164_v41 = vor.u32 %v215_v38, %v161_v39  ;;  %v213_v44 = vld [vmem:[%s357_s1 + $0x4] sm:$0xf]  ;;  %v153_v45 = vld [vmem:[%s357_s1 + $0x8] sm:$0xf0]  ;;  %v152_v46 = vor.u32 %v214_v43, %v151_v42  ;;  %v14_v48 = vld [vmem:[%s358_s0] sm:$0xf] }
   0xc   :  { %119 = vmatpush.bf16.msra.mxu0 %v192_v16  ;;  %v156_v47 = vor.u32 %v213_v44, %v153_v45  ;;  %v31_v49 = vld [vmem:[%s359_s2] sm:$0x3] }
   0xd   :  { %132 = vmatpush.bf16.msra.mxu1 %v196_v17  ;;  %v33_v50 = vperm.slane %v31_v49, 0  ;;  %v34_v51 = vperm.slane %v31_v49, 1 }
  0x10   :  { %120 = vmatpush.bf16.msra.mxu0 %v184_v22 }
  0x11   :  { %133 = vmatpush.bf16.msra.mxu1 %v188_v23 }
  0x14   :  { %121 = vmatpush.bf16.msra.mxu0 %v176_v28 }
  0x15   :  { %134 = vmatpush.bf16.msra.mxu1 %v180_v29 }
  0x18   :  { %122 = vmatpush.bf16.msra.mxu0 %v168_v34 }
  0x19   :  { %135 = vmatpush.bf16.msra.mxu1 %v172_v35 }
  0x1c   :  { %123 = vmatpush.bf16.msra.mxu0 %v160_v40 }
  0x1d   :  { %136 = vmatpush.bf16.msra.mxu1 %v164_v41 }
  0x20   :  { %124 = vmatpush.bf16.msra.mxu0 %v152_v46 }
  0x21   :  { %137 = vmatpush.bf16.msra.mxu1 %v156_v47 }
  0x23   :  { %125 = vmatmul.bf16.vlgmr.msra.gmra.mxu0 %v14_v48 }
  0x24   :  { %138 = vmatmul.bf16.vlgmr.msra.gmra.mxu1 %v14_v48 }
  0xa0   :  { %v126_v52 = vpop.f32.mrf.mxu0 }
  0xa1   :  { %v127_v53 = vadd.f32 %v126_v52, %v33_v50  ;;  %v139_v54 = vpop.f32.mrf.mxu1 }
  0xa2   :  { %v140_v55 = vadd.f32 %v139_v54, %v34_v51 }
  0xa3   :  { %143 = vst [vmem:[%s360_s3] sm:$0xff] %v127_v53 }
  0xa4   :  { %144 = vst [vmem:[%s360_s3 + $0x8] sm:$0xff] %v140_v55 }
  0xa8   :  { %v128_v56 = vpop.f32.mrf.mxu0 }
  0xa9   :  { %v141_v57 = vpop.f32.mrf.mxu1 }

// kernel: caption_net_forward.5
= control target key start
LH: loop header
LB: loop body
LE: loop exit
PB: predicated region body
PF: predicated region fallthrough
CT: control target
= control target key end

     0   :  { %s323_s1 = inlined_call_operand.vmem [shape: bf16[128,128], index: 1, kind: input, shape index: {}]   ;;  %s324_s2 = inlined_call_operand.vmem [shape: f32[1,128], index: 2, kind: input, shape index: {}]   ;;  %s325_s0 = inlined_call_operand.vmem [shape: bf16[64,128], index: 0, kind: input, shape index: {}]   ;;  %s326_s3 = inlined_call_operand.vmem [shape: f32[64,128], index: 3, kind: output, shape index: {}]  }
   0x1   :  { %v214_v0 = vld [vmem:[%s323_s1 + $0x38] sm:$0xff]  ;;  %v213_v1 = vld [vmem:[%s323_s1 + $0x30] sm:$0xff]  ;;  %v212_v2 = vld [vmem:[%s323_s1 + $0x28] sm:$0xff] }
   0x2   :  { %114 = vmatpush.bf16.msra.mxu0 %v214_v0  ;;  %215 = vmatpush.bf16.msra.mxu1 %v214_v0  ;;  %v211_v3 = vld [vmem:[%s323_s1 + $0x20] sm:$0xff]  ;;  %v210_v4 = vld [vmem:[%s323_s1 + $0x18] sm:$0xff]  ;;  %v209_v5 = vld [vmem:[%s323_s1 + $0x10] sm:$0xff] }
   0x3   :  { %216 = vmatpush.bf16.msra.mxu2 %v214_v0  ;;  %217 = vmatpush.bf16.msra.mxu3 %v214_v0  ;;  %v208_v6 = vld [vmem:[%s323_s1 + $0x8] sm:$0xff]  ;;  %v207_v7 = vld [vmem:[%s323_s1] sm:$0xff]  ;;  %v205_v10 = vld [vmem:[%s325_s0 + $0x10] sm:$0xff] }
   0x4   :  { %v203_v8 = vld [vmem:[%s325_s0] sm:$0xff]  ;;  %v204_v9 = vld [vmem:[%s325_s0 + $0x8] sm:$0xff]  ;;  %v206_v11 = vld [vmem:[%s325_s0 + $0x18] sm:$0xff] }
   0x5   :  { %v239_v12 = vld [vmem:[%s324_s2] ss:$0 sm:$0xff] }
   0x6   :  { %115 = vmatpush.bf16.msra.mxu0 %v213_v1  ;;  %218 = vmatpush.bf16.msra.mxu1 %v213_v1 }
   0x7   :  { %219 = vmatpush.bf16.msra.mxu2 %v213_v1  ;;  %220 = vmatpush.bf16.msra.mxu3 %v213_v1 }
   0xa   :  { %116 = vmatpush.bf16.msra.mxu0 %v212_v2  ;;  %221 = vmatpush.bf16.msra.mxu1 %v212_v2 }
   0xb   :  { %222 = vmatpush.bf16.msra.mxu2 %v212_v2  ;;  %223 = vmatpush.bf16.msra.mxu3 %v212_v2 }
   0xe   :  { %117 = vmatpush.bf16.msra.mxu0 %v211_v3  ;;  %224 = vmatpush.bf16.msra.mxu1 %v211_v3 }
   0xf   :  { %225 = vmatpush.bf16.msra.mxu2 %v211_v3  ;;  %226 = vmatpush.bf16.msra.mxu3 %v211_v3 }
  0x12   :  { %118 = vmatpush.bf16.msra.mxu0 %v210_v4  ;;  %227 = vmatpush.bf16.msra.mxu1 %v210_v4 }
  0x13   :  { %228 = vmatpush.bf16.msra.mxu2 %v210_v4  ;;  %229 = vmatpush.bf16.msra.mxu3 %v210_v4 }
  0x16   :  { %119 = vmatpush.bf16.msra.mxu0 %v209_v5  ;;  %230 = vmatpush.bf16.msra.mxu1 %v209_v5 }
  0x17   :  { %231 = vmatpush.bf16.msra.mxu2 %v209_v5  ;;  %232 = vmatpush.bf16.msra.mxu3 %v209_v5 }
  0x1a   :  { %120 = vmatpush.bf16.msra.mxu0 %v208_v6  ;;  %233 = vmatpush.bf16.msra.mxu1 %v208_v6 }
  0x1b   :  { %234 = vmatpush.bf16.msra.mxu2 %v208_v6  ;;  %235 = vmatpush.bf16.msra.mxu3 %v208_v6 }
  0x1e   :  { %121 = vmatpush.bf16.msra.mxu0 %v207_v7  ;;  %236 = vmatpush.bf16.msra.mxu1 %v207_v7 }
  0x1f   :  { %237 = vmatpush.bf16.msra.mxu2 %v207_v7  ;;  %238 = vmatpush.bf16.msra.mxu3 %v207_v7 }
  0x21   :  { %122 = vmatmul.bf16.vlgmr.msra.gmra.mxu0 %v203_v8  ;;  %127 = vmatmul.bf16.vlgmr.msra.gmra.mxu1 %v204_v9 }
  0x22   :  { %132 = vmatmul.bf16.vlgmr.msra.gmra.mxu2 %v205_v10  ;;  %137 = vmatmul.bf16.vlgmr.msra.gmra.mxu3 %v206_v11 }
  0x9e   :  { %v123_v13 = vpop.f32.mrf.mxu0  ;;  %v128_v14 = vpop.f32.mrf.mxu1 }
  0x9f   :  { %v124_v15 = vadd.f32 %v239_v12, %v123_v13  ;;  %v129_v16 = vadd.f32 %v239_v12, %v128_v14 }
  0xa1   :  { %143 = vst [vmem:[%s326_s3] sm:$0xff] %v124_v15 }
  0xa2   :  { %145 = vst [vmem:[%s326_s3 + $0x10] sm:$0xff] %v129_v16 }
  0xa5   :  { %v133_v17 = vpop.f32.mrf.mxu2  ;;  %v138_v18 = vpop.f32.mrf.mxu3 }
  0xa6   :  { %v134_v19 = vadd.f32 %v239_v12, %v133_v17  ;;  %v139_v20 = vadd.f32 %v239_v12, %v138_v18  ;;  %v125_v21 = vpop.f32.mrf.mxu0  ;;  %v130_v22 = vpop.f32.mrf.mxu1 }
  0xa7   :  { %v126_v23 = vadd.f32 %v239_v12, %v125_v21  ;;  %v131_v24 = vadd.f32 %v239_v12, %v130_v22 }
  0xa8   :  { %147 = vst [vmem:[%s326_s3 + $0x20] sm:$0xff] %v134_v19 }
  0xa9   :  { %149 = vst [vmem:[%s326_s3 + $0x30] sm:$0xff] %v139_v20 }
  0xaa   :  { %144 = vst [vmem:[%s326_s3 + $0x8] sm:$0xff] %v126_v23 }
  0xab   :  { %146 = vst [vmem:[%s326_s3 + $0x18] sm:$0xff] %v131_v24 }
  0xad   :  { %v135_v25 = vpop.f32.mrf.mxu2  ;;  %v140_v26 = vpop.f32.mrf.mxu3 }
  0xae   :  { %v136_v27 = vadd.f32 %v239_v12, %v135_v25  ;;  %v141_v28 = vadd.f32 %v239_v12, %v140_v26 }
  0xb0   :  { %148 = vst [vmem:[%s326_s3 + $0x28] sm:$0xff] %v136_v27 }
  0xb1   :  { %150 = vst [vmem:[%s326_s3 + $0x38] sm:$0xff] %v141_v28 }

// kernel: caption_net_forward.4
= control target key start
LH: loop header
LB: loop body
LE: loop exit
PB: predicated region body
PF: predicated region fallthrough
CT: control target
= control target key end

     0   :  { %s3492_s3 = inlined_call_operand.vmem [shape: bf16[128,512], index: 3, kind: input, shape index: {}]   ;;  %s3493_s2 = inlined_call_operand.vmem [shape: bf16[128,512], index: 2, kind: input, shape index: {}]   ;;  %s3494_s0 = inlined_call_operand.vmem [shape: f32[8,256], index: 0, kind: input, shape index: {}]   ;;  %s3495_s1 = inlined_call_operand.vmem [shape: bf16[8,8,128], index: 1, kind: input, shape index: {}]   ;;  %s3496_s4 = inlined_call_operand.vmem [shape: f32[1,512], index: 4, kind: input, shape index: {}]   ;;  %s3497_s5 = inlined_call_operand.vmem [shape: bf16[8,8,128], index: 5, kind: output, shape index: {}]  }
   0x1   :  { %v1941_v0 = vld [vmem:[%s3492_s3 + $0xe0] sm:$0xf]  ;;  %v2183_v1 = vld [vmem:[%s3492_s3 + $0xec] sm:$0xf0]  ;;  %v2181_v2 = vld [vmem:[%s3492_s3 + $0xe4] sm:$0xf] }
   0x2   :  { %v2352_v3 = vor.u32 %v2183_v1, %v1941_v0  ;;  %v1943_v4 = vld [vmem:[%s3492_s3 + $0xf0] sm:$0xf0]  ;;  %v1949_v5 = vld [vmem:[%s3492_s3 + $0xe8] sm:$0xf]  ;;  %v2184_v6 = vld [vmem:[%s3492_s3 + $0xf4] sm:$0xf0] }
   0x3   :  { %v2363_v7 = vor.u32 %v2181_v2, %v1943_v4  ;;  %v2365_v8 = vor.u32 %v2184_v6, %v1949_v5  ;;  %v2182_v9 = vld [vmem:[%s3492_s3 + $0xec] sm:$0xf]  ;;  %v1951_v10 = vld [vmem:[%s3492_s3 + $0xf8] sm:$0xf0]  ;;  %v1925_v11 = vld [vmem:[%s3492_s3 + $0xc0] sm:$0xf] }
   0x4   :  { %249 = vmatpush.bf16.msra.mxu0 %v2352_v3  ;;  %v2377_v12 = vor.u32 %v2182_v9, %v1951_v10  ;;  %v2179_v13 = vld [vmem:[%s3492_s3 + $0xcc] sm:$0xf0]  ;;  %v2177_v14 = vld [vmem:[%s3492_s3 + $0xc4] sm:$0xf]  ;;  %v1927_v15 = vld [vmem:[%s3492_s3 + $0xd0] sm:$0xf0] }
   0x5   :  { %262 = vmatpush.bf16.msra.mxu1 %v2363_v7  ;;  %275 = vmatpush.bf16.msra.mxu2 %v2365_v8  ;;  %v2390_v16 = vor.u32 %v2179_v13, %v1925_v11  ;;  %v2392_v17 = vor.u32 %v2177_v14, %v1927_v15  ;;  %v1933_v18 = vld [vmem:[%s3492_s3 + $0xc8] sm:$0xf]  ;;  %v2180_v19 = vld [vmem:[%s3492_s3 + $0xd4] sm:$0xf0]  ;;  %v2178_v20 = vld [vmem:[%s3492_s3 + $0xcc] sm:$0xf] }
   0x6   :  { %288 = vmatpush.bf16.msra.mxu3 %v2377_v12  ;;  %v2404_v21 = vor.u32 %v2180_v19, %v1933_v18  ;;  %v1935_v22 = vld [vmem:[%s3492_s3 + $0xd8] sm:$0xf0]  ;;  %v1909_v23 = vld [vmem:[%s3492_s3 + $0xa0] sm:$0xf]  ;;  %v2175_v24 = vld [vmem:[%s3492_s3 + $0xac] sm:$0xf0] }
   0x7   :  { %v2415_v25 = vor.u32 %v2178_v20, %v1935_v22  ;;  %v2173_v26 = vld [vmem:[%s3492_s3 + $0xa4] sm:$0xf]  ;;  %v1911_v27 = vld [vmem:[%s3492_s3 + $0xb0] sm:$0xf0]  ;;  %v1917_v28 = vld [vmem:[%s3492_s3 + $0xa8] sm:$0xf]  ;;  %v2427_v29 = vor.u32 %v2175_v24, %v1909_v23 }
   0x8   :  { %250 = vmatpush.bf16.msra.mxu0 %v2390_v16  ;;  %v2176_v30 = vld [vmem:[%s3492_s3 + $0xb4] sm:$0xf0]  ;;  %v2174_v31 = vld [vmem:[%s3492_s3 + $0xac] sm:$0xf]  ;;  %v1919_v32 = vld [vmem:[%s3492_s3 + $0xb8] sm:$0xf0]  ;;  %v2440_v33 = vor.u32 %v2173_v26, %v1911_v27 }
   0x9   :  { %263 = vmatpush.bf16.msra.mxu1 %v2392_v17  ;;  %276 = vmatpush.bf16.msra.mxu2 %v2404_v21  ;;  %v2442_v34 = vor.u32 %v2176_v30, %v1917_v28  ;;  %v1893_v35 = vld [vmem:[%s3492_s3 + $0x80] sm:$0xf]  ;;  %v2171_v36 = vld [vmem:[%s3492_s3 + $0x8c] sm:$0xf0]  ;;  %v2169_v37 = vld [vmem:[%s3492_s3 + $0x84] sm:$0xf]  ;;  %v2454_v38 = vor.u32 %v2174_v31, %v1919_v32 }
   0xa   :  { %289 = vmatpush.bf16.msra.mxu3 %v2415_v25  ;;  %v1895_v39 = vld [vmem:[%s3492_s3 + $0x90] sm:$0xf0]  ;;  %v1901_v40 = vld [vmem:[%s3492_s3 + $0x88] sm:$0xf]  ;;  %v2172_v41 = vld [vmem:[%s3492_s3 + $0x94] sm:$0xf0]  ;;  %v2472_v44 = vor.u32 %v2171_v36, %v1893_v35 }
   0xb   :  { %v2170_v42 = vld [vmem:[%s3492_s3 + $0x8c] sm:$0xf]  ;;  %v1903_v43 = vld [vmem:[%s3492_s3 + $0x98] sm:$0xf0]  ;;  %v2476_v45 = vor.u32 %v2169_v37, %v1895_v39  ;;  %v2478_v46 = vor.u32 %v2172_v41, %v1901_v40  ;;  %v1877_v47 = vld [vmem:[%s3492_s3 + $0x60] sm:$0xf] }
   0xc   :  { %251 = vmatpush.bf16.msra.mxu0 %v2427_v29  ;;  %v2167_v48 = vld [vmem:[%s3492_s3 + $0x6c] sm:$0xf0]  ;;  %v2165_v49 = vld [vmem:[%s3492_s3 + $0x64] sm:$0xf]  ;;  %v2490_v50 = vor.u32 %v2170_v42, %v1903_v43  ;;  %v1879_v51 = vld [vmem:[%s3492_s3 + $0x70] sm:$0xf0] }
   0xd   :  { %264 = vmatpush.bf16.msra.mxu1 %v2440_v33  ;;  %277 = vmatpush.bf16.msra.mxu2 %v2442_v34  ;;  %v1885_v52 = vld [vmem:[%s3492_s3 + $0x68] sm:$0xf]  ;;  %v2168_v53 = vld [vmem:[%s3492_s3 + $0x74] sm:$0xf0]  ;;  %v2166_v54 = vld [vmem:[%s3492_s3 + $0x6c] sm:$0xf]  ;;  %v2508_v56 = vor.u32 %v2167_v48, %v1877_v47  ;;  %v2512_v57 = vor.u32 %v2165_v49, %v1879_v51 }
   0xe   :  { %290 = vmatpush.bf16.msra.mxu3 %v2454_v38  ;;  %v1887_v55 = vld [vmem:[%s3492_s3 + $0x78] sm:$0xf0]  ;;  %v2514_v58 = vor.u32 %v2168_v53, %v1885_v52  ;;  %v1861_v59 = vld [vmem:[%s3492_s3 + $0x40] sm:$0xf]  ;;  %v2163_v60 = vld [vmem:[%s3492_s3 + $0x4c] sm:$0xf0] }
   0xf   :  { %v2161_v61 = vld [vmem:[%s3492_s3 + $0x44] sm:$0xf]  ;;  %v2526_v62 = vor.u32 %v2166_v54, %v1887_v55  ;;  %v1863_v63 = vld [vmem:[%s3492_s3 + $0x50] sm:$0xf0]  ;;  %v1869_v0 = vld [vmem:[%s3492_s3 + $0x48] sm:$0xf]  ;;  %v2544_v5 = vor.u32 %v2163_v60, %v1861_v59 }
  0x10   :  { %252 = vmatpush.bf16.msra.mxu0 %v2472_v44  ;;  %v2164_v1 = vld [vmem:[%s3492_s3 + $0x54] sm:$0xf0]  ;;  %v2162_v2 = vld [vmem:[%s3492_s3 + $0x4c] sm:$0xf]  ;;  %v1871_v4 = vld [vmem:[%s3492_s3 + $0x58] sm:$0xf0]  ;;  %v2548_v6 = vor.u32 %v2161_v61, %v1863_v63 }
  0x11   :  { %265 = vmatpush.bf16.msra.mxu1 %v2476_v45  ;;  %278 = vmatpush.bf16.msra.mxu2 %v2478_v46  ;;  %v2550_v9 = vor.u32 %v2164_v1, %v1869_v0  ;;  %v1845_v10 = vld [vmem:[%s3492_s3 + $0x20] sm:$0xf]  ;;  %v2159_v11 = vld [vmem:[%s3492_s3 + $0x2c] sm:$0xf0]  ;;  %v2157_v13 = vld [vmem:[%s3492_s3 + $0x24] sm:$0xf]  ;;  %v2562_v14 = vor.u32 %v2162_v2, %v1871_v4 }
  0x12   :  { %291 = vmatpush.bf16.msra.mxu3 %v2490_v50  ;;  %v1847_v15 = vld [vmem:[%s3492_s3 + $0x30] sm:$0xf0]  ;;  %v1853_v18 = vld [vmem:[%s3492_s3 + $0x28] sm:$0xf]  ;;  %v2160_v19 = vld [vmem:[%s3492_s3 + $0x34] sm:$0xf0]  ;;  %v2580_v23 = vor.u32 %v2159_v11, %v1845_v10 }
  0x13   :  { %v2158_v20 = vld [vmem:[%s3492_s3 + $0x2c] sm:$0xf]  ;;  %v1855_v22 = vld [vmem:[%s3492_s3 + $0x38] sm:$0xf0]  ;;  %v1829_v24 = vld [vmem:[%s3492_s3] sm:$0xf]  ;;  %v2590_v27 = vor.u32 %v2157_v13, %v1847_v15  ;;  %v2592_v28 = vor.u32 %v2160_v19, %v1853_v18 }
  0x14   :  { %253 = vmatpush.bf16.msra.mxu0 %v2508_v56  ;;  %v2155_v26 = vld [vmem:[%s3492_s3 + $0xc] sm:$0xf0]  ;;  %v2153_v30 = vld [vmem:[%s3492_s3 + $0x4] sm:$0xf]  ;;  %v1831_v31 = vld [vmem:[%s3492_s3 + $0x10] sm:$0xf0]  ;;  %v2604_v35 = vor.u32 %v2158_v20, %v1855_v22 }
  0x15   :  { %266 = vmatpush.bf16.msra.mxu1 %v2512_v57  ;;  %279 = vmatpush.bf16.msra.mxu2 %v2514_v58  ;;  %v1837_v32 = vld [vmem:[%s3492_s3 + $0x8] sm:$0xf]  ;;  %v2156_v36 = vld [vmem:[%s3492_s3 + $0x14] sm:$0xf0]  ;;  %v2154_v37 = vld [vmem:[%s3492_s3 + $0xc] sm:$0xf]  ;;  %v2625_v43 = vor.u32 %v2155_v26, %v1829_v24  ;;  %v2638_v51 = vor.u32 %v2153_v30, %v1831_v31 }
  0x16   :  { %292 = vmatpush.bf16.msra.mxu3 %v2526_v62  ;;  %v1839_v39 = vld [vmem:[%s3492_s3 + $0x18] sm:$0xf0]  ;;  %v2069_v40 = vld [vmem:[%s3493_s2 + $0xe0] sm:$0xf]  ;;  %v2151_v41 = vld [vmem:[%s3493_s2 + $0xec] sm:$0xf0]  ;;  %v2640_v52 = vor.u32 %v2156_v36, %v1837_v32 }
  0x17   :  { %v2149_v42 = vld [vmem:[%s3493_s2 + $0xe4] sm:$0xf]  ;;  %v2071_v47 = vld [vmem:[%s3493_s2 + $0xf0] sm:$0xf0]  ;;  %v2077_v48 = vld [vmem:[%s3493_s2 + $0xe8] sm:$0xf]  ;;  %v2652_v59 = vor.u32 %v2154_v37, %v1839_v39  ;;  %v2654_v60 = vor.u32 %v2151_v41, %v2069_v40 }
  0x18   :  { %254 = vmatpush.bf16.msra.mxu0 %v2544_v5  ;;  %v2152_v49 = vld [vmem:[%s3493_s2 + $0xf4] sm:$0xf0]  ;;  %v2150_v53 = vld [vmem:[%s3493_s2 + $0xec] sm:$0xf]  ;;  %v2079_v54 = vld [vmem:[%s3493_s2 + $0xf8] sm:$0xf0]  ;;  %v2656_v61 = vor.u32 %v2149_v42, %v2071_v47 }
  0x19   :  { %267 = vmatpush.bf16.msra.mxu1 %v2548_v6  ;;  %280 = vmatpush.bf16.msra.mxu2 %v2550_v9  ;;  %v85_v55 = vld [vmem:[%s3494_s0] sm:$0xff]  ;;  %v2658_v63 = vor.u32 %v2152_v49, %v2077_v48  ;;  %v2147_v1 = vld [vmem:[%s3493_s2 + $0xcc] sm:$0xf0]  ;;  %v2670_v4 = vor.u32 %v2150_v53, %v2079_v54  ;;  %v2055_v10 = vld [vmem:[%s3493_s2 + $0xd0] sm:$0xf0] }
  0x1a   :  { %293 = vmatpush.bf16.msra.mxu3 %v2562_v14  ;;  %v2053_v0 = vld [vmem:[%s3493_s2 + $0xc0] sm:$0xf]  ;;  %v2145_v2 = vld [vmem:[%s3493_s2 + $0xc4] sm:$0xf]  ;;  %v2061_v11 = vld [vmem:[%s3493_s2 + $0xc8] sm:$0xf]  ;;  %v88_v15 = vpack.c.bf16 %v85_v55, %v85_v55 }
  0x1b   :  { %v2148_v13 = vld [vmem:[%s3493_s2 + $0xd4] sm:$0xf0]  ;;  %v2146_v18 = vld [vmem:[%s3493_s2 + $0xcc] sm:$0xf]  ;;  %v2063_v19 = vld [vmem:[%s3493_s2 + $0xd8] sm:$0xf0]  ;;  %v2691_v20 = vor.u32 %v2147_v1, %v2053_v0  ;;  %v2695_v22 = vor.u32 %v2145_v2, %v2055_v10 }
  0x1c   :  { %255 = vmatpush.bf16.msra.mxu0 %v2580_v23  ;;  %v2697_v24 = vor.u32 %v2148_v13, %v2061_v11  ;;  %v2037_v26 = vld [vmem:[%s3493_s2 + $0xa0] sm:$0xf]  ;;  %v2143_v30 = vld [vmem:[%s3493_s2 + $0xac] sm:$0xf0]  ;;  %v2141_v31 = vld [vmem:[%s3493_s2 + $0xa4] sm:$0xf]  ;;  %v2709_v32 = vor.u32 %v2146_v18, %v2063_v19 }
  0x1d   :  { %268 = vmatpush.bf16.msra.mxu1 %v2590_v27  ;;  %281 = vmatpush.bf16.msra.mxu2 %v2592_v28  ;;  %v2039_v36 = vld [vmem:[%s3493_s2 + $0xb0] sm:$0xf0]  ;;  %v2045_v37 = vld [vmem:[%s3493_s2 + $0xa8] sm:$0xf]  ;;  %v2144_v39 = vld [vmem:[%s3493_s2 + $0xb4] sm:$0xf0]  ;;  %v2727_v42 = vor.u32 %v2143_v30, %v2037_v26 }
  0x1e   :  { %294 = vmatpush.bf16.msra.mxu3 %v2604_v35  ;;  %3558 = vst [vmem:[#allocation2_spill] sm:$0xff] %v2697_v24  ;;  %v2142_v40 = vld [vmem:[%s3493_s2 + $0xac] sm:$0xf]  ;;  %v2047_v41 = vld [vmem:[%s3493_s2 + $0xb8] sm:$0xf0]  ;;  %v2731_v47 = vor.u32 %v2141_v31, %v2039_v36  ;;  %v2733_v48 = vor.u32 %v2144_v39, %v2045_v37 }
  0x1f   :  { %3559 = vst [vmem:[#allocation3_spill] sm:$0xff] %v2709_v32  ;;  %v2021_v49 = vld [vmem:[%s3493_s2 + $0x80] sm:$0xf]  ;;  %v2139_v53 = vld [vmem:[%s3493_s2 + $0x8c] sm:$0xf0]  ;;  %v2745_v55 = vor.u32 %v2142_v40, %v2047_v41 }
  0x20   :  { %256 = vmatpush.bf16.msra.mxu0 %v2625_v43  ;;  %3560 = vst [vmem:[#allocation4_spill] sm:$0xff] %v2727_v42  ;;  %v2137_v54 = vld [vmem:[%s3493_s2 + $0x84] sm:$0xf]  ;;  %v2023_v0 = vld [vmem:[%s3493_s2 + $0x90] sm:$0xf0]  ;;  %v2763_v13 = vor.u32 %v2139_v53, %v2021_v49 }
  0x21   :  { %269 = vmatpush.bf16.msra.mxu1 %v2638_v51  ;;  %282 = vmatpush.bf16.msra.mxu2 %v2640_v52  ;;  %3561 = vst [vmem:[#allocation5_spill] sm:$0xff] %v2731_v47  ;;  %v2029_v1 = vld [vmem:[%s3493_s2 + $0x88] sm:$0xf]  ;;  %v2140_v2 = vld [vmem:[%s3493_s2 + $0x94] sm:$0xf0] }
  0x22   :  { %295 = vmatpush.bf16.msra.mxu3 %v2652_v59  ;;  %3562 = vst [vmem:[#allocation6_spill] sm:$0xff] %v2733_v48  ;;  %v2138_v10 = vld [vmem:[%s3493_s2 + $0x8c] sm:$0xf]  ;;  %v2031_v11 = vld [vmem:[%s3493_s2 + $0x98] sm:$0xf0]  ;;  %v2769_v18 = vor.u32 %v2140_v2, %v2029_v1 }
  0x23   :  { %257 = vmatmul.bf16.vlgmr.msra.gmra.mxu0 %v88_v15  ;;  %3563 = vst [vmem:[#allocation7_spill] sm:$0xff] %v2745_v55  ;;  %v2005_v19 = vld [vmem:[%s3493_s2 + $0x60] sm:$0xf]  ;;  %v2135_v26 = vld [vmem:[%s3493_s2 + $0x6c] sm:$0xf0]  ;;  %v2781_v31 = vor.u32 %v2138_v10, %v2031_v11 }
  0x24   :  { %461 = vmatpush.bf16.msrb.mxu0 %v2654_v60  ;;  %270 = vmatmul.bf16.vlgmr.msra.gmra.mxu1 %v88_v15  ;;  %3564 = vst [vmem:[#allocation8_spill] sm:$0xff] %v2763_v13  ;;  %v2133_v30 = vld [vmem:[%s3493_s2 + $0x64] sm:$0xf]  ;;  %v2007_v36 = vld [vmem:[%s3493_s2 + $0x70] sm:$0xf0]  ;;  %v2799_v49 = vor.u32 %v2135_v26, %v2005_v19 }
  0x25   :  { %474 = vmatpush.bf16.msrb.mxu1 %v2656_v61  ;;  %487 = vmatpush.bf16.msrb.mxu2 %v2658_v63  ;;  %3566 = vst [vmem:[#allocation10_spill] sm:$0xff] %v2769_v18  ;;  %v2013_v37 = vld [vmem:[%s3493_s2 + $0x68] sm:$0xf]  ;;  %v2136_v39 = vld [vmem:[%s3493_s2 + $0x74] sm:$0xf0]  ;;  %v2803_v53 = vor.u32 %v2133_v30, %v2007_v36 }
  0x26   :  { %500 = vmatpush.bf16.msrb.mxu3 %v2670_v4  ;;  %283 = vmatmul.bf16.vlgmr.msra.gmra.mxu2 %v88_v15  ;;  %3567 = vst [vmem:[#allocation11_spill] sm:$0xff] %v2781_v31  ;;  %v2134_v40 = vld [vmem:[%s3493_s2 + $0x6c] sm:$0xf]  ;;  %v2015_v41 = vld [vmem:[%s3493_s2 + $0x78] sm:$0xf0] }
  0x27   :  { %296 = vmatmul.bf16.vlgmr.msra.gmra.mxu3 %v88_v15  ;;  %v2767_v15 = vor.u32 %v2137_v54, %v2023_v0  ;;  %3568 = vst [vmem:[#allocation12_spill] sm:$0xff] %v2799_v49  ;;  %v2805_v54 = vor.u32 %v2136_v39, %v2013_v37  ;;  %v1989_v0 = vld [vmem:[%s3493_s2 + $0x40] sm:$0xf]  ;;  %v2131_v1 = vld [vmem:[%s3493_s2 + $0x4c] sm:$0xf0]  ;;  %v2817_v10 = vor.u32 %v2134_v40, %v2015_v41 }
  0x28   :  { %462 = vmatpush.bf16.msrb.mxu0 %v2691_v20  ;;  %3569 = vst [vmem:[#allocation13_spill] sm:$0xff] %v2803_v53  ;;  %v2129_v2 = vld [vmem:[%s3493_s2 + $0x44] sm:$0xf]  ;;  %v1991_v11 = vld [vmem:[%s3493_s2 + $0x50] sm:$0xf0]  ;;  %v2835_v37 = vor.u32 %v2131_v1, %v1989_v0 }
  0x29   :  { %475 = vmatpush.bf16.msrb.mxu1 %v2695_v22  ;;  %488 = vmatpush.bf16.msrb.mxu2 %v2697_v24  ;;  %3565 = vst [vmem:[#allocation9_spill] sm:$0xff] %v2767_v15  ;;  %v1997_v19 = vld [vmem:[%s3493_s2 + $0x48] sm:$0xf]  ;;  %v2132_v26 = vld [vmem:[%s3493_s2 + $0x54] sm:$0xf0]  ;;  %v2839_v39 = vor.u32 %v2129_v2, %v1991_v11 }
  0x2a   :  { %501 = vmatpush.bf16.msrb.mxu3 %v2709_v32  ;;  %3570 = vst [vmem:[#allocation14_spill] sm:$0xff] %v2805_v54  ;;  %v2130_v30 = vld [vmem:[%s3493_s2 + $0x4c] sm:$0xf]  ;;  %v1999_v36 = vld [vmem:[%s3493_s2 + $0x58] sm:$0xf0]  ;;  %v2841_v40 = vor.u32 %v2132_v26, %v1997_v19 }
  0x2b   :  { %3571 = vst [vmem:[#allocation15_spill] sm:$0xff] %v2817_v10  ;;  %v1973_v41 = vld [vmem:[%s3493_s2 + $0x20] sm:$0xf]  ;;  %v2125_v0 = vld [vmem:[%s3493_s2 + $0x24] sm:$0xf]  ;;  %v2853_v1 = vor.u32 %v2130_v30, %v1999_v36 }
  0x2c   :  { %463 = vmatpush.bf16.msrb.mxu0 %v2727_v42  ;;  %3572 = vst [vmem:[#allocation16_spill] sm:$0xff] %v2835_v37  ;;  %v1975_v2 = vld [vmem:[%s3493_s2 + $0x30] sm:$0xf0]  ;;  %v1981_v11 = vld [vmem:[%s3493_s2 + $0x28] sm:$0xf] }
  0x2d   :  { %476 = vmatpush.bf16.msrb.mxu1 %v2731_v47  ;;  %489 = vmatpush.bf16.msrb.mxu2 %v2733_v48  ;;  %3573 = vst [vmem:[#allocation17_spill] sm:$0xff] %v2839_v39  ;;  %v2128_v19 = vld [vmem:[%s3493_s2 + $0x34] sm:$0xf0]  ;;  %v2126_v26 = vld [vmem:[%s3493_s2 + $0x2c] sm:$0xf] }
  0x2e   :  { %502 = vmatpush.bf16.msrb.mxu3 %v2745_v55  ;;  %3574 = vst [vmem:[#allocation18_spill] sm:$0xff] %v2841_v40  ;;  %v1983_v30 = vld [vmem:[%s3493_s2 + $0x38] sm:$0xf0] }
  0x2f   :  { %3575 = vst [vmem:[#allocation19_spill] sm:$0xff] %v2853_v1 }
  0x30   :  { %464 = vmatpush.bf16.msrb.mxu0 %v2763_v13 }
  0x31   :  { %477 = vmatpush.bf16.msrb.mxu1 %v2767_v15  ;;  %490 = vmatpush.bf16.msrb.mxu2 %v2769_v18 }
  0x32   :  { %503 = vmatpush.bf16.msrb.mxu3 %v2781_v31  ;;  %v2127_v31 = vld [vmem:[%s3493_s2 + $0x2c] sm:$0xf0] }
  0x33   :  { %v2871_v36 = vor.u32 %v2127_v31, %v1973_v41  ;;  %v2121_v31 = vld [vmem:[%s3493_s2 + $0x4] sm:$0xf]  ;;  %v2889_v41 = vor.u32 %v2126_v26, %v1983_v30  ;;  %v1967_v26 = vld [vmem:[%s3493_s2 + $0x18] sm:$0xf0] }
  0x34   :  { %465 = vmatpush.bf16.msrb.mxu0 %v2799_v49  ;;  %v2123_v49 = vld [vmem:[%s3493_s2 + $0xc] sm:$0xf0] }
  0x35   :  { %478 = vmatpush.bf16.msrb.mxu1 %v2803_v53  ;;  %491 = vmatpush.bf16.msrb.mxu2 %v2805_v54  ;;  %3576 = vst [vmem:[#allocation20_spill] sm:$0xff] %v2871_v36  ;;  %v2877_v54 = vor.u32 %v2128_v19, %v1981_v11  ;;  %v1957_v53 = vld [vmem:[%s3493_s2] sm:$0xf]  ;;  %v2124_v11 = vld [vmem:[%s3493_s2 + $0x14] sm:$0xf0] }
  0x36   :  { %504 = vmatpush.bf16.msrb.mxu3 %v2817_v10  ;;  %v2875_v10 = vor.u32 %v2125_v0, %v1975_v2  ;;  %3579 = vst [vmem:[#allocation23_spill] sm:$0xff] %v2889_v41  ;;  %v1959_v0 = vld [vmem:[%s3493_s2 + $0x10] sm:$0xf0]  ;;  %v1965_v2 = vld [vmem:[%s3493_s2 + $0x8] sm:$0xf]  ;;  %v2907_v30 = vor.u32 %v2123_v49, %v1957_v53 }
  0x37   :  { %3578 = vst [vmem:[#allocation22_spill] sm:$0xff] %v2877_v54  ;;  %v2122_v19 = vld [vmem:[%s3493_s2 + $0xc] sm:$0xf]  ;;  %v3585_v53 = vld [vmem:[#allocation12_spill] sm:$0xff] }
  0x38   :  { %466 = vmatpush.bf16.msrb.mxu0 %v2835_v37  ;;  %3577 = vst [vmem:[#allocation21_spill] sm:$0xff] %v2875_v10  ;;  %v3584_v49 = vld [vmem:[#allocation11_spill] sm:$0xff] }
  0x39   :  { %479 = vmatpush.bf16.msrb.mxu1 %v2839_v39  ;;  %492 = vmatpush.bf16.msrb.mxu2 %v2841_v40  ;;  %3580 = vst [vmem:[#allocation24_spill] sm:$0xff] %v2907_v30  ;;  %v2913_v40 = vor.u32 %v2124_v11, %v1965_v2  ;;  %v2916_v39 = vor.u32 %v2122_v19, %v1967_v26  ;;  %v3589_v2 = vld [vmem:[#allocation17_spill] sm:$0xff]  ;;  %v3590_v11 = vld [vmem:[#allocation18_spill] sm:$0xff]  ;;  %v3591_v19 = vld [vmem:[#allocation19_spill] sm:$0xff] }
  0x3a   :  { %505 = vmatpush.bf16.msrb.mxu3 %v2853_v1  ;;  %v2911_v1 = vor.u32 %v2121_v31, %v1959_v0  ;;  %v3587_v31 = vld [vmem:[#allocation14_spill] sm:$0xff]  ;;  %v3588_v0 = vld [vmem:[#allocation15_spill] sm:$0xff] }
  0x3b   :  { %3582 = vst [vmem:[#allocation26_spill] sm:$0xff] %v2913_v40 }
  0x3c   :  { %467 = vmatpush.bf16.msrb.mxu0 %v2871_v36  ;;  %3581 = vst [vmem:[#allocation25_spill] sm:$0xff] %v2911_v1  ;;  %v87_v36 = vld [vmem:[%s3495_s1] sm:$0xf]  ;;  %v3592_v26 = vld [vmem:[#allocation20_spill] sm:$0xff] }
  0x3d   :  { %480 = vmatpush.bf16.msrb.mxu1 %v2875_v10  ;;  %493 = vmatpush.bf16.msrb.mxu2 %v2877_v54  ;;  %3583 = vst [vmem:[#allocation27_spill] sm:$0xff] %v2916_v39 }
  0x3e   :  { %506 = vmatpush.bf16.msrb.mxu3 %v2889_v41 }
  0x40   :  { %468 = vmatpush.bf16.msrb.mxu0 %v2907_v30 }
  0x41   :  { %481 = vmatpush.bf16.msrb.mxu1 %v2911_v1  ;;  %494 = vmatpush.bf16.msrb.mxu2 %v2913_v40 }
  0x42   :  { %507 = vmatpush.bf16.msrb.mxu3 %v2916_v39 }
  0x43   :  { %469 = vmatmul.bf16.vlgmr.msrb.gmra.mxu0 %v87_v36 }
  0x44   :  { %593 = vmatpush.bf16.msra.mxu0 %v2352_v3  ;;  %482 = vmatmul.bf16.vlgmr.msrb.gmra.mxu1 %v87_v36 }
  0x45   :  { %606 = vmatpush.bf16.msra.mxu1 %v2363_v7  ;;  %495 = vmatmul.bf16.vlgmr.msrb.gmra.mxu2 %v87_v36 }
  0x46   :  { %508 = vmatmul.bf16.vlgmr.msrb.gmra.mxu3 %v87_v36  ;;  %619 = vmatpush.bf16.msra.mxu2 %v2365_v8  ;;  %v3586_v36 = vld [vmem:[#allocation13_spill] sm:$0xff] }
  0x47   :  { %632 = vmatpush.bf16.msra.mxu3 %v2377_v12 }
  0x48   :  { %594 = vmatpush.bf16.msra.mxu0 %v2390_v16 }
  0x49   :  { %607 = vmatpush.bf16.msra.mxu1 %v2392_v17 }
  0x4a   :  { %620 = vmatpush.bf16.msra.mxu2 %v2404_v21 }
  0x4b   :  { %633 = vmatpush.bf16.msra.mxu3 %v2415_v25 }
  0x4c   :  { %595 = vmatpush.bf16.msra.mxu0 %v2427_v29 }
  0x4d   :  { %608 = vmatpush.bf16.msra.mxu1 %v2440_v33 }
  0x4e   :  { %621 = vmatpush.bf16.msra.mxu2 %v2442_v34 }
  0x4f   :  { %634 = vmatpush.bf16.msra.mxu3 %v2454_v38 }
  0x50   :  { %596 = vmatpush.bf16.msra.mxu0 %v2472_v44 }
  0x51   :  { %609 = vmatpush.bf16.msra.mxu1 %v2476_v45 }
  0x52   :  { %622 = vmatpush.bf16.msra.mxu2 %v2478_v46 }
  0x53   :  { %635 = vmatpush.bf16.msra.mxu3 %v2490_v50 }
  0x54   :  { %597 = vmatpush.bf16.msra.mxu0 %v2508_v56 }
  0x55   :  { %610 = vmatpush.bf16.msra.mxu1 %v2512_v57 }
  0x56   :  { %623 = vmatpush.bf16.msra.mxu2 %v2514_v58 }
  0x57   :  { %636 = vmatpush.bf16.msra.mxu3 %v2526_v62 }
  0x58   :  { %598 = vmatpush.bf16.msra.mxu0 %v2544_v5 }
  0x59   :  { %611 = vmatpush.bf16.msra.mxu1 %v2548_v6 }
  0x5a   :  { %624 = vmatpush.bf16.msra.mxu2 %v2550_v9 }
  0x5b   :  { %637 = vmatpush.bf16.msra.mxu3 %v2562_v14 }
  0x5c   :  { %599 = vmatpush.bf16.msra.mxu0 %v2580_v23 }
  0x5d   :  { %612 = vmatpush.bf16.msra.mxu1 %v2590_v27 }
  0x5e   :  { %625 = vmatpush.bf16.msra.mxu2 %v2592_v28 }
  0x5f   :  { %638 = vmatpush.bf16.msra.mxu3 %v2604_v35 }
  0x60   :  { %600 = vmatpush.bf16.msra.mxu0 %v2625_v43 }
  0x61   :  { %613 = vmatpush.bf16.msra.mxu1 %v2638_v51 }
  0x62   :  { %626 = vmatpush.bf16.msra.mxu2 %v2640_v52 }
  0x63   :  { %639 = vmatpush.bf16.msra.mxu3 %v2652_v59 }
  0x64   :  { %645 = vmatpush.bf16.msrb.mxu0 %v2654_v60 }
  0x65   :  { %658 = vmatpush.bf16.msrb.mxu1 %v2656_v61 }
  0x66   :  { %671 = vmatpush.bf16.msrb.mxu2 %v2658_v63 }
  0x67   :  { %684 = vmatpush.bf16.msrb.mxu3 %v2670_v4 }
  0x68   :  { %646 = vmatpush.bf16.msrb.mxu0 %v2691_v20 }
  0x69   :  { %659 = vmatpush.bf16.msrb.mxu1 %v2695_v22 }
  0x6a   :  { %672 = vmatpush.bf16.msrb.mxu2 %v2697_v24 }
  0x6b   :  { %685 = vmatpush.bf16.msrb.mxu3 %v2709_v32 }
  0x6c   :  { %647 = vmatpush.bf16.msrb.mxu0 %v2727_v42 }
  0x6d   :  { %660 = vmatpush.bf16.msrb.mxu1 %v2731_v47 }
  0x6e   :  { %673 = vmatpush.bf16.msrb.mxu2 %v2733_v48 }
  0x6f   :  { %686 = vmatpush.bf16.msrb.mxu3 %v2745_v55 }
  0x70   :  { %648 = vmatpush.bf16.msrb.mxu0 %v2763_v13 }
  0x71   :  { %661 = vmatpush.bf16.msrb.mxu1 %v2767_v15 }
  0x72   :  { %674 = vmatpush.bf16.msrb.mxu2 %v2769_v18 }
  0x73   :  { %687 = vmatpush.bf16.msrb.mxu3 %v3584_v49 }
  0x74   :  { %649 = vmatpush.bf16.msrb.mxu0 %v3585_v53 }
  0x75   :  { %662 = vmatpush.bf16.msrb.mxu1 %v3586_v36 }
  0x76   :  { %675 = vmatpush.bf16.msrb.mxu2 %v3587_v31 }
  0x77   :  { %688 = vmatpush.bf16.msrb.mxu3 %v3588_v0 }
  0x78   :  { %650 = vmatpush.bf16.msrb.mxu0 %v2835_v37 }
  0x79   :  { %663 = vmatpush.bf16.msrb.mxu1 %v3589_v2 }
  0x7a   :  { %676 = vmatpush.bf16.msrb.mxu2 %v3590_v11 }
  0x7b   :  { %689 = vmatpush.bf16.msrb.mxu3 %v3591_v19 }
  0x7c   :  { %651 = vmatpush.bf16.msrb.mxu0 %v3592_v26 }
  0x7d   :  { %664 = vmatpush.bf16.msrb.mxu1 %v2875_v10 }
  0x7e   :  { %677 = vmatpush.bf16.msrb.mxu2 %v2877_v54 }
  0x7f   :  { %690 = vmatpush.bf16.msrb.mxu3 %v2889_v41  ;;  %v84_v41 = vld [vmem:[%s3496_s4] sm:$0xf] }
  0x80   :  { %652 = vmatpush.bf16.msrb.mxu0 %v2907_v30  ;;  %v2992_v54 = vperm.slane %v84_v41, 0 }
  0x81   :  { %665 = vmatpush.bf16.msrb.mxu1 %v2911_v1  ;;  %v2994_v1 = vperm.slane %v84_v41, 1 }
  0x82   :  { %678 = vmatpush.bf16.msrb.mxu2 %v2913_v40  ;;  %3593 = vst [vmem:[#allocation28_spill] sm:$0xff] %v2992_v54 }
  0x83   :  { %691 = vmatpush.bf16.msrb.mxu3 %v2916_v39  ;;  %3594 = vst [vmem:[#allocation29_spill] sm:$0xff] %v2994_v1 }
  0xa0   :  { %v258_v2 = vpop.f32.mrf.mxu0 }
  0xa1   :  { %v271_v11 = vpop.f32.mrf.mxu1 }
  0xa8   :  { %v260_v19 = vpop.f32.mrf.mxu0 }
  0xa9   :  { %v284_v0 = vpop.f32.mrf.mxu2  ;;  %v273_v26 = vpop.f32.mrf.mxu1 }
  0xaa   :  { %v297_v37 = vpop.f32.mrf.mxu3 }
  0xb1   :  { %v286_v10 = vpop.f32.mrf.mxu2 }
  0xb2   :  { %v299_v31 = vpop.f32.mrf.mxu3 }
  0xb3   :  { %v2998_v31 = vperm.slane %v84_v41, 3 }
  0xb5   :  { %3595 = vst [vmem:[#allocation30_spill] sm:$0xff] %v2998_v31 }
  0xc0   :  { %v470_v30 = vpop.f32.mrf.mxu0 }
  0xc1   :  { %v471_v40 = vadd.f32 %v470_v30, %v258_v2  ;;  %v483_v36 = vpop.f32.mrf.mxu1 }
  0xc2   :  { %v484_v39 = vadd.f32 %v483_v36, %v271_v11 }
  0xc3   :  { %v522_v53 = vadd.f32 %v2992_v54, %v471_v40 }
  0xc4   :  { %v523_v19 = vadd.f32 %v2994_v1, %v484_v39 }
  0xc5   :  { %v2083_v49 = vmul.f32 -1.442695, %v522_v53 }
  0xc6   :  { %v2084_v26 = vmul.f32 -1.442695, %v523_v19  ;;  %v3001_v19 = vperm.slane %v84_v41, 2 }
  0xc7   :  { %2185 = vpow2.f32 %v2083_v49 }
  0xc8   :  { %v496_v10 = vpop.f32.mrf.mxu2  ;;  %2187 = vpow2.f32 %v2084_v26  ;;  %v472_v15 = vpop.f32.mrf.mxu0  ;;  %3596 = vst [vmem:[#allocation31_spill] sm:$0xff] %v3001_v19 }
  0xc9   :  { %v509_v18 = vpop.f32.mrf.mxu3  ;;  %v485_v55 = vpop.f32.mrf.mxu1  ;;  %v497_v49 = vadd.f32 %v496_v10, %v284_v0 }
  0xca   :  { %v510_v13 = vadd.f32 %v509_v18, %v297_v37 }
  0xcb   :  { %v524_v15 = vadd.f32 %v3001_v19, %v497_v49 }
  0xcc   :  { %v525_v48 = vadd.f32 %v2998_v31, %v510_v13 }
  0xcd   :  { %v2186_v30 = vpop.eup %2185 }
  0xce   :  { %v2085_v2 = vmul.f32 -1.442695, %v525_v48  ;;  %v2188_v36 = vpop.eup %2187  ;;  %v529_v11 = vadd.f32 1.0, %v2186_v30 }
  0xcf   :  { %v548_v40 = vadd.f32 1.0, %v2188_v36 }
  0xd0   :  { %2189 = vpow2.f32 %v2085_v2  ;;  %v498_v39 = vpop.f32.mrf.mxu2  ;;  %v541_v36 = vand.u32 2147483648, %v529_v11  ;;  %vm535_vm2 = vweird.f32 %v529_v11 }
  0xd1   :  { %2191 = vrcp.f32 %v529_v11  ;;  %v511_v53 = vpop.f32.mrf.mxu3  ;;  %v560_v2 = vand.u32 2147483648, %v548_v40  ;;  %v558_v41 = vand.u32 2147483647, %v548_v40  ;;  %vm554_vm3 = vweird.f32 %v548_v40 }
  0xd2   :  { %2193 = vrcp.f32 %v548_v40  ;;  %v539_v53 = vand.u32 2147483647, %v529_v11  ;;  %v542_v49 = vor.u32 1.1754944e-38, %v541_v36 }
  0xd3   :  { %vm559_vm7 = vcmp.eq.f32.partialorder %v558_v41, 8.507059e+37 }
  0xd4   :  { %vm540_vm6 = vcmp.eq.f32.partialorder %v539_v53, 8.507059e+37 }
  0xd6   :  { %v2190_v26 = vpop.eup %2189 }
  0xd7   :  { %v2192_v1 = vpop.eup %2191  ;;  %v568_v55 = vadd.f32 1.0, %v2190_v26 }
  0xd8   :  { %v2194_v18 = vpop.eup %2193  ;;  %v531_v13 = vmul.f32 %v2192_v1, %v529_v11  ;;  %vm536_vm0 = vweird.f32 %v2192_v1 }
  0xd9   :  { %v550_v37 = vmul.f32 %v2194_v18, %v548_v40  ;;  %2195 = vrcp.f32 %v568_v55  ;;  %vm555_vm1 = vweird.f32 %v2194_v18  ;;  %vm537_vm4 = vmor %vm535_vm2, %vm536_vm0  ;;  %v580_v32 = vand.u32 2147483648, %v568_v55 }
  0xda   :  { %v532_v48 = vsub.f32 1.0, %v531_v13  ;;  %2197 = vtanh.f32 %v524_v15  ;;  %v86_v13 = vld [vmem:[%s3494_s0 + $0x8] sm:$0xff]  ;;  %vm556_vm5 = vmor %vm554_vm3, %vm555_vm1  ;;  %v561_v15 = vor.u32 1.1754944e-38, %v560_v2  ;;  %vm574_vm9 = vweird.f32 %v568_v55 }
  0xdb   :  { %v551_v30 = vsub.f32 1.0, %v550_v37  ;;  %v581_v53 = vor.u32 1.1754944e-38, %v580_v32  ;;  %v2086_v32 = vld [vmem:[%s3495_s1 + $0x4] sm:$0xf] }
  0xdc   :  { %v533_v39 = vmul.f32 %v2192_v1, %v532_v48 }
  0xdd   :  { %v552_v0 = vmul.f32 %v2194_v18, %v551_v30 }
  0xde   :  { %v534_v10 = vadd.f32 %v2192_v1, %v533_v39 }
  0xdf   :  { %v2196_v31 = vpop.eup %2195  ;;  %v553_v26 = vadd.f32 %v2194_v18, %v552_v0 }
  0xe0   :  { %v538_v37 = vsel %vm537_vm4, %v2192_v1, %v534_v10  ;;  %v570_v48 = vmul.f32 %v2196_v31, %v568_v55  ;;  %v2198_v19 = vpop.eup %2197  ;;  %vm575_vm8 = vweird.f32 %v2196_v31  ;;  %v578_v1 = vand.u32 2147483647, %v568_v55  ;;  %v3600_v55 = vld [vmem:[#allocation6_spill] sm:$0xff]  ;;  %v3601_v10 = vld [vmem:[#allocation7_spill] sm:$0xff] }
  0xe1   :  { %v543_v30 = vsel %vm540_vm6, %v542_v49, %v538_v37  ;;  %v557_v54 = vsel %vm556_vm5, %v2194_v18, %v553_v26  ;;  %vm576_vm10 = vmor %vm574_vm9, %vm575_vm8  ;;  %v3602_v49 = vld [vmem:[#allocation8_spill] sm:$0xff]  ;;  %v3603_v26 = vld [vmem:[#allocation9_spill] sm:$0xff] }
  0xe2   :  { %v562_v39 = vsel %vm559_vm7, %v561_v15, %v557_v54  ;;  %v585_v11 = vmul.f32 %v2198_v19, %v543_v30  ;;  %v571_v47 = vsub.f32 1.0, %v570_v48  ;;  %vm579_vm11 = vcmp.eq.f32.partialorder %v578_v1, 8.507059e+37  ;;  %v3605_v15 = vld [vmem:[#allocation11_spill] sm:$0xff]  ;;  %v3606_v37 = vld [vmem:[#allocation12_spill] sm:$0xff]  ;;  %v3607_v48 = vld [vmem:[#allocation13_spill] sm:$0xff] }
  0xe3   :  { %v584_v40 = vmul.f32 %v562_v39, %v86_v13  ;;  %v3604_v13 = vld [vmem:[#allocation10_spill] sm:$0xff]  ;;  %v3609_v39 = vld [vmem:[#allocation15_spill] sm:$0xff] }
  0xe4   :  { %v572_v42 = vmul.f32 %v2196_v31, %v571_v47  ;;  %v3598_v47 = vld [vmem:[#allocation4_spill] sm:$0xff]  ;;  %v3608_v30 = vld [vmem:[#allocation14_spill] sm:$0xff]  ;;  %v3613_v1 = vld [vmem:[#allocation19_spill] sm:$0xff] }
  0xe5   :  { %v3007_v36 = vadd.f32 %v585_v11, %v584_v40  ;;  %v3610_v11 = vld [vmem:[#allocation16_spill] sm:$0xff]  ;;  %v3611_v40 = vld [vmem:[#allocation17_spill] sm:$0xff] }
  0xe6   :  { %v573_v0 = vadd.f32 %v2196_v31, %v572_v42  ;;  %v3597_v42 = vld [vmem:[#allocation3_spill] sm:$0xff] }
  0xe7   :  { %2199 = vtanh.f32 %v3007_v36 }
  0xe8   :  { %v577_v2 = vsel %vm576_vm10, %v2196_v31, %v573_v0  ;;  %v3599_v31 = vld [vmem:[#allocation5_spill] sm:$0xff]  ;;  %v3612_v0 = vld [vmem:[#allocation18_spill] sm:$0xff] }
  0xe9   :  { %v582_v41 = vsel %vm579_vm11, %v581_v53, %v577_v2  ;;  %v3614_v2 = vld [vmem:[#allocation20_spill] sm:$0xff]  ;;  %v3615_v53 = vld [vmem:[#allocation21_spill] sm:$0xff] }
  0xed   :  { %v2200_v18 = vpop.eup %2199 }
  0xee   :  { %v588_v54 = vmul.f32 %v2200_v18, %v582_v41  ;;  %v3616_v18 = vld [vmem:[#allocation22_spill] sm:$0xff]  ;;  %v3617_v41 = vld [vmem:[#allocation23_spill] sm:$0xff] }
  0xf0   :  { %v589_v19 = vpack.c.bf16 %v588_v54, %v588_v54  ;;  %v3618_v54 = vld [vmem:[#allocation24_spill] sm:$0xff] }
  0xf2   :  { %590 = vst [vmem:[%s3497_s5] sm:$0xf] %v589_v19  ;;  %601 = vmatmul.bf16.vlgmr.msra.gmra.mxu0 %v589_v19  ;;  %614 = vmatmul.bf16.vlgmr.msra.gmra.mxu1 %v589_v19 }
  0xf3   :  { %627 = vmatmul.bf16.vlgmr.msra.gmra.mxu2 %v589_v19  ;;  %640 = vmatmul.bf16.vlgmr.msra.gmra.mxu3 %v589_v19  ;;  %v3619_v19 = vld [vmem:[#allocation25_spill] sm:$0xff] }
  0xf4   :  { %769 = vmatpush.bf16.msra.mxu0 %v2352_v3  ;;  %782 = vmatpush.bf16.msra.mxu1 %v2363_v7 }
  0xf5   :  { %795 = vmatpush.bf16.msra.mxu2 %v2365_v8  ;;  %808 = vmatpush.bf16.msra.mxu3 %v2377_v12 }
  0xf8   :  { %770 = vmatpush.bf16.msra.mxu0 %v2390_v16  ;;  %783 = vmatpush.bf16.msra.mxu1 %v2392_v17 }
  0xf9   :  { %796 = vmatpush.bf16.msra.mxu2 %v2404_v21  ;;  %809 = vmatpush.bf16.msra.mxu3 %v2415_v25 }
  0xfc   :  { %771 = vmatpush.bf16.msra.mxu0 %v2427_v29  ;;  %784 = vmatpush.bf16.msra.mxu1 %v2440_v33 }
  0xfd   :  { %797 = vmatpush.bf16.msra.mxu2 %v2442_v34  ;;  %810 = vmatpush.bf16.msra.mxu3 %v2454_v38 }
 0x100   :  { %772 = vmatpush.bf16.msra.mxu0 %v2472_v44  ;;  %785 = vmatpush.bf16.msra.mxu1 %v2476_v45 }
 0x101   :  { %798 = vmatpush.bf16.msra.mxu2 %v2478_v46  ;;  %811 = vmatpush.bf16.msra.mxu3 %v2490_v50 }
 0x102   :  { %653 = vmatmul.bf16.vlgmr.msrb.gmra.mxu0 %v2086_v32  ;;  %666 = vmatmul.bf16.vlgmr.msrb.gmra.mxu1 %v2086_v32 }
 0x103   :  { %679 = vmatmul.bf16.vlgmr.msrb.gmra.mxu2 %v2086_v32  ;;  %692 = vmatmul.bf16.vlgmr.msrb.gmra.mxu3 %v2086_v32  ;;  %v3620_v32 = vld [vmem:[#allocation26_spill] sm:$0xff] }
 0x104   :  { %773 = vmatpush.bf16.msra.mxu0 %v2508_v56  ;;  %786 = vmatpush.bf16.msra.mxu1 %v2512_v57 }
 0x105   :  { %799 = vmatpush.bf16.msra.mxu2 %v2514_v58  ;;  %812 = vmatpush.bf16.msra.mxu3 %v2526_v62 }
 0x108   :  { %774 = vmatpush.bf16.msra.mxu0 %v2544_v5  ;;  %787 = vmatpush.bf16.msra.mxu1 %v2548_v6 }
 0x109   :  { %800 = vmatpush.bf16.msra.mxu2 %v2550_v9  ;;  %813 = vmatpush.bf16.msra.mxu3 %v2562_v14 }
 0x10c   :  { %775 = vmatpush.bf16.msra.mxu0 %v2580_v23  ;;  %788 = vmatpush.bf16.msra.mxu1 %v2590_v27 }
 0x10d   :  { %801 = vmatpush.bf16.msra.mxu2 %v2592_v28  ;;  %814 = vmatpush.bf16.msra.mxu3 %v2604_v35 }
 0x110   :  { %776 = vmatpush.bf16.msra.mxu0 %v2625_v43  ;;  %789 = vmatpush.bf16.msra.mxu1 %v2638_v51 }
 0x111   :  { %802 = vmatpush.bf16.msra.mxu2 %v2640_v52  ;;  %815 = vmatpush.bf16.msra.mxu3 %v2652_v59 }
 0x114   :  { %821 = vmatpush.bf16.msrb.mxu0 %v2654_v60  ;;  %834 = vmatpush.bf16.msrb.mxu1 %v2656_v61 }
 0x115   :  { %847 = vmatpush.bf16.msrb.mxu2 %v2658_v63  ;;  %860 = vmatpush.bf16.msrb.mxu3 %v2670_v4 }
 0x118   :  { %822 = vmatpush.bf16.msrb.mxu0 %v2691_v20  ;;  %835 = vmatpush.bf16.msrb.mxu1 %v2695_v22 }
 0x119   :  { %848 = vmatpush.bf16.msrb.mxu2 %v2697_v24  ;;  %861 = vmatpush.bf16.msrb.mxu3 %v3597_v42 }
 0x11c   :  { %823 = vmatpush.bf16.msrb.mxu0 %v3598_v47  ;;  %836 = vmatpush.bf16.msrb.mxu1 %v3599_v31 }
 0x11d   :  { %849 = vmatpush.bf16.msrb.mxu2 %v3600_v55  ;;  %862 = vmatpush.bf16.msrb.mxu3 %v3601_v10 }
 0x120   :  { %824 = vmatpush.bf16.msrb.mxu0 %v3602_v49  ;;  %837 = vmatpush.bf16.msrb.mxu1 %v3603_v26  ;;  %v3623_v26 = vld [vmem:[#allocation29_spill] sm:$0xff] }
 0x121   :  { %850 = vmatpush.bf16.msrb.mxu2 %v3604_v13  ;;  %863 = vmatpush.bf16.msrb.mxu3 %v3605_v15  ;;  %v3622_v13 = vld [vmem:[#allocation28_spill] sm:$0xff] }
 0x124   :  { %825 = vmatpush.bf16.msrb.mxu0 %v3606_v37  ;;  %838 = vmatpush.bf16.msrb.mxu1 %v3607_v48 }
 0x125   :  { %851 = vmatpush.bf16.msrb.mxu2 %v3608_v30  ;;  %864 = vmatpush.bf16.msrb.mxu3 %v3609_v39 }
 0x128   :  { %826 = vmatpush.bf16.msrb.mxu0 %v3610_v11  ;;  %839 = vmatpush.bf16.msrb.mxu1 %v3611_v40  ;;  %v3621_v11 = vld [vmem:[#allocation27_spill] sm:$0xff] }
 0x129   :  { %852 = vmatpush.bf16.msrb.mxu2 %v3612_v0  ;;  %865 = vmatpush.bf16.msrb.mxu3 %v3613_v1 }
 0x12c   :  { %827 = vmatpush.bf16.msrb.mxu0 %v3614_v2  ;;  %840 = vmatpush.bf16.msrb.mxu1 %v3615_v53 }
 0x12d   :  { %853 = vmatpush.bf16.msrb.mxu2 %v3616_v18  ;;  %866 = vmatpush.bf16.msrb.mxu3 %v3617_v41 }
 0x130   :  { %828 = vmatpush.bf16.msrb.mxu0 %v3618_v54  ;;  %841 = vmatpush.bf16.msrb.mxu1 %v3619_v19 }
 0x131   :  { %854 = vmatpush.bf16.msrb.mxu2 %v3620_v32  ;;  %867 = vmatpush.bf16.msrb.mxu3 %v3621_v11 }
 0x16f   :  { %v602_v40 = vpop.f32.mrf.mxu0  ;;  %v615_v0 = vpop.f32.mrf.mxu1 }
 0x176   :  { %v628_v39 = vpop.f32.mrf.mxu2  ;;  %v641_v1 = vpop.f32.mrf.mxu3 }
 0x177   :  { %v604_v30 = vpop.f32.mrf.mxu0  ;;  %v617_v2 = vpop.f32.mrf.mxu1 }
 0x178   :  { %v3624_v2 = vld [vmem:[#allocation30_spill] sm:$0xff] }
 0x17e   :  { %v630_v48 = vpop.f32.mrf.mxu2  ;;  %v643_v53 = vpop.f32.mrf.mxu3 }
 0x17f   :  { %v654_v37 = vpop.f32.mrf.mxu0  ;;  %v667_v18 = vpop.f32.mrf.mxu1 }
 0x180   :  { %v655_v15 = vadd.f32 %v654_v37, %v602_v40  ;;  %v668_v41 = vadd.f32 %v667_v18, %v615_v0 }
 0x182   :  { %v697_v54 = vadd.f32 %v655_v15, %v3622_v13  ;;  %v698_v19 = vadd.f32 %v668_v41, %v3623_v26 }
 0x184   :  { %v2087_v49 = vmul.f32 -1.442695, %v697_v54  ;;  %v2088_v32 = vmul.f32 -1.442695, %v698_v19  ;;  %v3625_v19 = vld [vmem:[#allocation31_spill] sm:$0xff] }
 0x186   :  { %2201 = vpow2.f32 %v2087_v49  ;;  %v680_v11 = vpop.f32.mrf.mxu2  ;;  %v693_v10 = vpop.f32.mrf.mxu3 }
 0x187   :  { %2203 = vpow2.f32 %v2088_v32  ;;  %v694_v55 = vadd.f32 %v693_v10, %v641_v1  ;;  %v656_v31 = vpop.f32.mrf.mxu0  ;;  %v669_v30 = vpop.f32.mrf.mxu1  ;;  %v681_v18 = vadd.f32 %v680_v11, %v628_v39 }
 0x189   :  { %v700_v48 = vadd.f32 %v694_v55, %v3624_v2  ;;  %v699_v10 = vadd.f32 %v681_v18, %v3625_v19 }
 0x18b   :  { %v2089_v53 = vmul.f32 -1.442695, %v700_v48 }
 0x18c   :  { %v2202_v47 = vpop.eup %2201 }
 0x18d   :  { %v2204_v42 = vpop.eup %2203  ;;  %v704_v37 = vadd.f32 1.0, %v2202_v47  ;;  %2205 = vpow2.f32 %v2089_v53 }
 0x18e   :  { %v723_v40 = vadd.f32 1.0, %v2204_v42  ;;  %v695_v15 = vpop.f32.mrf.mxu3  ;;  %v682_v0 = vpop.f32.mrf.mxu2 }
 0x18f   :  { %2207 = vrcp.f32 %v704_v37  ;;  %v716_v48 = vand.u32 2147483648, %v704_v37  ;;  %v714_v53 = vand.u32 2147483647, %v704_v37  ;;  %vm710_vm14 = vweird.f32 %v704_v37 }
 0x190   :  { %2209 = vrcp.f32 %v723_v40  ;;  %v735_v47 = vand.u32 2147483648, %v723_v40  ;;  %v733_v39 = vand.u32 2147483647, %v723_v40  ;;  %vm729_vm15 = vweird.f32 %v723_v40 }
 0x191   :  { %v717_v18 = vor.u32 1.1754944e-38, %v716_v48  ;;  %vm715_vm2 = vcmp.eq.f32.partialorder %v714_v53, 8.507059e+37 }
 0x192   :  { %vm734_vm3 = vcmp.eq.f32.partialorder %v733_v39, 8.507059e+37  ;;  %v3630_v39 = vld [vmem:[#allocation6_spill] sm:$0xff] }
 0x193   :  { %v2206_v49 = vpop.eup %2205 }
 0x194   :  { %v743_v41 = vadd.f32 1.0, %v2206_v49 }
 0x195   :  { %v2208_v54 = vpop.eup %2207 }
 0x196   :  { %v2210_v31 = vpop.eup %2209  ;;  %v706_v1 = vmul.f32 %v2208_v54, %v704_v37  ;;  %2211 = vrcp.f32 %v743_v41  ;;  %vm711_vm12 = vweird.f32 %v2208_v54  ;;  %v755_v48 = vand.u32 2147483648, %v743_v41 }
 0x197   :  { %v725_v55 = vmul.f32 %v2210_v31, %v723_v40  ;;  %2213 = vtanh.f32 %v699_v10  ;;  %vm730_vm13 = vweird.f32 %v2210_v31  ;;  %vm712_vm0 = vmor %vm710_vm14, %vm711_vm12  ;;  %vm749_vm5 = vweird.f32 %v743_v41 }
 0x198   :  { %v707_v32 = vsub.f32 1.0, %v706_v1  ;;  %vm731_vm1 = vmor %vm729_vm15, %vm730_vm13  ;;  %v736_v1 = vor.u32 1.1754944e-38, %v735_v47  ;;  %v756_v53 = vor.u32 1.1754944e-38, %v755_v48  ;;  %v3642_v48 = vld [vmem:[#allocation18_spill] sm:$0xff] }
 0x199   :  { %v726_v30 = vsub.f32 1.0, %v725_v55 }
 0x19a   :  { %v708_v42 = vmul.f32 %v2208_v54, %v707_v32 }
 0x19b   :  { %v727_v15 = vmul.f32 %v2210_v31, %v726_v30 }
 0x19c   :  { %v2212_v11 = vpop.eup %2211  ;;  %v709_v0 = vadd.f32 %v2208_v54, %v708_v42 }
 0x19d   :  { %v728_v49 = vadd.f32 %v2210_v31, %v727_v15  ;;  %v745_v19 = vmul.f32 %v2212_v11, %v743_v41  ;;  %v2214_v10 = vpop.eup %2213  ;;  %vm750_vm4 = vweird.f32 %v2212_v11 }
 0x19e   :  { %v713_v55 = vsel %vm712_vm0, %v2208_v54, %v709_v0  ;;  %v753_v54 = vand.u32 2147483647, %v743_v41  ;;  %vm751_vm6 = vmor %vm749_vm5, %vm750_vm4  ;;  %v3629_v41 = vld [vmem:[#allocation5_spill] sm:$0xff]  ;;  %v3632_v0 = vld [vmem:[#allocation8_spill] sm:$0xff] }
 0x19f   :  { %v718_v2 = vsel %vm715_vm2, %v717_v18, %v713_v55  ;;  %v732_v32 = vsel %vm731_vm1, %v2210_v31, %v728_v49  ;;  %v746_v26 = vsub.f32 1.0, %v745_v19  ;;  %v3633_v18 = vld [vmem:[#allocation9_spill] sm:$0xff]  ;;  %v3634_v49 = vld [vmem:[#allocation10_spill] sm:$0xff]  ;;  %v3636_v55 = vld [vmem:[#allocation12_spill] sm:$0xff] }
 0x1a0   :  { %v737_v30 = vsel %vm734_vm3, %v736_v1, %v732_v32  ;;  %v760_v13 = vmul.f32 %v2214_v10, %v718_v2  ;;  %vm754_vm7 = vcmp.eq.f32.partialorder %v753_v54, 8.507059e+37  ;;  %v3635_v1 = vld [vmem:[#allocation11_spill] sm:$0xff]  ;;  %v3637_v10 = vld [vmem:[#allocation13_spill] sm:$0xff]  ;;  %v3638_v32 = vld [vmem:[#allocation14_spill] sm:$0xff] }
 0x1a1   :  { %v759_v24 = vmul.f32 %v737_v30, %v3007_v36  ;;  %v747_v42 = vmul.f32 %v2212_v11, %v746_v26  ;;  %v3626_v36 = vld [vmem:[#allocation2_spill] sm:$0xff]  ;;  %v3627_v26 = vld [vmem:[#allocation3_spill] sm:$0xff] }
 0x1a2   :  { %v3639_v30 = vld [vmem:[#allocation15_spill] sm:$0xff] }
 0x1a3   :  { %v3085_v37 = vadd.f32 %v760_v13, %v759_v24  ;;  %v748_v40 = vadd.f32 %v2212_v11, %v747_v42  ;;  %v2091_v24 = vld [vmem:[%s3495_s1 + $0x8] sm:$0xf]  ;;  %v3628_v13 = vld [vmem:[#allocation4_spill] sm:$0xff] }
 0x1a4   :  { %v3640_v42 = vld [vmem:[#allocation16_spill] sm:$0xff]  ;;  %v3643_v54 = vld [vmem:[#allocation19_spill] sm:$0xff] }
 0x1a5   :  { %2215 = vtanh.f32 %v3085_v37  ;;  %v752_v47 = vsel %vm751_vm6, %v2212_v11, %v748_v40  ;;  %v3631_v11 = vld [vmem:[#allocation7_spill] sm:$0xff]  ;;  %v3641_v40 = vld [vmem:[#allocation17_spill] sm:$0xff] }
 0x1a6   :  { %v757_v19 = vsel %vm754_vm7, %v756_v53, %v752_v47  ;;  %v3644_v47 = vld [vmem:[#allocation20_spill] sm:$0xff]  ;;  %v3645_v53 = vld [vmem:[#allocation21_spill] sm:$0xff] }
 0x1ab   :  { %v2216_v31 = vpop.eup %2215 }
 0x1ac   :  { %v763_v15 = vmul.f32 %v2216_v31, %v757_v19  ;;  %v3646_v31 = vld [vmem:[#allocation22_spill] sm:$0xff]  ;;  %v3647_v19 = vld [vmem:[#allocation23_spill] sm:$0xff] }
 0x1ae   :  { %v764_v2 = vpack.c.bf16 %v763_v15, %v763_v15  ;;  %v3648_v15 = vld [vmem:[#allocation24_spill] sm:$0xff] }
 0x1b0   :  { %2090 = vst [vmem:[%s3497_s5 + $0x4] sm:$0xf] %v764_v2  ;;  %777 = vmatmul.bf16.vlgmr.msra.gmra.mxu0 %v764_v2  ;;  %790 = vmatmul.bf16.vlgmr.msra.gmra.mxu1 %v764_v2 }
 0x1b1   :  { %803 = vmatmul.bf16.vlgmr.msra.gmra.mxu2 %v764_v2  ;;  %816 = vmatmul.bf16.vlgmr.msra.gmra.mxu3 %v764_v2  ;;  %v3649_v2 = vld [vmem:[#allocation25_spill] sm:$0xff] }
 0x1b2   :  { %945 = vmatpush.bf16.msra.mxu0 %v2352_v3  ;;  %958 = vmatpush.bf16.msra.mxu1 %v2363_v7 }
 0x1b3   :  { %971 = vmatpush.bf16.msra.mxu2 %v2365_v8  ;;  %984 = vmatpush.bf16.msra.mxu3 %v2377_v12 }
 0x1b6   :  { %946 = vmatpush.bf16.msra.mxu0 %v2390_v16  ;;  %959 = vmatpush.bf16.msra.mxu1 %v2392_v17 }
 0x1b7   :  { %972 = vmatpush.bf16.msra.mxu2 %v2404_v21  ;;  %985 = vmatpush.bf16.msra.mxu3 %v2415_v25 }
 0x1ba   :  { %947 = vmatpush.bf16.msra.mxu0 %v2427_v29  ;;  %960 = vmatpush.bf16.msra.mxu1 %v2440_v33 }
 0x1bb   :  { %973 = vmatpush.bf16.msra.mxu2 %v2442_v34  ;;  %986 = vmatpush.bf16.msra.mxu3 %v2454_v38 }
 0x1be   :  { %948 = vmatpush.bf16.msra.mxu0 %v2472_v44  ;;  %961 = vmatpush.bf16.msra.mxu1 %v2476_v45 }
 0x1bf   :  { %974 = vmatpush.bf16.msra.mxu2 %v2478_v46  ;;  %987 = vmatpush.bf16.msra.mxu3 %v2490_v50 }
 0x1c0   :  { %829 = vmatmul.bf16.vlgmr.msrb.gmra.mxu0 %v2091_v24  ;;  %842 = vmatmul.bf16.vlgmr.msrb.gmra.mxu1 %v2091_v24 }
 0x1c1   :  { %855 = vmatmul.bf16.vlgmr.msrb.gmra.mxu2 %v2091_v24  ;;  %868 = vmatmul.bf16.vlgmr.msrb.gmra.mxu3 %v2091_v24  ;;  %v3650_v24 = vld [vmem:[#allocation26_spill] sm:$0xff] }
 0x1c2   :  { %949 = vmatpush.bf16.msra.mxu0 %v2508_v56  ;;  %962 = vmatpush.bf16.msra.mxu1 %v2512_v57 }
 0x1c3   :  { %975 = vmatpush.bf16.msra.mxu2 %v2514_v58  ;;  %988 = vmatpush.bf16.msra.mxu3 %v2526_v62 }
 0x1c6   :  { %950 = vmatpush.bf16.msra.mxu0 %v2544_v5  ;;  %963 = vmatpush.bf16.msra.mxu1 %v2548_v6 }
 0x1c7   :  { %976 = vmatpush.bf16.msra.mxu2 %v2550_v9  ;;  %989 = vmatpush.bf16.msra.mxu3 %v2562_v14 }
 0x1ca   :  { %951 = vmatpush.bf16.msra.mxu0 %v2580_v23  ;;  %964 = vmatpush.bf16.msra.mxu1 %v2590_v27 }
 0x1cb   :  { %977 = vmatpush.bf16.msra.mxu2 %v2592_v28  ;;  %990 = vmatpush.bf16.msra.mxu3 %v2604_v35 }
 0x1ce   :  { %952 = vmatpush.bf16.msra.mxu0 %v2625_v43  ;;  %965 = vmatpush.bf16.msra.mxu1 %v2638_v51 }
 0x1cf   :  { %978 = vmatpush.bf16.msra.mxu2 %v2640_v52  ;;  %991 = vmatpush.bf16.msra.mxu3 %v2652_v59 }
 0x1d2   :  { %997 = vmatpush.bf16.msrb.mxu0 %v2654_v60  ;;  %1010 = vmatpush.bf16.msrb.mxu1 %v2656_v61 }
 0x1d3   :  { %1023 = vmatpush.bf16.msrb.mxu2 %v2658_v63  ;;  %1036 = vmatpush.bf16.msrb.mxu3 %v2670_v4 }
 0x1d6   :  { %998 = vmatpush.bf16.msrb.mxu0 %v2691_v20  ;;  %1011 = vmatpush.bf16.msrb.mxu1 %v2695_v22 }
 0x1d7   :  { %1024 = vmatpush.bf16.msrb.mxu2 %v3626_v36  ;;  %1037 = vmatpush.bf16.msrb.mxu3 %v3627_v26 }
 0x1da   :  { %999 = vmatpush.bf16.msrb.mxu0 %v3628_v13  ;;  %1012 = vmatpush.bf16.msrb.mxu1 %v3629_v41 }
 0x1db   :  { %1025 = vmatpush.bf16.msrb.mxu2 %v3630_v39  ;;  %1038 = vmatpush.bf16.msrb.mxu3 %v3631_v11 }
 0x1de   :  { %1000 = vmatpush.bf16.msrb.mxu0 %v3632_v0  ;;  %1013 = vmatpush.bf16.msrb.mxu1 %v3633_v18  ;;  %v3653_v18 = vld [vmem:[#allocation29_spill] sm:$0xff] }
 0x1df   :  { %1026 = vmatpush.bf16.msrb.mxu2 %v3634_v49  ;;  %1039 = vmatpush.bf16.msrb.mxu3 %v3635_v1  ;;  %v3652_v49 = vld [vmem:[#allocation28_spill] sm:$0xff] }
 0x1e2   :  { %1001 = vmatpush.bf16.msrb.mxu0 %v3636_v55  ;;  %1014 = vmatpush.bf16.msrb.mxu1 %v3637_v10 }
 0x1e3   :  { %1027 = vmatpush.bf16.msrb.mxu2 %v3638_v32  ;;  %1040 = vmatpush.bf16.msrb.mxu3 %v3639_v30 }
 0x1e6   :  { %1002 = vmatpush.bf16.msrb.mxu0 %v3640_v42  ;;  %1015 = vmatpush.bf16.msrb.mxu1 %v3641_v40  ;;  %v3651_v42 = vld [vmem:[#allocation27_spill] sm:$0xff] }
 0x1e7   :  { %1028 = vmatpush.bf16.msrb.mxu2 %v3642_v48  ;;  %1041 = vmatpush.bf16.msrb.mxu3 %v3643_v54 }
 0x1ea   :  { %1003 = vmatpush.bf16.msrb.mxu0 %v3644_v47  ;;  %1016 = vmatpush.bf16.msrb.mxu1 %v3645_v53 }
 0x1eb   :  { %1029 = vmatpush.bf16.msrb.mxu2 %v3646_v31  ;;  %1042 = vmatpush.bf16.msrb.mxu3 %v3647_v19 }
 0x1ee   :  { %1004 = vmatpush.bf16.msrb.mxu0 %v3648_v15  ;;  %1017 = vmatpush.bf16.msrb.mxu1 %v3649_v2 }
 0x1ef   :  { %1030 = vmatpush.bf16.msrb.mxu2 %v3650_v24  ;;  %1043 = vmatpush.bf16.msrb.mxu3 %v3651_v42 }
 0x22d   :  { %v778_v40 = vpop.f32.mrf.mxu0  ;;  %v791_v48 = vpop.f32.mrf.mxu1 }
 0x234   :  { %v804_v30 = vpop.f32.mrf.mxu2  ;;  %v817_v54 = vpop.f32.mrf.mxu3 }
 0x235   :  { %v780_v32 = vpop.f32.mrf.mxu0  ;;  %v793_v47 = vpop.f32.mrf.mxu1 }
 0x236   :  { %v3654_v47 = vld [vmem:[#allocation30_spill] sm:$0xff] }
 0x23c   :  { %v806_v10 = vpop.f32.mrf.mxu2  ;;  %v819_v53 = vpop.f32.mrf.mxu3 }
 0x23d   :  { %v830_v55 = vpop.f32.mrf.mxu0  ;;  %v843_v31 = vpop.f32.mrf.mxu1 }
 0x23e   :  { %v831_v1 = vadd.f32 %v830_v55, %v778_v40  ;;  %v844_v19 = vadd.f32 %v843_v31, %v791_v48 }
 0x240   :  { %v873_v15 = vadd.f32 %v831_v1, %v3652_v49  ;;  %v874_v2 = vadd.f32 %v844_v19, %v3653_v18 }
 0x242   :  { %v2092_v0 = vmul.f32 -1.442695, %v873_v15  ;;  %v2093_v24 = vmul.f32 -1.442695, %v874_v2  ;;  %v3655_v2 = vld [vmem:[#allocation31_spill] sm:$0xff] }
 0x244   :  { %2217 = vpow2.f32 %v2092_v0  ;;  %v856_v42 = vpop.f32.mrf.mxu2  ;;  %v869_v11 = vpop.f32.mrf.mxu3 }
 0x245   :  { %2219 = vpow2.f32 %v2093_v24  ;;  %v870_v39 = vadd.f32 %v869_v11, %v817_v54  ;;  %v832_v41 = vpop.f32.mrf.mxu0  ;;  %v845_v32 = vpop.f32.mrf.mxu1  ;;  %v857_v31 = vadd.f32 %v856_v42, %v804_v30 }
 0x247   :  { %v876_v10 = vadd.f32 %v870_v39, %v3654_v47  ;;  %v875_v11 = vadd.f32 %v857_v31, %v3655_v2 }
 0x249   :  { %v2094_v53 = vmul.f32 -1.442695, %v876_v10 }
 0x24a   :  { %v2218_v13 = vpop.eup %2217 }
 0x24b   :  { %v2220_v26 = vpop.eup %2219  ;;  %v880_v55 = vadd.f32 1.0, %v2218_v13  ;;  %2221 = vpow2.f32 %v2094_v53 }
 0x24c   :  { %v899_v40 = vadd.f32 1.0, %v2220_v26  ;;  %v871_v1 = vpop.f32.mrf.mxu3  ;;  %v858_v48 = vpop.f32.mrf.mxu2 }
 0x24d   :  { %2223 = vrcp.f32 %v880_v55  ;;  %v892_v10 = vand.u32 2147483648, %v880_v55  ;;  %v890_v53 = vand.u32 2147483647, %v880_v55  ;;  %vm886_vm10 = vweird.f32 %v880_v55 }
 0x24e   :  { %2225 = vrcp.f32 %v899_v40  ;;  %v911_v13 = vand.u32 2147483648, %v899_v40  ;;  %v909_v30 = vand.u32 2147483647, %v899_v40  ;;  %vm905_vm11 = vweird.f32 %v899_v40 }
 0x24f   :  { %v893_v31 = vor.u32 1.1754944e-38, %v892_v10  ;;  %vm891_vm14 = vcmp.eq.f32.partialorder %v890_v53, 8.507059e+37 }
 0x250   :  { %vm910_vm15 = vcmp.eq.f32.partialorder %v909_v30, 8.507059e+37  ;;  %v3660_v30 = vld [vmem:[#allocation6_spill] sm:$0xff] }
 0x251   :  { %v2222_v0 = vpop.eup %2221 }
 0x252   :  { %v919_v19 = vadd.f32 1.0, %v2222_v0 }
 0x253   :  { %v2224_v15 = vpop.eup %2223 }
 0x254   :  { %v2226_v41 = vpop.eup %2225  ;;  %v882_v54 = vmul.f32 %v2224_v15, %v880_v55  ;;  %2227 = vrcp.f32 %v919_v19  ;;  %vm887_vm8 = vweird.f32 %v2224_v15  ;;  %v931_v10 = vand.u32 2147483648, %v919_v19 }
 0x255   :  { %v901_v39 = vmul.f32 %v2226_v41, %v899_v40  ;;  %2229 = vtanh.f32 %v875_v11  ;;  %vm906_vm9 = vweird.f32 %v2226_v41  ;;  %vm888_vm12 = vmor %vm886_vm10, %vm887_vm8  ;;  %vm925_vm1 = vweird.f32 %v919_v19 }
 0x256   :  { %v883_v24 = vsub.f32 1.0, %v882_v54  ;;  %vm907_vm13 = vmor %vm905_vm11, %vm906_vm9  ;;  %v912_v54 = vor.u32 1.1754944e-38, %v911_v13  ;;  %v932_v53 = vor.u32 1.1754944e-38, %v931_v10  ;;  %v3672_v10 = vld [vmem:[#allocation18_spill] sm:$0xff] }
 0x257   :  { %v902_v32 = vsub.f32 1.0, %v901_v39 }
 0x258   :  { %v884_v26 = vmul.f32 %v2224_v15, %v883_v24 }
 0x259   :  { %v903_v1 = vmul.f32 %v2226_v41, %v902_v32 }
 0x25a   :  { %v2228_v42 = vpop.eup %2227  ;;  %v885_v48 = vadd.f32 %v2224_v15, %v884_v26 }
 0x25b   :  { %v904_v0 = vadd.f32 %v2226_v41, %v903_v1  ;;  %v921_v2 = vmul.f32 %v2228_v42, %v919_v19  ;;  %v2230_v11 = vpop.eup %2229  ;;  %vm926_vm0 = vweird.f32 %v2228_v42 }
 0x25c   :  { %v889_v39 = vsel %vm888_vm12, %v2224_v15, %v885_v48  ;;  %v929_v15 = vand.u32 2147483647, %v919_v19  ;;  %vm927_vm2 = vmor %vm925_vm1, %vm926_vm0  ;;  %v3659_v19 = vld [vmem:[#allocation5_spill] sm:$0xff]  ;;  %v3662_v48 = vld [vmem:[#allocation8_spill] sm:$0xff] }
 0x25d   :  { %v894_v47 = vsel %vm891_vm14, %v893_v31, %v889_v39  ;;  %v908_v24 = vsel %vm907_vm13, %v2226_v41, %v904_v0  ;;  %v922_v18 = vsub.f32 1.0, %v921_v2  ;;  %v3663_v31 = vld [vmem:[#allocation9_spill] sm:$0xff]  ;;  %v3664_v0 = vld [vmem:[#allocation10_spill] sm:$0xff]  ;;  %v3666_v39 = vld [vmem:[#allocation12_spill] sm:$0xff] }
 0x25e   :  { %v913_v32 = vsel %vm910_vm15, %v912_v54, %v908_v24  ;;  %v936_v49 = vmul.f32 %v2230_v11, %v894_v47  ;;  %vm930_vm3 = vcmp.eq.f32.partialorder %v929_v15, 8.507059e+37  ;;  %v3665_v54 = vld [vmem:[#allocation11_spill] sm:$0xff]  ;;  %v3667_v11 = vld [vmem:[#allocation13_spill] sm:$0xff]  ;;  %v3668_v24 = vld [vmem:[#allocation14_spill] sm:$0xff] }
 0x25f   :  { %v935_v36 = vmul.f32 %v913_v32, %v3085_v37  ;;  %v923_v26 = vmul.f32 %v2228_v42, %v922_v18  ;;  %v2096_v37 = vld [vmem:[%s3495_s1 + $0xc] sm:$0xf] }
 0x260   :  { %v3657_v18 = vld [vmem:[#allocation3_spill] sm:$0xff] }
 0x261   :  { %v3163_v55 = vadd.f32 %v936_v49, %v935_v36  ;;  %v924_v40 = vadd.f32 %v2228_v42, %v923_v26  ;;  %v3656_v36 = vld [vmem:[#allocation2_spill] sm:$0xff]  ;;  %v3658_v49 = vld [vmem:[#allocation4_spill] sm:$0xff]  ;;  %v3669_v32 = vld [vmem:[#allocation15_spill] sm:$0xff] }
 0x262   :  { %v3670_v26 = vld [vmem:[#allocation16_spill] sm:$0xff]  ;;  %v3673_v15 = vld [vmem:[#allocation19_spill] sm:$0xff] }
 0x263   :  { %2231 = vtanh.f32 %v3163_v55  ;;  %v928_v13 = vsel %vm927_vm2, %v2228_v42, %v924_v40  ;;  %v3661_v42 = vld [vmem:[#allocation7_spill] sm:$0xff]  ;;  %v3671_v40 = vld [vmem:[#allocation17_spill] sm:$0xff] }
 0x264   :  { %v933_v2 = vsel %vm930_vm3, %v932_v53, %v928_v13  ;;  %v3674_v13 = vld [vmem:[#allocation20_spill] sm:$0xff]  ;;  %v3675_v53 = vld [vmem:[#allocation21_spill] sm:$0xff] }
 0x269   :  { %v2232_v41 = vpop.eup %2231 }
 0x26a   :  { %v939_v1 = vmul.f32 %v2232_v41, %v933_v2  ;;  %v3676_v41 = vld [vmem:[#allocation22_spill] sm:$0xff]  ;;  %v3677_v2 = vld [vmem:[#allocation23_spill] sm:$0xff] }
 0x26c   :  { %v940_v47 = vpack.c.bf16 %v939_v1, %v939_v1  ;;  %v3678_v1 = vld [vmem:[#allocation24_spill] sm:$0xff] }
 0x26e   :  { %2095 = vst [vmem:[%s3497_s5 + $0x8] sm:$0xf] %v940_v47  ;;  %953 = vmatmul.bf16.vlgmr.msra.gmra.mxu0 %v940_v47  ;;  %966 = vmatmul.bf16.vlgmr.msra.gmra.mxu1 %v940_v47 }
 0x26f   :  { %979 = vmatmul.bf16.vlgmr.msra.gmra.mxu2 %v940_v47  ;;  %992 = vmatmul.bf16.vlgmr.msra.gmra.mxu3 %v940_v47  ;;  %v3679_v47 = vld [vmem:[#allocation25_spill] sm:$0xff] }
 0x270   :  { %1121 = vmatpush.bf16.msra.mxu0 %v2352_v3  ;;  %1134 = vmatpush.bf16.msra.mxu1 %v2363_v7 }
 0x271   :  { %1147 = vmatpush.bf16.msra.mxu2 %v2365_v8  ;;  %1160 = vmatpush.bf16.msra.mxu3 %v2377_v12 }
 0x274   :  { %1122 = vmatpush.bf16.msra.mxu0 %v2390_v16  ;;  %1135 = vmatpush.bf16.msra.mxu1 %v2392_v17 }
 0x275   :  { %1148 = vmatpush.bf16.msra.mxu2 %v2404_v21  ;;  %1161 = vmatpush.bf16.msra.mxu3 %v2415_v25 }
 0x278   :  { %1123 = vmatpush.bf16.msra.mxu0 %v2427_v29  ;;  %1136 = vmatpush.bf16.msra.mxu1 %v2440_v33 }
 0x279   :  { %1149 = vmatpush.bf16.msra.mxu2 %v2442_v34  ;;  %1162 = vmatpush.bf16.msra.mxu3 %v2454_v38 }
 0x27c   :  { %1124 = vmatpush.bf16.msra.mxu0 %v2472_v44  ;;  %1137 = vmatpush.bf16.msra.mxu1 %v2476_v45 }
 0x27d   :  { %1150 = vmatpush.bf16.msra.mxu2 %v2478_v46  ;;  %1163 = vmatpush.bf16.msra.mxu3 %v2490_v50 }
 0x27e   :  { %1005 = vmatmul.bf16.vlgmr.msrb.gmra.mxu0 %v2096_v37  ;;  %1018 = vmatmul.bf16.vlgmr.msrb.gmra.mxu1 %v2096_v37 }
 0x27f   :  { %1031 = vmatmul.bf16.vlgmr.msrb.gmra.mxu2 %v2096_v37  ;;  %1044 = vmatmul.bf16.vlgmr.msrb.gmra.mxu3 %v2096_v37  ;;  %v3680_v37 = vld [vmem:[#allocation26_spill] sm:$0xff] }
 0x280   :  { %1125 = vmatpush.bf16.msra.mxu0 %v2508_v56  ;;  %1138 = vmatpush.bf16.msra.mxu1 %v2512_v57 }
 0x281   :  { %1151 = vmatpush.bf16.msra.mxu2 %v2514_v58  ;;  %1164 = vmatpush.bf16.msra.mxu3 %v2526_v62 }
 0x284   :  { %1126 = vmatpush.bf16.msra.mxu0 %v2544_v5  ;;  %1139 = vmatpush.bf16.msra.mxu1 %v2548_v6 }
 0x285   :  { %1152 = vmatpush.bf16.msra.mxu2 %v2550_v9  ;;  %1165 = vmatpush.bf16.msra.mxu3 %v2562_v14 }
 0x288   :  { %1127 = vmatpush.bf16.msra.mxu0 %v2580_v23  ;;  %1140 = vmatpush.bf16.msra.mxu1 %v2590_v27 }
 0x289   :  { %1153 = vmatpush.bf16.msra.mxu2 %v2592_v28  ;;  %1166 = vmatpush.bf16.msra.mxu3 %v2604_v35 }
 0x28c   :  { %1128 = vmatpush.bf16.msra.mxu0 %v2625_v43  ;;  %1141 = vmatpush.bf16.msra.mxu1 %v2638_v51 }
 0x28d   :  { %1154 = vmatpush.bf16.msra.mxu2 %v2640_v52  ;;  %1167 = vmatpush.bf16.msra.mxu3 %v2652_v59 }
 0x290   :  { %1173 = vmatpush.bf16.msrb.mxu0 %v2654_v60  ;;  %1186 = vmatpush.bf16.msrb.mxu1 %v2656_v61 }
 0x291   :  { %1199 = vmatpush.bf16.msrb.mxu2 %v2658_v63  ;;  %1212 = vmatpush.bf16.msrb.mxu3 %v2670_v4 }
 0x294   :  { %1174 = vmatpush.bf16.msrb.mxu0 %v2691_v20  ;;  %1187 = vmatpush.bf16.msrb.mxu1 %v2695_v22 }
 0x295   :  { %1200 = vmatpush.bf16.msrb.mxu2 %v3656_v36  ;;  %1213 = vmatpush.bf16.msrb.mxu3 %v3657_v18 }
 0x298   :  { %1175 = vmatpush.bf16.msrb.mxu0 %v3658_v49  ;;  %1188 = vmatpush.bf16.msrb.mxu1 %v3659_v19 }
 0x299   :  { %1201 = vmatpush.bf16.msrb.mxu2 %v3660_v30  ;;  %1214 = vmatpush.bf16.msrb.mxu3 %v3661_v42 }
 0x29c   :  { %1176 = vmatpush.bf16.msrb.mxu0 %v3662_v48  ;;  %1189 = vmatpush.bf16.msrb.mxu1 %v3663_v31  ;;  %v3683_v31 = vld [vmem:[#allocation29_spill] sm:$0xff] }
 0x29d   :  { %1202 = vmatpush.bf16.msrb.mxu2 %v3664_v0  ;;  %1215 = vmatpush.bf16.msrb.mxu3 %v3665_v54  ;;  %v3682_v0 = vld [vmem:[#allocation28_spill] sm:$0xff] }
 0x2a0   :  { %1177 = vmatpush.bf16.msrb.mxu0 %v3666_v39  ;;  %1190 = vmatpush.bf16.msrb.mxu1 %v3667_v11 }
 0x2a1   :  { %1203 = vmatpush.bf16.msrb.mxu2 %v3668_v24  ;;  %1216 = vmatpush.bf16.msrb.mxu3 %v3669_v32 }
 0x2a4   :  { %1178 = vmatpush.bf16.msrb.mxu0 %v3670_v26  ;;  %1191 = vmatpush.bf16.msrb.mxu1 %v3671_v40  ;;  %v3681_v26 = vld [vmem:[#allocation27_spill] sm:$0xff] }
 0x2a5   :  { %1204 = vmatpush.bf16.msrb.mxu2 %v3672_v10  ;;  %1217 = vmatpush.bf16.msrb.mxu3 %v3673_v15 }
 0x2a8   :  { %1179 = vmatpush.bf16.msrb.mxu0 %v3674_v13  ;;  %1192 = vmatpush.bf16.msrb.mxu1 %v3675_v53 }
 0x2a9   :  { %1205 = vmatpush.bf16.msrb.mxu2 %v3676_v41  ;;  %1218 = vmatpush.bf16.msrb.mxu3 %v3677_v2 }
 0x2ac   :  { %1180 = vmatpush.bf16.msrb.mxu0 %v3678_v1  ;;  %1193 = vmatpush.bf16.msrb.mxu1 %v3679_v47 }
 0x2ad   :  { %1206 = vmatpush.bf16.msrb.mxu2 %v3680_v37  ;;  %1219 = vmatpush.bf16.msrb.mxu3 %v3681_v26 }
 0x2eb   :  { %v954_v40 = vpop.f32.mrf.mxu0  ;;  %v967_v10 = vpop.f32.mrf.mxu1 }
 0x2f2   :  { %v980_v32 = vpop.f32.mrf.mxu2  ;;  %v993_v15 = vpop.f32.mrf.mxu3 }
 0x2f3   :  { %v956_v24 = vpop.f32.mrf.mxu0  ;;  %v969_v13 = vpop.f32.mrf.mxu1 }
 0x2f4   :  { %v3684_v13 = vld [vmem:[#allocation30_spill] sm:$0xff] }
 0x2fa   :  { %v982_v11 = vpop.f32.mrf.mxu2  ;;  %v995_v53 = vpop.f32.mrf.mxu3 }
 0x2fb   :  { %v1006_v39 = vpop.f32.mrf.mxu0  ;;  %v1019_v41 = vpop.f32.mrf.mxu1 }
 0x2fc   :  { %v1007_v54 = vadd.f32 %v1006_v39, %v954_v40  ;;  %v1020_v2 = vadd.f32 %v1019_v41, %v967_v10 }
 0x2fe   :  { %v1049_v1 = vadd.f32 %v1007_v54, %v3682_v0  ;;  %v1050_v47 = vadd.f32 %v1020_v2, %v3683_v31 }
 0x300   :  { %v2097_v48 = vmul.f32 -1.442695, %v1049_v1  ;;  %v2098_v37 = vmul.f32 -1.442695, %v1050_v47  ;;  %v3685_v47 = vld [vmem:[#allocation31_spill] sm:$0xff] }
 0x302   :  { %2233 = vpow2.f32 %v2097_v48  ;;  %v1032_v26 = vpop.f32.mrf.mxu2  ;;  %v1045_v42 = vpop.f32.mrf.mxu3 }
 0x303   :  { %2235 = vpow2.f32 %v2098_v37  ;;  %v1046_v30 = vadd.f32 %v1045_v42, %v993_v15  ;;  %v1008_v19 = vpop.f32.mrf.mxu0  ;;  %v1021_v24 = vpop.f32.mrf.mxu1  ;;  %v1033_v41 = vadd.f32 %v1032_v26, %v980_v32 }
 0x305   :  { %v1052_v11 = vadd.f32 %v1046_v30, %v3684_v13  ;;  %v1051_v42 = vadd.f32 %v1033_v41, %v3685_v47 }
 0x307   :  { %v2099_v53 = vmul.f32 -1.442695, %v1052_v11 }
 0x308   :  { %v2234_v49 = vpop.eup %2233 }
 0x309   :  { %v2236_v18 = vpop.eup %2235  ;;  %v1056_v39 = vadd.f32 1.0, %v2234_v49  ;;  %2237 = vpow2.f32 %v2099_v53 }
 0x30a   :  { %v1075_v40 = vadd.f32 1.0, %v2236_v18  ;;  %v1047_v54 = vpop.f32.mrf.mxu3  ;;  %v1034_v10 = vpop.f32.mrf.mxu2 }
 0x30b   :  { %2239 = vrcp.f32 %v1056_v39  ;;  %v1068_v11 = vand.u32 2147483648, %v1056_v39  ;;  %v1066_v53 = vand.u32 2147483647, %v1056_v39  ;;  %vm1062_vm6 = vweird.f32 %v1056_v39 }
 0x30c   :  { %2241 = vrcp.f32 %v1075_v40  ;;  %v1087_v49 = vand.u32 2147483648, %v1075_v40  ;;  %v1085_v32 = vand.u32 2147483647, %v1075_v40  ;;  %vm1081_vm7 = vweird.f32 %v1075_v40 }
 0x30d   :  { %v1069_v41 = vor.u32 1.1754944e-38, %v1068_v11  ;;  %vm1067_vm10 = vcmp.eq.f32.partialorder %v1066_v53, 8.507059e+37 }
 0x30e   :  { %vm1086_vm11 = vcmp.eq.f32.partialorder %v1085_v32, 8.507059e+37  ;;  %v3690_v32 = vld [vmem:[#allocation6_spill] sm:$0xff] }
 0x30f   :  { %v2238_v48 = vpop.eup %2237 }
 0x310   :  { %v1095_v2 = vadd.f32 1.0, %v2238_v48 }
 0x311   :  { %v2240_v1 = vpop.eup %2239 }
 0x312   :  { %v2242_v19 = vpop.eup %2241  ;;  %v1058_v15 = vmul.f32 %v2240_v1, %v1056_v39  ;;  %2243 = vrcp.f32 %v1095_v2  ;;  %vm1063_vm4 = vweird.f32 %v2240_v1  ;;  %v1107_v11 = vand.u32 2147483648, %v1095_v2 }
 0x313   :  { %v1077_v30 = vmul.f32 %v2242_v19, %v1075_v40  ;;  %2245 = vtanh.f32 %v1051_v42  ;;  %vm1082_vm5 = vweird.f32 %v2242_v19  ;;  %vm1064_vm8 = vmor %vm1062_vm6, %vm1063_vm4  ;;  %vm1101_vm13 = vweird.f32 %v1095_v2 }
 0x314   :  { %v1059_v37 = vsub.f32 1.0, %v1058_v15  ;;  %vm1083_vm9 = vmor %vm1081_vm7, %vm1082_vm5  ;;  %v1088_v15 = vor.u32 1.1754944e-38, %v1087_v49  ;;  %v1108_v53 = vor.u32 1.1754944e-38, %v1107_v11  ;;  %v3702_v11 = vld [vmem:[#allocation18_spill] sm:$0xff] }
 0x315   :  { %v1078_v24 = vsub.f32 1.0, %v1077_v30 }
 0x316   :  { %v1060_v18 = vmul.f32 %v2240_v1, %v1059_v37 }
 0x317   :  { %v1079_v54 = vmul.f32 %v2242_v19, %v1078_v24 }
 0x318   :  { %v2244_v26 = vpop.eup %2243  ;;  %v1061_v10 = vadd.f32 %v2240_v1, %v1060_v18 }
 0x319   :  { %v1080_v48 = vadd.f32 %v2242_v19, %v1079_v54  ;;  %v1097_v47 = vmul.f32 %v2244_v26, %v1095_v2  ;;  %v2246_v42 = vpop.eup %2245  ;;  %vm1102_vm12 = vweird.f32 %v2244_v26 }
 0x31a   :  { %v1065_v30 = vsel %vm1064_vm8, %v2240_v1, %v1061_v10  ;;  %v1105_v1 = vand.u32 2147483647, %v1095_v2  ;;  %vm1103_vm14 = vmor %vm1101_vm13, %vm1102_vm12  ;;  %v3689_v2 = vld [vmem:[#allocation5_spill] sm:$0xff]  ;;  %v3692_v10 = vld [vmem:[#allocation8_spill] sm:$0xff] }
 0x31b   :  { %v1070_v13 = vsel %vm1067_vm10, %v1069_v41, %v1065_v30  ;;  %v1084_v37 = vsel %vm1083_vm9, %v2242_v19, %v1080_v48  ;;  %v1098_v31 = vsub.f32 1.0, %v1097_v47  ;;  %v3693_v41 = vld [vmem:[#allocation9_spill] sm:$0xff]  ;;  %v3694_v48 = vld [vmem:[#allocation10_spill] sm:$0xff]  ;;  %v3696_v30 = vld [vmem:[#allocation12_spill] sm:$0xff] }
 0x31c   :  { %v1089_v24 = vsel %vm1086_vm11, %v1088_v15, %v1084_v37  ;;  %v1112_v0 = vmul.f32 %v2246_v42, %v1070_v13  ;;  %vm1106_vm15 = vcmp.eq.f32.partialorder %v1105_v1, 8.507059e+37  ;;  %v3695_v15 = vld [vmem:[#allocation11_spill] sm:$0xff]  ;;  %v3697_v42 = vld [vmem:[#allocation13_spill] sm:$0xff]  ;;  %v3698_v37 = vld [vmem:[#allocation14_spill] sm:$0xff] }
 0x31d   :  { %v1111_v36 = vmul.f32 %v1089_v24, %v3163_v55  ;;  %v1099_v18 = vmul.f32 %v2244_v26, %v1098_v31  ;;  %v2101_v55 = vld [vmem:[%s3495_s1 + $0x10] sm:$0xf]  ;;  %v3687_v31 = vld [vmem:[#allocation3_spill] sm:$0xff] }
 0x31e   :  { %v3699_v24 = vld [vmem:[#allocation15_spill] sm:$0xff] }
 0x31f   :  { %v3241_v39 = vadd.f32 %v1112_v0, %v1111_v36  ;;  %v1100_v40 = vadd.f32 %v2244_v26, %v1099_v18  ;;  %v3686_v36 = vld [vmem:[#allocation2_spill] sm:$0xff]  ;;  %v3688_v0 = vld [vmem:[#allocation4_spill] sm:$0xff]  ;;  %v3703_v1 = vld [vmem:[#allocation19_spill] sm:$0xff] }
 0x320   :  { %v3700_v18 = vld [vmem:[#allocation16_spill] sm:$0xff] }
 0x321   :  { %2247 = vtanh.f32 %v3241_v39  ;;  %v1104_v49 = vsel %vm1103_vm14, %v2244_v26, %v1100_v40  ;;  %v3691_v26 = vld [vmem:[#allocation7_spill] sm:$0xff]  ;;  %v3701_v40 = vld [vmem:[#allocation17_spill] sm:$0xff] }
 0x322   :  { %v1109_v47 = vsel %vm1106_vm15, %v1108_v53, %v1104_v49  ;;  %v3704_v49 = vld [vmem:[#allocation20_spill] sm:$0xff]  ;;  %v3705_v53 = vld [vmem:[#allocation21_spill] sm:$0xff] }
 0x327   :  { %v2248_v19 = vpop.eup %2247 }
 0x328   :  { %v1115_v54 = vmul.f32 %v2248_v19, %v1109_v47  ;;  %v3706_v19 = vld [vmem:[#allocation22_spill] sm:$0xff]  ;;  %v3707_v47 = vld [vmem:[#allocation23_spill] sm:$0xff] }
 0x32a   :  { %v1116_v13 = vpack.c.bf16 %v1115_v54, %v1115_v54  ;;  %v3708_v54 = vld [vmem:[#allocation24_spill] sm:$0xff] }
 0x32c   :  { %2100 = vst [vmem:[%s3497_s5 + $0xc] sm:$0xf] %v1116_v13  ;;  %1129 = vmatmul.bf16.vlgmr.msra.gmra.mxu0 %v1116_v13  ;;  %1142 = vmatmul.bf16.vlgmr.msra.gmra.mxu1 %v1116_v13 }
 0x32d   :  { %1155 = vmatmul.bf16.vlgmr.msra.gmra.mxu2 %v1116_v13  ;;  %1168 = vmatmul.bf16.vlgmr.msra.gmra.mxu3 %v1116_v13  ;;  %v3709_v13 = vld [vmem:[#allocation25_spill] sm:$0xff] }
 0x32e   :  { %1297 = vmatpush.bf16.msra.mxu0 %v2352_v3  ;;  %1310 = vmatpush.bf16.msra.mxu1 %v2363_v7 }
 0x32f   :  { %1323 = vmatpush.bf16.msra.mxu2 %v2365_v8  ;;  %1336 = vmatpush.bf16.msra.mxu3 %v2377_v12 }
 0x332   :  { %1298 = vmatpush.bf16.msra.mxu0 %v2390_v16  ;;  %1311 = vmatpush.bf16.msra.mxu1 %v2392_v17 }
 0x333   :  { %1324 = vmatpush.bf16.msra.mxu2 %v2404_v21  ;;  %1337 = vmatpush.bf16.msra.mxu3 %v2415_v25 }
 0x336   :  { %1299 = vmatpush.bf16.msra.mxu0 %v2427_v29  ;;  %1312 = vmatpush.bf16.msra.mxu1 %v2440_v33 }
 0x337   :  { %1325 = vmatpush.bf16.msra.mxu2 %v2442_v34  ;;  %1338 = vmatpush.bf16.msra.mxu3 %v2454_v38 }
 0x33a   :  { %1300 = vmatpush.bf16.msra.mxu0 %v2472_v44  ;;  %1313 = vmatpush.bf16.msra.mxu1 %v2476_v45 }
 0x33b   :  { %1326 = vmatpush.bf16.msra.mxu2 %v2478_v46  ;;  %1339 = vmatpush.bf16.msra.mxu3 %v2490_v50 }
 0x33c   :  { %1181 = vmatmul.bf16.vlgmr.msrb.gmra.mxu0 %v2101_v55  ;;  %1194 = vmatmul.bf16.vlgmr.msrb.gmra.mxu1 %v2101_v55 }
 0x33d   :  { %1207 = vmatmul.bf16.vlgmr.msrb.gmra.mxu2 %v2101_v55  ;;  %1220 = vmatmul.bf16.vlgmr.msrb.gmra.mxu3 %v2101_v55  ;;  %v3710_v55 = vld [vmem:[#allocation26_spill] sm:$0xff] }
 0x33e   :  { %1301 = vmatpush.bf16.msra.mxu0 %v2508_v56  ;;  %1314 = vmatpush.bf16.msra.mxu1 %v2512_v57 }
 0x33f   :  { %1327 = vmatpush.bf16.msra.mxu2 %v2514_v58  ;;  %1340 = vmatpush.bf16.msra.mxu3 %v2526_v62 }
 0x342   :  { %1302 = vmatpush.bf16.msra.mxu0 %v2544_v5  ;;  %1315 = vmatpush.bf16.msra.mxu1 %v2548_v6 }
 0x343   :  { %1328 = vmatpush.bf16.msra.mxu2 %v2550_v9  ;;  %1341 = vmatpush.bf16.msra.mxu3 %v2562_v14 }
 0x346   :  { %1303 = vmatpush.bf16.msra.mxu0 %v2580_v23  ;;  %1316 = vmatpush.bf16.msra.mxu1 %v2590_v27 }
 0x347   :  { %1329 = vmatpush.bf16.msra.mxu2 %v2592_v28  ;;  %1342 = vmatpush.bf16.msra.mxu3 %v2604_v35 }
 0x34a   :  { %1304 = vmatpush.bf16.msra.mxu0 %v2625_v43  ;;  %1317 = vmatpush.bf16.msra.mxu1 %v2638_v51 }
 0x34b   :  { %1330 = vmatpush.bf16.msra.mxu2 %v2640_v52  ;;  %1343 = vmatpush.bf16.msra.mxu3 %v2652_v59 }
 0x34e   :  { %1349 = vmatpush.bf16.msrb.mxu0 %v2654_v60  ;;  %1362 = vmatpush.bf16.msrb.mxu1 %v2656_v61 }
 0x34f   :  { %1375 = vmatpush.bf16.msrb.mxu2 %v2658_v63  ;;  %1388 = vmatpush.bf16.msrb.mxu3 %v2670_v4 }
 0x352   :  { %1350 = vmatpush.bf16.msrb.mxu0 %v2691_v20  ;;  %1363 = vmatpush.bf16.msrb.mxu1 %v2695_v22 }
 0x353   :  { %1376 = vmatpush.bf16.msrb.mxu2 %v3686_v36  ;;  %1389 = vmatpush.bf16.msrb.mxu3 %v3687_v31 }
 0x356   :  { %1351 = vmatpush.bf16.msrb.mxu0 %v3688_v0  ;;  %1364 = vmatpush.bf16.msrb.mxu1 %v3689_v2 }
 0x357   :  { %1377 = vmatpush.bf16.msrb.mxu2 %v3690_v32  ;;  %1390 = vmatpush.bf16.msrb.mxu3 %v3691_v26 }
 0x35a   :  { %1352 = vmatpush.bf16.msrb.mxu0 %v3692_v10  ;;  %1365 = vmatpush.bf16.msrb.mxu1 %v3693_v41  ;;  %v3713_v41 = vld [vmem:[#allocation29_spill] sm:$0xff] }
 0x35b   :  { %1378 = vmatpush.bf16.msrb.mxu2 %v3694_v48  ;;  %1391 = vmatpush.bf16.msrb.mxu3 %v3695_v15  ;;  %v3712_v48 = vld [vmem:[#allocation28_spill] sm:$0xff] }
 0x35e   :  { %1353 = vmatpush.bf16.msrb.mxu0 %v3696_v30  ;;  %1366 = vmatpush.bf16.msrb.mxu1 %v3697_v42 }
 0x35f   :  { %1379 = vmatpush.bf16.msrb.mxu2 %v3698_v37  ;;  %1392 = vmatpush.bf16.msrb.mxu3 %v3699_v24 }
 0x362   :  { %1354 = vmatpush.bf16.msrb.mxu0 %v3700_v18  ;;  %1367 = vmatpush.bf16.msrb.mxu1 %v3701_v40  ;;  %v3711_v18 = vld [vmem:[#allocation27_spill] sm:$0xff] }
 0x363   :  { %1380 = vmatpush.bf16.msrb.mxu2 %v3702_v11  ;;  %1393 = vmatpush.bf16.msrb.mxu3 %v3703_v1 }
 0x366   :  { %1355 = vmatpush.bf16.msrb.mxu0 %v3704_v49  ;;  %1368 = vmatpush.bf16.msrb.mxu1 %v3705_v53 }
 0x367   :  { %1381 = vmatpush.bf16.msrb.mxu2 %v3706_v19  ;;  %1394 = vmatpush.bf16.msrb.mxu3 %v3707_v47 }
 0x36a   :  { %1356 = vmatpush.bf16.msrb.mxu0 %v3708_v54  ;;  %1369 = vmatpush.bf16.msrb.mxu1 %v3709_v13 }
 0x36b   :  { %1382 = vmatpush.bf16.msrb.mxu2 %v3710_v55  ;;  %1395 = vmatpush.bf16.msrb.mxu3 %v3711_v18 }
 0x3a9   :  { %v1130_v40 = vpop.f32.mrf.mxu0  ;;  %v1143_v11 = vpop.f32.mrf.mxu1 }
 0x3b0   :  { %v1156_v24 = vpop.f32.mrf.mxu2  ;;  %v1169_v1 = vpop.f32.mrf.mxu3 }
 0x3b1   :  { %v1132_v37 = vpop.f32.mrf.mxu0  ;;  %v1145_v49 = vpop.f32.mrf.mxu1 }
 0x3b2   :  { %v3714_v49 = vld [vmem:[#allocation30_spill] sm:$0xff] }
 0x3b8   :  { %v1158_v42 = vpop.f32.mrf.mxu2  ;;  %v1171_v53 = vpop.f32.mrf.mxu3 }
 0x3b9   :  { %v1182_v30 = vpop.f32.mrf.mxu0  ;;  %v1195_v19 = vpop.f32.mrf.mxu1 }
 0x3ba   :  { %v1183_v15 = vadd.f32 %v1182_v30, %v1130_v40  ;;  %v1196_v47 = vadd.f32 %v1195_v19, %v1143_v11 }
 0x3bc   :  { %v1225_v54 = vadd.f32 %v1183_v15, %v3712_v48  ;;  %v1226_v13 = vadd.f32 %v1196_v47, %v3713_v41 }
 0x3be   :  { %v2102_v10 = vmul.f32 -1.442695, %v1225_v54  ;;  %v2103_v55 = vmul.f32 -1.442695, %v1226_v13  ;;  %v3715_v13 = vld [vmem:[#allocation31_spill] sm:$0xff] }
 0x3c0   :  { %2249 = vpow2.f32 %v2102_v10  ;;  %v1208_v18 = vpop.f32.mrf.mxu2  ;;  %v1221_v26 = vpop.f32.mrf.mxu3 }
 0x3c1   :  { %2251 = vpow2.f32 %v2103_v55  ;;  %v1222_v32 = vadd.f32 %v1221_v26, %v1169_v1  ;;  %v1184_v2 = vpop.f32.mrf.mxu0  ;;  %v1197_v37 = vpop.f32.mrf.mxu1  ;;  %v1209_v19 = vadd.f32 %v1208_v18, %v1156_v24 }
 0x3c3   :  { %v1228_v42 = vadd.f32 %v1222_v32, %v3714_v49  ;;  %v1227_v26 = vadd.f32 %v1209_v19, %v3715_v13 }
 0x3c5   :  { %v2104_v53 = vmul.f32 -1.442695, %v1228_v42 }
 0x3c6   :  { %v2250_v0 = vpop.eup %2249 }
 0x3c7   :  { %v2252_v31 = vpop.eup %2251  ;;  %v1232_v30 = vadd.f32 1.0, %v2250_v0  ;;  %2253 = vpow2.f32 %v2104_v53 }
 0x3c8   :  { %v1251_v40 = vadd.f32 1.0, %v2252_v31  ;;  %v1223_v15 = vpop.f32.mrf.mxu3  ;;  %v1210_v11 = vpop.f32.mrf.mxu2 }
 0x3c9   :  { %2255 = vrcp.f32 %v1232_v30  ;;  %v1244_v42 = vand.u32 2147483648, %v1232_v30  ;;  %v1242_v53 = vand.u32 2147483647, %v1232_v30  ;;  %vm1238_vm2 = vweird.f32 %v1232_v30 }
 0x3ca   :  { %2257 = vrcp.f32 %v1251_v40  ;;  %v1263_v0 = vand.u32 2147483648, %v1251_v40  ;;  %v1261_v24 = vand.u32 2147483647, %v1251_v40  ;;  %vm1257_vm3 = vweird.f32 %v1251_v40 }
 0x3cb   :  { %v1245_v19 = vor.u32 1.1754944e-38, %v1244_v42  ;;  %vm1243_vm6 = vcmp.eq.f32.partialorder %v1242_v53, 8.507059e+37 }
 0x3cc   :  { %vm1262_vm7 = vcmp.eq.f32.partialorder %v1261_v24, 8.507059e+37  ;;  %v3720_v24 = vld [vmem:[#allocation6_spill] sm:$0xff] }
 0x3cd   :  { %v2254_v10 = vpop.eup %2253 }
 0x3ce   :  { %v1271_v47 = vadd.f32 1.0, %v2254_v10 }
 0x3cf   :  { %v2256_v54 = vpop.eup %2255 }
 0x3d0   :  { %v2258_v2 = vpop.eup %2257  ;;  %v1234_v1 = vmul.f32 %v2256_v54, %v1232_v30  ;;  %2259 = vrcp.f32 %v1271_v47  ;;  %vm1239_vm0 = vweird.f32 %v2256_v54  ;;  %v1283_v42 = vand.u32 2147483648, %v1271_v47 }
 0x3d1   :  { %v1253_v32 = vmul.f32 %v2258_v2, %v1251_v40  ;;  %2261 = vtanh.f32 %v1227_v26  ;;  %vm1258_vm1 = vweird.f32 %v2258_v2  ;;  %vm1240_vm4 = vmor %vm1238_vm2, %vm1239_vm0  ;;  %vm1277_vm9 = vweird.f32 %v1271_v47 }
 0x3d2   :  { %v1235_v55 = vsub.f32 1.0, %v1234_v1  ;;  %vm1259_vm5 = vmor %vm1257_vm3, %vm1258_vm1  ;;  %v1264_v1 = vor.u32 1.1754944e-38, %v1263_v0  ;;  %v1284_v53 = vor.u32 1.1754944e-38, %v1283_v42  ;;  %v3732_v42 = vld [vmem:[#allocation18_spill] sm:$0xff] }
 0x3d3   :  { %v1254_v37 = vsub.f32 1.0, %v1253_v32 }
 0x3d4   :  { %v1236_v31 = vmul.f32 %v2256_v54, %v1235_v55 }
 0x3d5   :  { %v1255_v15 = vmul.f32 %v2258_v2, %v1254_v37 }
 0x3d6   :  { %v2260_v18 = vpop.eup %2259  ;;  %v1237_v11 = vadd.f32 %v2256_v54, %v1236_v31 }
 0x3d7   :  { %v1256_v10 = vadd.f32 %v2258_v2, %v1255_v15  ;;  %v1273_v13 = vmul.f32 %v2260_v18, %v1271_v47  ;;  %v2262_v26 = vpop.eup %2261  ;;  %vm1278_vm8 = vweird.f32 %v2260_v18 }
 0x3d8   :  { %v1241_v32 = vsel %vm1240_vm4, %v2256_v54, %v1237_v11  ;;  %v1281_v54 = vand.u32 2147483647, %v1271_v47  ;;  %vm1279_vm10 = vmor %vm1277_vm9, %vm1278_vm8  ;;  %v3719_v47 = vld [vmem:[#allocation5_spill] sm:$0xff]  ;;  %v3722_v11 = vld [vmem:[#allocation8_spill] sm:$0xff] }
 0x3d9   :  { %v1246_v49 = vsel %vm1243_vm6, %v1245_v19, %v1241_v32  ;;  %v1260_v55 = vsel %vm1259_vm5, %v2258_v2, %v1256_v10  ;;  %v1274_v41 = vsub.f32 1.0, %v1273_v13  ;;  %v3723_v19 = vld [vmem:[#allocation9_spill] sm:$0xff]  ;;  %v3724_v10 = vld [vmem:[#allocation10_spill] sm:$0xff]  ;;  %v3726_v32 = vld [vmem:[#allocation12_spill] sm:$0xff] }
 0x3da   :  { %v1265_v37 = vsel %vm1262_vm7, %v1264_v1, %v1260_v55  ;;  %v1288_v48 = vmul.f32 %v2262_v26, %v1246_v49  ;;  %vm1282_vm11 = vcmp.eq.f32.partialorder %v1281_v54, 8.507059e+37  ;;  %v3725_v1 = vld [vmem:[#allocation11_spill] sm:$0xff]  ;;  %v3727_v26 = vld [vmem:[#allocation13_spill] sm:$0xff]  ;;  %v3728_v55 = vld [vmem:[#allocation14_spill] sm:$0xff] }
 0x3db   :  { %v1287_v36 = vmul.f32 %v1265_v37, %v3241_v39  ;;  %v1275_v31 = vmul.f32 %v2260_v18, %v1274_v41  ;;  %v2106_v39 = vld [vmem:[%s3495_s1 + $0x14] sm:$0xf]  ;;  %v3717_v41 = vld [vmem:[#allocation3_spill] sm:$0xff] }
 0x3dc   :  { %v3729_v37 = vld [vmem:[#allocation15_spill] sm:$0xff] }
 0x3dd   :  { %v3319_v30 = vadd.f32 %v1288_v48, %v1287_v36  ;;  %v1276_v40 = vadd.f32 %v2260_v18, %v1275_v31  ;;  %v3716_v36 = vld [vmem:[#allocation2_spill] sm:$0xff]  ;;  %v3718_v48 = vld [vmem:[#allocation4_spill] sm:$0xff]  ;;  %v3733_v54 = vld [vmem:[#allocation19_spill] sm:$0xff] }
 0x3de   :  { %v3730_v31 = vld [vmem:[#allocation16_spill] sm:$0xff] }
 0x3df   :  { %2263 = vtanh.f32 %v3319_v30  ;;  %v1280_v0 = vsel %vm1279_vm10, %v2260_v18, %v1276_v40  ;;  %v3721_v18 = vld [vmem:[#allocation7_spill] sm:$0xff]  ;;  %v3731_v40 = vld [vmem:[#allocation17_spill] sm:$0xff] }
 0x3e0   :  { %v1285_v13 = vsel %vm1282_vm11, %v1284_v53, %v1280_v0  ;;  %v3734_v0 = vld [vmem:[#allocation20_spill] sm:$0xff]  ;;  %v3735_v53 = vld [vmem:[#allocation21_spill] sm:$0xff] }
 0x3e5   :  { %v2264_v2 = vpop.eup %2263 }
 0x3e6   :  { %v1291_v15 = vmul.f32 %v2264_v2, %v1285_v13  ;;  %v3736_v2 = vld [vmem:[#allocation22_spill] sm:$0xff]  ;;  %v3737_v13 = vld [vmem:[#allocation23_spill] sm:$0xff] }
 0x3e8   :  { %v1292_v49 = vpack.c.bf16 %v1291_v15, %v1291_v15  ;;  %v3738_v15 = vld [vmem:[#allocation24_spill] sm:$0xff] }
 0x3ea   :  { %2105 = vst [vmem:[%s3497_s5 + $0x10] sm:$0xf] %v1292_v49  ;;  %1305 = vmatmul.bf16.vlgmr.msra.gmra.mxu0 %v1292_v49  ;;  %1318 = vmatmul.bf16.vlgmr.msra.gmra.mxu1 %v1292_v49 }
 0x3eb   :  { %1331 = vmatmul.bf16.vlgmr.msra.gmra.mxu2 %v1292_v49  ;;  %1344 = vmatmul.bf16.vlgmr.msra.gmra.mxu3 %v1292_v49  ;;  %v3739_v49 = vld [vmem:[#allocation25_spill] sm:$0xff] }
 0x3ec   :  { %1473 = vmatpush.bf16.msra.mxu0 %v2352_v3  ;;  %1486 = vmatpush.bf16.msra.mxu1 %v2363_v7 }
 0x3ed   :  { %1499 = vmatpush.bf16.msra.mxu2 %v2365_v8  ;;  %1512 = vmatpush.bf16.msra.mxu3 %v2377_v12 }
 0x3f0   :  { %1474 = vmatpush.bf16.msra.mxu0 %v2390_v16  ;;  %1487 = vmatpush.bf16.msra.mxu1 %v2392_v17 }
 0x3f1   :  { %1500 = vmatpush.bf16.msra.mxu2 %v2404_v21  ;;  %1513 = vmatpush.bf16.msra.mxu3 %v2415_v25 }
 0x3f4   :  { %1475 = vmatpush.bf16.msra.mxu0 %v2427_v29  ;;  %1488 = vmatpush.bf16.msra.mxu1 %v2440_v33 }
 0x3f5   :  { %1501 = vmatpush.bf16.msra.mxu2 %v2442_v34  ;;  %1514 = vmatpush.bf16.msra.mxu3 %v2454_v38 }
 0x3f8   :  { %1476 = vmatpush.bf16.msra.mxu0 %v2472_v44  ;;  %1489 = vmatpush.bf16.msra.mxu1 %v2476_v45 }
 0x3f9   :  { %1502 = vmatpush.bf16.msra.mxu2 %v2478_v46  ;;  %1515 = vmatpush.bf16.msra.mxu3 %v2490_v50 }
 0x3fa   :  { %1357 = vmatmul.bf16.vlgmr.msrb.gmra.mxu0 %v2106_v39  ;;  %1370 = vmatmul.bf16.vlgmr.msrb.gmra.mxu1 %v2106_v39 }
 0x3fb   :  { %1383 = vmatmul.bf16.vlgmr.msrb.gmra.mxu2 %v2106_v39  ;;  %1396 = vmatmul.bf16.vlgmr.msrb.gmra.mxu3 %v2106_v39  ;;  %v3740_v39 = vld [vmem:[#allocation26_spill] sm:$0xff] }
 0x3fc   :  { %1477 = vmatpush.bf16.msra.mxu0 %v2508_v56  ;;  %1490 = vmatpush.bf16.msra.mxu1 %v2512_v57 }
 0x3fd   :  { %1503 = vmatpush.bf16.msra.mxu2 %v2514_v58  ;;  %1516 = vmatpush.bf16.msra.mxu3 %v2526_v62 }
 0x400   :  { %1478 = vmatpush.bf16.msra.mxu0 %v2544_v5  ;;  %1491 = vmatpush.bf16.msra.mxu1 %v2548_v6 }
 0x401   :  { %1504 = vmatpush.bf16.msra.mxu2 %v2550_v9  ;;  %1517 = vmatpush.bf16.msra.mxu3 %v2562_v14 }
 0x404   :  { %1479 = vmatpush.bf16.msra.mxu0 %v2580_v23  ;;  %1492 = vmatpush.bf16.msra.mxu1 %v2590_v27 }
 0x405   :  { %1505 = vmatpush.bf16.msra.mxu2 %v2592_v28  ;;  %1518 = vmatpush.bf16.msra.mxu3 %v2604_v35 }
 0x408   :  { %1480 = vmatpush.bf16.msra.mxu0 %v2625_v43  ;;  %1493 = vmatpush.bf16.msra.mxu1 %v2638_v51 }
 0x409   :  { %1506 = vmatpush.bf16.msra.mxu2 %v2640_v52  ;;  %1519 = vmatpush.bf16.msra.mxu3 %v2652_v59 }
 0x40c   :  { %1525 = vmatpush.bf16.msrb.mxu0 %v2654_v60  ;;  %1538 = vmatpush.bf16.msrb.mxu1 %v2656_v61 }
 0x40d   :  { %1551 = vmatpush.bf16.msrb.mxu2 %v2658_v63  ;;  %1564 = vmatpush.bf16.msrb.mxu3 %v2670_v4 }
 0x410   :  { %1526 = vmatpush.bf16.msrb.mxu0 %v2691_v20  ;;  %1539 = vmatpush.bf16.msrb.mxu1 %v2695_v22 }
 0x411   :  { %1552 = vmatpush.bf16.msrb.mxu2 %v3716_v36  ;;  %1565 = vmatpush.bf16.msrb.mxu3 %v3717_v41 }
 0x414   :  { %1527 = vmatpush.bf16.msrb.mxu0 %v3718_v48  ;;  %1540 = vmatpush.bf16.msrb.mxu1 %v3719_v47 }
 0x415   :  { %1553 = vmatpush.bf16.msrb.mxu2 %v3720_v24  ;;  %1566 = vmatpush.bf16.msrb.mxu3 %v3721_v18 }
 0x418   :  { %1528 = vmatpush.bf16.msrb.mxu0 %v3722_v11  ;;  %1541 = vmatpush.bf16.msrb.mxu1 %v3723_v19  ;;  %v3743_v19 = vld [vmem:[#allocation29_spill] sm:$0xff] }
 0x419   :  { %1554 = vmatpush.bf16.msrb.mxu2 %v3724_v10  ;;  %1567 = vmatpush.bf16.msrb.mxu3 %v3725_v1  ;;  %v3742_v10 = vld [vmem:[#allocation28_spill] sm:$0xff] }
 0x41c   :  { %1529 = vmatpush.bf16.msrb.mxu0 %v3726_v32  ;;  %1542 = vmatpush.bf16.msrb.mxu1 %v3727_v26 }
 0x41d   :  { %1555 = vmatpush.bf16.msrb.mxu2 %v3728_v55  ;;  %1568 = vmatpush.bf16.msrb.mxu3 %v3729_v37 }
 0x420   :  { %1530 = vmatpush.bf16.msrb.mxu0 %v3730_v31  ;;  %1543 = vmatpush.bf16.msrb.mxu1 %v3731_v40  ;;  %v3741_v31 = vld [vmem:[#allocation27_spill] sm:$0xff] }
 0x421   :  { %1556 = vmatpush.bf16.msrb.mxu2 %v3732_v42  ;;  %1569 = vmatpush.bf16.msrb.mxu3 %v3733_v54 }
 0x424   :  { %1531 = vmatpush.bf16.msrb.mxu0 %v3734_v0  ;;  %1544 = vmatpush.bf16.msrb.mxu1 %v3735_v53 }
 0x425   :  { %1557 = vmatpush.bf16.msrb.mxu2 %v3736_v2  ;;  %1570 = vmatpush.bf16.msrb.mxu3 %v3737_v13 }
 0x428   :  { %1532 = vmatpush.bf16.msrb.mxu0 %v3738_v15  ;;  %1545 = vmatpush.bf16.msrb.mxu1 %v3739_v49 }
 0x429   :  { %1558 = vmatpush.bf16.msrb.mxu2 %v3740_v39  ;;  %1571 = vmatpush.bf16.msrb.mxu3 %v3741_v31 }
 0x467   :  { %v1306_v40 = vpop.f32.mrf.mxu0  ;;  %v1319_v42 = vpop.f32.mrf.mxu1 }
 0x46e   :  { %v1332_v37 = vpop.f32.mrf.mxu2  ;;  %v1345_v54 = vpop.f32.mrf.mxu3 }
 0x46f   :  { %v1308_v55 = vpop.f32.mrf.mxu0  ;;  %v1321_v0 = vpop.f32.mrf.mxu1 }
 0x470   :  { %v3744_v0 = vld [vmem:[#allocation30_spill] sm:$0xff] }
 0x476   :  { %v1334_v26 = vpop.f32.mrf.mxu2  ;;  %v1347_v53 = vpop.f32.mrf.mxu3 }
 0x477   :  { %v1358_v32 = vpop.f32.mrf.mxu0  ;;  %v1371_v2 = vpop.f32.mrf.mxu1 }
 0x478   :  { %v1359_v1 = vadd.f32 %v1358_v32, %v1306_v40  ;;  %v1372_v13 = vadd.f32 %v1371_v2, %v1319_v42 }
 0x47a   :  { %v1401_v15 = vadd.f32 %v1359_v1, %v3742_v10  ;;  %v1402_v49 = vadd.f32 %v1372_v13, %v3743_v19 }
 0x47c   :  { %v2107_v11 = vmul.f32 -1.442695, %v1401_v15  ;;  %v2108_v39 = vmul.f32 -1.442695, %v1402_v49  ;;  %v3745_v49 = vld [vmem:[#allocation31_spill] sm:$0xff] }
 0x47e   :  { %2265 = vpow2.f32 %v2107_v11  ;;  %v1384_v31 = vpop.f32.mrf.mxu2  ;;  %v1397_v18 = vpop.f32.mrf.mxu3 }
 0x47f   :  { %2267 = vpow2.f32 %v2108_v39  ;;  %v1398_v24 = vadd.f32 %v1397_v18, %v1345_v54  ;;  %v1360_v47 = vpop.f32.mrf.mxu0  ;;  %v1373_v55 = vpop.f32.mrf.mxu1  ;;  %v1385_v2 = vadd.f32 %v1384_v31, %v1332_v37 }
 0x481   :  { %v1404_v26 = vadd.f32 %v1398_v24, %v3744_v0  ;;  %v1403_v18 = vadd.f32 %v1385_v2, %v3745_v49 }
 0x483   :  { %v2109_v53 = vmul.f32 -1.442695, %v1404_v26 }
 0x484   :  { %v2266_v48 = vpop.eup %2265 }
 0x485   :  { %v2268_v41 = vpop.eup %2267  ;;  %v1408_v32 = vadd.f32 1.0, %v2266_v48  ;;  %2269 = vpow2.f32 %v2109_v53 }
 0x486   :  { %v1427_v40 = vadd.f32 1.0, %v2268_v41  ;;  %v1399_v1 = vpop.f32.mrf.mxu3  ;;  %v1386_v42 = vpop.f32.mrf.mxu2 }
 0x487   :  { %2271 = vrcp.f32 %v1408_v32  ;;  %v1420_v26 = vand.u32 2147483648, %v1408_v32  ;;  %v1418_v53 = vand.u32 2147483647, %v1408_v32  ;;  %vm1414_vm14 = vweird.f32 %v1408_v32 }
 0x488   :  { %2273 = vrcp.f32 %v1427_v40  ;;  %v1439_v48 = vand.u32 2147483648, %v1427_v40  ;;  %v1437_v37 = vand.u32 2147483647, %v1427_v40  ;;  %vm1433_vm15 = vweird.f32 %v1427_v40 }
 0x489   :  { %v1421_v2 = vor.u32 1.1754944e-38, %v1420_v26  ;;  %vm1419_vm2 = vcmp.eq.f32.partialorder %v1418_v53, 8.507059e+37 }
 0x48a   :  { %vm1438_vm3 = vcmp.eq.f32.partialorder %v1437_v37, 8.507059e+37 }
 0x48b   :  { %v2270_v11 = vpop.eup %2269 }
 0x48c   :  { %v1447_v13 = vadd.f32 1.0, %v2270_v11 }
 0x48d   :  { %v2272_v15 = vpop.eup %2271 }
 0x48e   :  { %v2274_v47 = vpop.eup %2273  ;;  %v1410_v54 = vmul.f32 %v2272_v15, %v1408_v32  ;;  %2275 = vrcp.f32 %v1447_v13  ;;  %vm1415_vm12 = vweird.f32 %v2272_v15  ;;  %v1459_v26 = vand.u32 2147483648, %v1447_v13 }
 0x48f   :  { %v1429_v24 = vmul.f32 %v2274_v47, %v1427_v40  ;;  %2277 = vtanh.f32 %v1403_v18  ;;  %vm1434_vm13 = vweird.f32 %v2274_v47  ;;  %vm1416_vm0 = vmor %vm1414_vm14, %vm1415_vm12  ;;  %vm1453_vm5 = vweird.f32 %v1447_v13 }
 0x490   :  { %v1411_v39 = vsub.f32 1.0, %v1410_v54  ;;  %vm1435_vm1 = vmor %vm1433_vm15, %vm1434_vm13  ;;  %v1440_v54 = vor.u32 1.1754944e-38, %v1439_v48  ;;  %v1460_v53 = vor.u32 1.1754944e-38, %v1459_v26 }
 0x491   :  { %v1430_v55 = vsub.f32 1.0, %v1429_v24 }
 0x492   :  { %v1412_v41 = vmul.f32 %v2272_v15, %v1411_v39 }
 0x493   :  { %v1431_v1 = vmul.f32 %v2274_v47, %v1430_v55 }
 0x494   :  { %v2276_v31 = vpop.eup %2275  ;;  %v1413_v42 = vadd.f32 %v2272_v15, %v1412_v41 }
 0x495   :  { %v1432_v11 = vadd.f32 %v2274_v47, %v1431_v1  ;;  %v1449_v49 = vmul.f32 %v2276_v31, %v1447_v13  ;;  %v2278_v18 = vpop.eup %2277  ;;  %vm1454_vm4 = vweird.f32 %v2276_v31 }
 0x496   :  { %v1417_v24 = vsel %vm1416_vm0, %v2272_v15, %v1413_v42  ;;  %v1457_v15 = vand.u32 2147483647, %v1447_v13  ;;  %vm1455_vm6 = vmor %vm1453_vm5, %vm1454_vm4 }
 0x497   :  { %v1422_v0 = vsel %vm1419_vm2, %v1421_v2, %v1417_v24  ;;  %v1436_v39 = vsel %vm1435_vm1, %v2274_v47, %v1432_v11  ;;  %v1450_v19 = vsub.f32 1.0, %v1449_v49 }
 0x498   :  { %v1441_v55 = vsel %vm1438_vm3, %v1440_v54, %v1436_v39  ;;  %v1464_v10 = vmul.f32 %v2278_v18, %v1422_v0  ;;  %vm1458_vm7 = vcmp.eq.f32.partialorder %v1457_v15, 8.507059e+37  ;;  %v3774_v18 = vld [vmem:[#allocation30_spill] sm:$0xff] }
 0x499   :  { %v1463_v36 = vmul.f32 %v1441_v55, %v3319_v30  ;;  %v1451_v41 = vmul.f32 %v2276_v31, %v1450_v19 }
 0x49b   :  { %v3397_v32 = vadd.f32 %v1464_v10, %v1463_v36  ;;  %v1452_v40 = vadd.f32 %v2276_v31, %v1451_v41  ;;  %v3772_v36 = vld [vmem:[#allocation28_spill] sm:$0xff]  ;;  %v3773_v10 = vld [vmem:[#allocation29_spill] sm:$0xff] }
 0x49d   :  { %2279 = vtanh.f32 %v3397_v32  ;;  %v1456_v48 = vsel %vm1455_vm6, %v2276_v31, %v1452_v40 }
 0x49e   :  { %v1461_v49 = vsel %vm1458_vm7, %v1460_v53, %v1456_v48 }
 0x4a3   :  { %v2280_v47 = vpop.eup %2279 }
 0x4a4   :  { %v1467_v1 = vmul.f32 %v2280_v47, %v1461_v49 }
 0x4a6   :  { %v1468_v0 = vpack.c.bf16 %v1467_v1, %v1467_v1 }
 0x4a8   :  { %2110 = vst [vmem:[%s3497_s5 + $0x14] sm:$0xf] %v1468_v0  ;;  %1481 = vmatmul.bf16.vlgmr.msra.gmra.mxu0 %v1468_v0  ;;  %1494 = vmatmul.bf16.vlgmr.msra.gmra.mxu1 %v1468_v0 }
 0x4a9   :  { %1507 = vmatmul.bf16.vlgmr.msra.gmra.mxu2 %v1468_v0  ;;  %1520 = vmatmul.bf16.vlgmr.msra.gmra.mxu3 %v1468_v0 }
 0x4aa   :  { %1649 = vmatpush.bf16.msra.mxu0 %v2352_v3  ;;  %1662 = vmatpush.bf16.msra.mxu1 %v2363_v7  ;;  %v2111_v3 = vld [vmem:[%s3495_s1 + $0x18] sm:$0xf]  ;;  %v3746_v7 = vld [vmem:[#allocation2_spill] sm:$0xff] }
 0x4ab   :  { %1675 = vmatpush.bf16.msra.mxu2 %v2365_v8  ;;  %1688 = vmatpush.bf16.msra.mxu3 %v2377_v12  ;;  %v3747_v8 = vld [vmem:[#allocation3_spill] sm:$0xff]  ;;  %v3748_v12 = vld [vmem:[#allocation4_spill] sm:$0xff] }
 0x4ae   :  { %1650 = vmatpush.bf16.msra.mxu0 %v2390_v16  ;;  %1663 = vmatpush.bf16.msra.mxu1 %v2392_v17  ;;  %v3749_v16 = vld [vmem:[#allocation5_spill] sm:$0xff]  ;;  %v3750_v17 = vld [vmem:[#allocation6_spill] sm:$0xff] }
 0x4af   :  { %1676 = vmatpush.bf16.msra.mxu2 %v2404_v21  ;;  %1689 = vmatpush.bf16.msra.mxu3 %v2415_v25  ;;  %v3751_v21 = vld [vmem:[#allocation7_spill] sm:$0xff]  ;;  %v3752_v25 = vld [vmem:[#allocation8_spill] sm:$0xff] }
 0x4b2   :  { %1651 = vmatpush.bf16.msra.mxu0 %v2427_v29  ;;  %1664 = vmatpush.bf16.msra.mxu1 %v2440_v33  ;;  %v3753_v29 = vld [vmem:[#allocation9_spill] sm:$0xff]  ;;  %v3754_v33 = vld [vmem:[#allocation10_spill] sm:$0xff] }
 0x4b3   :  { %1677 = vmatpush.bf16.msra.mxu2 %v2442_v34  ;;  %1690 = vmatpush.bf16.msra.mxu3 %v2454_v38  ;;  %v3755_v34 = vld [vmem:[#allocation11_spill] sm:$0xff]  ;;  %v3756_v38 = vld [vmem:[#allocation12_spill] sm:$0xff] }
 0x4b6   :  { %1652 = vmatpush.bf16.msra.mxu0 %v2472_v44  ;;  %1665 = vmatpush.bf16.msra.mxu1 %v2476_v45  ;;  %v3757_v44 = vld [vmem:[#allocation13_spill] sm:$0xff]  ;;  %v3758_v45 = vld [vmem:[#allocation14_spill] sm:$0xff] }
 0x4b7   :  { %1678 = vmatpush.bf16.msra.mxu2 %v2478_v46  ;;  %1691 = vmatpush.bf16.msra.mxu3 %v2490_v50  ;;  %v3759_v46 = vld [vmem:[#allocation15_spill] sm:$0xff]  ;;  %v3760_v50 = vld [vmem:[#allocation16_spill] sm:$0xff] }
 0x4b8   :  { %1533 = vmatmul.bf16.vlgmr.msrb.gmra.mxu0 %v2111_v3  ;;  %1546 = vmatmul.bf16.vlgmr.msrb.gmra.mxu1 %v2111_v3 }
 0x4b9   :  { %1559 = vmatmul.bf16.vlgmr.msrb.gmra.mxu2 %v2111_v3  ;;  %1572 = vmatmul.bf16.vlgmr.msrb.gmra.mxu3 %v2111_v3  ;;  %v3775_v3 = vld [vmem:[#allocation31_spill] sm:$0xff] }
 0x4ba   :  { %1653 = vmatpush.bf16.msra.mxu0 %v2508_v56  ;;  %1666 = vmatpush.bf16.msra.mxu1 %v2512_v57  ;;  %v3761_v56 = vld [vmem:[#allocation17_spill] sm:$0xff]  ;;  %v3762_v57 = vld [vmem:[#allocation18_spill] sm:$0xff] }
 0x4bb   :  { %1679 = vmatpush.bf16.msra.mxu2 %v2514_v58  ;;  %1692 = vmatpush.bf16.msra.mxu3 %v2526_v62  ;;  %v3763_v58 = vld [vmem:[#allocation19_spill] sm:$0xff]  ;;  %v3764_v62 = vld [vmem:[#allocation20_spill] sm:$0xff] }
 0x4be   :  { %1654 = vmatpush.bf16.msra.mxu0 %v2544_v5  ;;  %1667 = vmatpush.bf16.msra.mxu1 %v2548_v6  ;;  %v3765_v5 = vld [vmem:[#allocation21_spill] sm:$0xff]  ;;  %v3766_v6 = vld [vmem:[#allocation22_spill] sm:$0xff] }
 0x4bf   :  { %1680 = vmatpush.bf16.msra.mxu2 %v2550_v9  ;;  %1693 = vmatpush.bf16.msra.mxu3 %v2562_v14  ;;  %v3767_v9 = vld [vmem:[#allocation23_spill] sm:$0xff]  ;;  %v3768_v14 = vld [vmem:[#allocation24_spill] sm:$0xff] }
 0x4c2   :  { %1655 = vmatpush.bf16.msra.mxu0 %v2580_v23  ;;  %1668 = vmatpush.bf16.msra.mxu1 %v2590_v27  ;;  %v3769_v23 = vld [vmem:[#allocation25_spill] sm:$0xff]  ;;  %v3770_v27 = vld [vmem:[#allocation26_spill] sm:$0xff] }
 0x4c3   :  { %1681 = vmatpush.bf16.msra.mxu2 %v2592_v28  ;;  %1694 = vmatpush.bf16.msra.mxu3 %v2604_v35  ;;  %v3771_v28 = vld [vmem:[#allocation27_spill] sm:$0xff] }
 0x4c6   :  { %1656 = vmatpush.bf16.msra.mxu0 %v2625_v43  ;;  %1669 = vmatpush.bf16.msra.mxu1 %v2638_v51 }
 0x4c7   :  { %1682 = vmatpush.bf16.msra.mxu2 %v2640_v52  ;;  %1695 = vmatpush.bf16.msra.mxu3 %v2652_v59 }
 0x4ca   :  { %1701 = vmatpush.bf16.msrb.mxu0 %v2654_v60  ;;  %1714 = vmatpush.bf16.msrb.mxu1 %v2656_v61 }
 0x4cb   :  { %1727 = vmatpush.bf16.msrb.mxu2 %v2658_v63  ;;  %1740 = vmatpush.bf16.msrb.mxu3 %v2670_v4 }
 0x4ce   :  { %1702 = vmatpush.bf16.msrb.mxu0 %v2691_v20  ;;  %1715 = vmatpush.bf16.msrb.mxu1 %v2695_v22 }
 0x4cf   :  { %1728 = vmatpush.bf16.msrb.mxu2 %v3746_v7  ;;  %1741 = vmatpush.bf16.msrb.mxu3 %v3747_v8 }
 0x4d2   :  { %1703 = vmatpush.bf16.msrb.mxu0 %v3748_v12  ;;  %1716 = vmatpush.bf16.msrb.mxu1 %v3749_v16 }
 0x4d3   :  { %1729 = vmatpush.bf16.msrb.mxu2 %v3750_v17  ;;  %1742 = vmatpush.bf16.msrb.mxu3 %v3751_v21 }
 0x4d6   :  { %1704 = vmatpush.bf16.msrb.mxu0 %v3752_v25  ;;  %1717 = vmatpush.bf16.msrb.mxu1 %v3753_v29 }
 0x4d7   :  { %1730 = vmatpush.bf16.msrb.mxu2 %v3754_v33  ;;  %1743 = vmatpush.bf16.msrb.mxu3 %v3755_v34 }
 0x4da   :  { %1705 = vmatpush.bf16.msrb.mxu0 %v3756_v38  ;;  %1718 = vmatpush.bf16.msrb.mxu1 %v3757_v44 }
 0x4db   :  { %1731 = vmatpush.bf16.msrb.mxu2 %v3758_v45  ;;  %1744 = vmatpush.bf16.msrb.mxu3 %v3759_v46 }
 0x4de   :  { %1706 = vmatpush.bf16.msrb.mxu0 %v3760_v50  ;;  %1719 = vmatpush.bf16.msrb.mxu1 %v3761_v56 }
 0x4df   :  { %1732 = vmatpush.bf16.msrb.mxu2 %v3762_v57  ;;  %1745 = vmatpush.bf16.msrb.mxu3 %v3763_v58 }
 0x4e2   :  { %1707 = vmatpush.bf16.msrb.mxu0 %v3764_v62  ;;  %1720 = vmatpush.bf16.msrb.mxu1 %v3765_v5 }
 0x4e3   :  { %1733 = vmatpush.bf16.msrb.mxu2 %v3766_v6  ;;  %1746 = vmatpush.bf16.msrb.mxu3 %v3767_v9 }
 0x4e6   :  { %1708 = vmatpush.bf16.msrb.mxu0 %v3768_v14  ;;  %1721 = vmatpush.bf16.msrb.mxu1 %v3769_v23 }
 0x4e7   :  { %1734 = vmatpush.bf16.msrb.mxu2 %v3770_v27  ;;  %1747 = vmatpush.bf16.msrb.mxu3 %v3771_v28 }
 0x525   :  { %v1482_v35 = vpop.f32.mrf.mxu0  ;;  %v1495_v43 = vpop.f32.mrf.mxu1 }
 0x52c   :  { %v1508_v51 = vpop.f32.mrf.mxu2  ;;  %v1521_v52 = vpop.f32.mrf.mxu3 }
 0x52d   :  { %v1484_v59 = vpop.f32.mrf.mxu0  ;;  %v1497_v60 = vpop.f32.mrf.mxu1 }
 0x534   :  { %v1510_v61 = vpop.f32.mrf.mxu2  ;;  %v1523_v63 = vpop.f32.mrf.mxu3 }
 0x535   :  { %v1534_v4 = vpop.f32.mrf.mxu0  ;;  %v1547_v20 = vpop.f32.mrf.mxu1 }
 0x536   :  { %v1535_v22 = vadd.f32 %v1534_v4, %v1482_v35  ;;  %v1548_v30 = vadd.f32 %v1547_v20, %v1495_v43 }
 0x538   :  { %v1577_v19 = vadd.f32 %v1535_v22, %v3772_v36  ;;  %v1578_v13 = vadd.f32 %v1548_v30, %v3773_v10 }
 0x53a   :  { %v2112_v37 = vmul.f32 -1.442695, %v1577_v19  ;;  %v2113_v31 = vmul.f32 -1.442695, %v1578_v13 }
 0x53c   :  { %2281 = vpow2.f32 %v2112_v37  ;;  %v1560_v42 = vpop.f32.mrf.mxu2  ;;  %v1573_v2 = vpop.f32.mrf.mxu3 }
 0x53d   :  { %2283 = vpow2.f32 %v2113_v31  ;;  %v1574_v11 = vadd.f32 %v1573_v2, %v1521_v52  ;;  %v1536_v54 = vpop.f32.mrf.mxu0  ;;  %v1549_v24 = vpop.f32.mrf.mxu1  ;;  %v1561_v47 = vadd.f32 %v1560_v42, %v1508_v51 }
 0x53f   :  { %v1580_v39 = vadd.f32 %v1574_v11, %v3774_v18  ;;  %v1579_v7 = vadd.f32 %v1561_v47, %v3775_v3 }
 0x541   :  { %v2114_v55 = vmul.f32 -1.442695, %v1580_v39 }
 0x542   :  { %v2282_v41 = vpop.eup %2281 }
 0x543   :  { %v2284_v40 = vpop.eup %2283  ;;  %v1584_v26 = vadd.f32 1.0, %v2282_v41  ;;  %2285 = vpow2.f32 %v2114_v55 }
 0x544   :  { %v1603_v15 = vadd.f32 1.0, %v2284_v40  ;;  %v1575_v48 = vpop.f32.mrf.mxu3  ;;  %v1562_v53 = vpop.f32.mrf.mxu2 }
 0x545   :  { %2287 = vrcp.f32 %v1584_v26  ;;  %v1596_v25 = vand.u32 2147483648, %v1584_v26  ;;  %v1594_v34 = vand.u32 2147483647, %v1584_v26  ;;  %vm1590_vm10 = vweird.f32 %v1584_v26 }
 0x546   :  { %2289 = vrcp.f32 %v1603_v15  ;;  %v1615_v29 = vand.u32 2147483648, %v1603_v15  ;;  %v1613_v44 = vand.u32 2147483647, %v1603_v15  ;;  %vm1609_vm11 = vweird.f32 %v1603_v15 }
 0x547   :  { %v1597_v50 = vor.u32 1.1754944e-38, %v1596_v25  ;;  %vm1595_vm14 = vcmp.eq.f32.partialorder %v1594_v34, 8.507059e+37 }
 0x548   :  { %v1616_v58 = vor.u32 1.1754944e-38, %v1615_v29  ;;  %vm1614_vm15 = vcmp.eq.f32.partialorder %v1613_v44, 8.507059e+37 }
 0x549   :  { %v2286_v49 = vpop.eup %2285 }
 0x54a   :  { %v1623_v1 = vadd.f32 1.0, %v2286_v49 }
 0x54b   :  { %v2288_v0 = vpop.eup %2287 }
 0x54c   :  { %v2290_v8 = vpop.eup %2289  ;;  %v1586_v12 = vmul.f32 %v2288_v0, %v1584_v26  ;;  %2291 = vrcp.f32 %v1623_v1  ;;  %vm1591_vm8 = vweird.f32 %v2288_v0  ;;  %v1635_v52 = vand.u32 2147483648, %v1623_v1 }
 0x54d   :  { %v1605_v16 = vmul.f32 %v2290_v8, %v1603_v15  ;;  %2293 = vtanh.f32 %v1579_v7  ;;  %vm1610_vm9 = vweird.f32 %v2290_v8  ;;  %vm1592_vm12 = vmor %vm1590_vm10, %vm1591_vm8  ;;  %vm1629_vm1 = vweird.f32 %v1623_v1 }
 0x54e   :  { %v1587_v17 = vsub.f32 1.0, %v1586_v12  ;;  %vm1611_vm13 = vmor %vm1609_vm11, %vm1610_vm9  ;;  %v1633_v59 = vand.u32 2147483647, %v1623_v1  ;;  %v1636_v61 = vor.u32 1.1754944e-38, %v1635_v52 }
 0x54f   :  { %v1606_v21 = vsub.f32 1.0, %v1605_v16 }
 0x550   :  { %v1588_v33 = vmul.f32 %v2288_v0, %v1587_v17  ;;  %vm1634_vm3 = vcmp.eq.f32.partialorder %v1633_v59, 8.507059e+37 }
 0x551   :  { %v1607_v38 = vmul.f32 %v2290_v8, %v1606_v21 }
 0x552   :  { %v2292_v45 = vpop.eup %2291  ;;  %v1589_v46 = vadd.f32 %v2288_v0, %v1588_v33 }
 0x553   :  { %v1608_v56 = vadd.f32 %v2290_v8, %v1607_v38  ;;  %v1625_v57 = vmul.f32 %v2292_v45, %v1623_v1  ;;  %v2294_v5 = vpop.eup %2293  ;;  %vm1630_vm0 = vweird.f32 %v2292_v45 }
 0x554   :  { %v1593_v62 = vsel %vm1592_vm12, %v2288_v0, %v1589_v46  ;;  %vm1631_vm2 = vmor %vm1629_vm1, %vm1630_vm0 }
 0x555   :  { %v1598_v6 = vsel %vm1595_vm14, %v1597_v50, %v1593_v62  ;;  %v1612_v9 = vsel %vm1611_vm13, %v2290_v8, %v1608_v56  ;;  %v1626_v14 = vsub.f32 1.0, %v1625_v57 }
 0x556   :  { %v1617_v23 = vsel %vm1614_vm15, %v1616_v58, %v1612_v9  ;;  %v1640_v27 = vmul.f32 %v2294_v5, %v1598_v6 }
 0x557   :  { %v1639_v28 = vmul.f32 %v1617_v23, %v3397_v32  ;;  %v1627_v35 = vmul.f32 %v2292_v45, %v1626_v14  ;;  %v2116_v32 = vld [vmem:[%s3495_s1 + $0x1c] sm:$0xf] }
 0x559   :  { %v3475_v43 = vadd.f32 %v1640_v27, %v1639_v28  ;;  %v1628_v51 = vadd.f32 %v2292_v45, %v1627_v35 }
 0x55b   :  { %2295 = vtanh.f32 %v3475_v43  ;;  %v1632_v60 = vsel %vm1631_vm2, %v2292_v45, %v1628_v51 }
 0x55c   :  { %v1637_v4 = vsel %vm1634_vm3, %v1636_v61, %v1632_v60 }
 0x561   :  { %v2296_v63 = vpop.eup %2295 }
 0x562   :  { %v1643_v20 = vmul.f32 %v2296_v63, %v1637_v4 }
 0x564   :  { %v1644_v22 = vpack.c.bf16 %v1643_v20, %v1643_v20 }
 0x566   :  { %2115 = vst [vmem:[%s3497_s5 + $0x18] sm:$0xf] %v1644_v22  ;;  %1657 = vmatmul.bf16.vlgmr.msra.gmra.mxu0 %v1644_v22  ;;  %1670 = vmatmul.bf16.vlgmr.msra.gmra.mxu1 %v1644_v22 }
 0x567   :  { %1683 = vmatmul.bf16.vlgmr.msra.gmra.mxu2 %v1644_v22  ;;  %1696 = vmatmul.bf16.vlgmr.msra.gmra.mxu3 %v1644_v22 }
 0x576   :  { %1709 = vmatmul.bf16.vlgmr.msrb.gmra.mxu0 %v2116_v32  ;;  %1722 = vmatmul.bf16.vlgmr.msrb.gmra.mxu1 %v2116_v32 }
 0x577   :  { %1735 = vmatmul.bf16.vlgmr.msrb.gmra.mxu2 %v2116_v32  ;;  %1748 = vmatmul.bf16.vlgmr.msrb.gmra.mxu3 %v2116_v32 }
 0x5e3   :  { %v1658_v30 = vpop.f32.mrf.mxu0  ;;  %v1671_v19 = vpop.f32.mrf.mxu1 }
 0x5ea   :  { %v1684_v13 = vpop.f32.mrf.mxu2  ;;  %v1697_v37 = vpop.f32.mrf.mxu3 }
 0x5eb   :  { %v1660_v31 = vpop.f32.mrf.mxu0  ;;  %v1673_v42 = vpop.f32.mrf.mxu1 }
 0x5f2   :  { %v1686_v2 = vpop.f32.mrf.mxu2  ;;  %v1699_v11 = vpop.f32.mrf.mxu3 }
 0x5f3   :  { %v1710_v54 = vpop.f32.mrf.mxu0  ;;  %v1723_v24 = vpop.f32.mrf.mxu1 }
 0x5f4   :  { %v1711_v39 = vadd.f32 %v1710_v54, %v1658_v30  ;;  %v1724_v55 = vadd.f32 %v1723_v24, %v1671_v19 }
 0x5f6   :  { %v1753_v41 = vadd.f32 %v1711_v39, %v3772_v36  ;;  %v1754_v40 = vadd.f32 %v1724_v55, %v3773_v10 }
 0x5f8   :  { %v2117_v26 = vmul.f32 -1.442695, %v1753_v41  ;;  %v2118_v15 = vmul.f32 -1.442695, %v1754_v40 }
 0x5fa   :  { %2297 = vpow2.f32 %v2117_v26  ;;  %v1736_v48 = vpop.f32.mrf.mxu2  ;;  %v1749_v53 = vpop.f32.mrf.mxu3 }
 0x5fb   :  { %2299 = vpow2.f32 %v2118_v15  ;;  %v1750_v47 = vadd.f32 %v1749_v53, %v1697_v37  ;;  %v1712_v49 = vpop.f32.mrf.mxu0  ;;  %v1725_v1 = vpop.f32.mrf.mxu1  ;;  %v1737_v10 = vadd.f32 %v1736_v48, %v1684_v13 }
 0x5fd   :  { %v1756_v0 = vadd.f32 %v1750_v47, %v3774_v18  ;;  %v1755_v34 = vadd.f32 %v1737_v10, %v3775_v3 }
 0x5ff   :  { %v2119_v7 = vmul.f32 -1.442695, %v1756_v0 }
 0x600   :  { %v2298_v8 = vpop.eup %2297 }
 0x601   :  { %v2300_v12 = vpop.eup %2299  ;;  %v1760_v16 = vadd.f32 1.0, %v2298_v8  ;;  %2301 = vpow2.f32 %v2119_v7 }
 0x602   :  { %v1779_v17 = vadd.f32 1.0, %v2300_v12  ;;  %v1751_v36 = vpop.f32.mrf.mxu3  ;;  %v1738_v21 = vpop.f32.mrf.mxu2 }
 0x603   :  { %2303 = vrcp.f32 %v1760_v16  ;;  %v1772_v50 = vand.u32 2147483648, %v1760_v16  ;;  %v1770_v58 = vand.u32 2147483647, %v1760_v16  ;;  %vm1766_vm6 = vweird.f32 %v1760_v16 }
 0x604   :  { %2305 = vrcp.f32 %v1779_v17  ;;  %v1791_v56 = vand.u32 2147483648, %v1779_v17  ;;  %v1789_v5 = vand.u32 2147483647, %v1779_v17  ;;  %vm1785_vm7 = vweird.f32 %v1779_v17 }
 0x605   :  { %v1773_v3 = vor.u32 1.1754944e-38, %v1772_v50  ;;  %vm1771_vm10 = vcmp.eq.f32.partialorder %v1770_v58, 8.507059e+37 }
 0x606   :  { %v1792_v27 = vor.u32 1.1754944e-38, %v1791_v56  ;;  %vm1790_vm11 = vcmp.eq.f32.partialorder %v1789_v5, 8.507059e+37 }
 0x607   :  { %v2302_v25 = vpop.eup %2301 }
 0x608   :  { %v1799_v29 = vadd.f32 1.0, %v2302_v25 }
 0x609   :  { %v2304_v33 = vpop.eup %2303 }
 0x60a   :  { %v2306_v38 = vpop.eup %2305  ;;  %v1762_v44 = vmul.f32 %v2304_v33, %v1760_v16  ;;  %2307 = vrcp.f32 %v1799_v29  ;;  %vm1767_vm4 = vweird.f32 %v2304_v33  ;;  %v1811_v32 = vand.u32 2147483648, %v1799_v29 }
 0x60b   :  { %v1781_v18 = vmul.f32 %v2306_v38, %v1779_v17  ;;  %2309 = vtanh.f32 %v1755_v34  ;;  %vm1786_vm5 = vweird.f32 %v2306_v38  ;;  %vm1768_vm8 = vmor %vm1766_vm6, %vm1767_vm4  ;;  %vm1805_vm13 = vweird.f32 %v1799_v29 }
 0x60c   :  { %v1763_v45 = vsub.f32 1.0, %v1762_v44  ;;  %vm1787_vm9 = vmor %vm1785_vm7, %vm1786_vm5  ;;  %v1809_v30 = vand.u32 2147483647, %v1799_v29  ;;  %v1812_v13 = vor.u32 1.1754944e-38, %v1811_v32 }
 0x60d   :  { %v1782_v46 = vsub.f32 1.0, %v1781_v18 }
 0x60e   :  { %v1764_v57 = vmul.f32 %v2304_v33, %v1763_v45  ;;  %vm1810_vm15 = vcmp.eq.f32.partialorder %v1809_v30, 8.507059e+37 }
 0x60f   :  { %v1783_v62 = vmul.f32 %v2306_v38, %v1782_v46 }
 0x610   :  { %v2308_v6 = vpop.eup %2307  ;;  %v1765_v9 = vadd.f32 %v2304_v33, %v1764_v57 }
 0x611   :  { %v1784_v14 = vadd.f32 %v2306_v38, %v1783_v62  ;;  %v1801_v23 = vmul.f32 %v2308_v6, %v1799_v29  ;;  %v2310_v35 = vpop.eup %2309  ;;  %vm1806_vm12 = vweird.f32 %v2308_v6 }
 0x612   :  { %v1769_v28 = vsel %vm1768_vm8, %v2304_v33, %v1765_v9  ;;  %vm1807_vm14 = vmor %vm1805_vm13, %vm1806_vm12 }
 0x613   :  { %v1774_v51 = vsel %vm1771_vm10, %v1773_v3, %v1769_v28  ;;  %v1788_v52 = vsel %vm1787_vm9, %v2306_v38, %v1784_v14  ;;  %v1802_v59 = vsub.f32 1.0, %v1801_v23 }
 0x614   :  { %v1793_v60 = vsel %vm1790_vm11, %v1792_v27, %v1788_v52  ;;  %v1816_v61 = vmul.f32 %v2310_v35, %v1774_v51 }
 0x615   :  { %v1815_v63 = vmul.f32 %v1793_v60, %v3475_v43  ;;  %v1803_v4 = vmul.f32 %v2308_v6, %v1802_v59 }
 0x617   :  { %v1817_v20 = vadd.f32 %v1816_v61, %v1815_v63  ;;  %v1804_v22 = vadd.f32 %v2308_v6, %v1803_v4 }
 0x619   :  { %2311 = vtanh.f32 %v1817_v20  ;;  %v1808_v19 = vsel %vm1807_vm14, %v2308_v6, %v1804_v22 }
 0x61a   :  { %v1813_v31 = vsel %vm1810_vm15, %v1812_v13, %v1808_v19 }
 0x61f   :  { %v2312_v37 = vpop.eup %2311 }
 0x620   :  { %v1819_v42 = vmul.f32 %v2312_v37, %v1813_v31 }
 0x622   :  { %v1820_v2 = vpack.c.bf16 %v1819_v42, %v1819_v42 }
 0x624   :  { %2120 = vst [vmem:[%s3497_s5 + $0x1c] sm:$0xf] %v1820_v2 }

</bundles_post_ra>
